<compile_context>
chip_gen: v5e
topology: v5e:2x2
jax: 0.10.0
libtpu: 0.0.40
codegen_flags: <defaults>
</compile_context>

<pallas_src>
import functools

import jax
import jax.numpy as jnp
from jax import lax
from jax.experimental import pallas as pl
from jax.experimental.pallas import tpu as pltpu


def _ceil_to(v, m):
    return ((v + m - 1) // m) * m


# ----------------------------------------------------------------------------
# In-kernel helpers
# ----------------------------------------------------------------------------
def _row_stats(y, e):
    """Per-row cosine stats of y vs e, produced LANE-DENSE as a (4, tm) block.

    Rows: cos, dot, |y|^2, |e|^2.  The row reductions are done with a
    (1, C) ones contraction so the MXU emits (1, tm) directly on lanes
    (no sublane->lane relayout, no masked narrow stores).
    """
    ones = jnp.ones((1, y.shape[1]), jnp.float32)
    cd = (((1,), (1,)), ((), ()))
    dot_r = lax.dot_general(ones, y * e, cd, preferred_element_type=jnp.float32)
    d2_r = lax.dot_general(ones, y * y, cd, preferred_element_type=jnp.float32)
    e2_r = lax.dot_general(ones, e * e, cd, preferred_element_type=jnp.float32)
    eps = jnp.float32(1e-8)
    cos_r = dot_r / (jnp.maximum(jnp.sqrt(d2_r), eps) *
                     jnp.maximum(jnp.sqrt(e2_r), eps))
    return jnp.concatenate([cos_r, dot_r, d2_r, e2_r], axis=0)       # (4, tm)


# ----------------------------------------------------------------------------
# Pallas kernels
# ----------------------------------------------------------------------------
def _sa_kernel(x_ref, wq_ref, bq_ref, wkv_ref, bkv_ref, g_ref, o_ref, *,
               cqp, tq):
    # x_ref: (N, C) bf16 (full map for this batch); output block: (tq, C) bf16.
    qi = pl.program_id(1)
    q_start = pl.multiple_of(qi * tq, 8)
    xq = x_ref[pl.ds(q_start, tq), :]                                # (tq, C)
    xf = x_ref[...]                                                  # (N, C)
    # 128-lane-aligned q / k|v projections (padded columns carry zero weights).
    q = jnp.dot(xq, wq_ref[...], preferred_element_type=jnp.float32) + bq_ref[...]
    kv = jnp.dot(xf, wkv_ref[...], preferred_element_type=jnp.float32) + bkv_ref[...]
    k = kv[:, :cqp]                                                  # (N, cqp)
    v = kv[:, cqp:]                                                  # (N, C)
    # energy[n, m] = sum_c q[n, c] * k[m, c]   (== bmm(qT, k) in torch)
    energy = lax.dot_general(q.astype(jnp.bfloat16), k.astype(jnp.bfloat16),
                             (((1,), (1,)), ((), ())),
                             preferred_element_type=jnp.float32)     # (tq, N)
    energy = energy - jnp.max(energy, axis=-1, keepdims=True)
    p = jnp.exp(energy)
    s = jnp.sum(p, axis=-1, keepdims=True)                           # (tq, 1)
    pv = jnp.dot(p.astype(jnp.bfloat16), v.astype(jnp.bfloat16),
                 preferred_element_type=jnp.float32)                 # (tq, C)
    g = g_ref[0, 0]                                                  # SMEM scalar
    out = g * (pv * pl.reciprocal(s, approx=True)) + xq.astype(jnp.float32)
    o_ref[...] = out.astype(o_ref.dtype)


def _pwconv_kernel(x_ref, w_ref, b_ref, o_ref, *, relu):
    # 1x1 conv == matmul over channels: (R, Cin) @ (Cin, Cout) + bias
    y = jnp.dot(x_ref[...], w_ref[...],
                preferred_element_type=jnp.float32) + b_ref[...]
    if relu:
        y = jnp.maximum(y, 0.0)
    o_ref[...] = y.astype(o_ref.dtype)


def _pwconv_add_cos_kernel(x_ref, w_ref, b_ref, a_ref, e_ref, d_ref, st_ref, *,
                           relu):
    # Fused decoder stage: skip-branch 1x1 conv + (upsampled coarse branch) add
    # + bias + ReLU, then per-row channel cosine stats vs the encoder target.
    y = jnp.dot(x_ref[...], w_ref[...], preferred_element_type=jnp.float32)
    y = y + b_ref[...] + a_ref[...].astype(jnp.float32)
    if relu:
        y = jnp.maximum(y, 0.0)
    d_ref[...] = y.astype(d_ref.dtype)
    st_ref[...] = _row_stats(y, e_ref[...].astype(jnp.float32))


def _cos_kernel(d_ref, e_ref, st_ref):
    st_ref[...] = _row_stats(d_ref[...].astype(jnp.float32),
                             e_ref[...].astype(jnp.float32))


# ----------------------------------------------------------------------------
# Row-tiling helpers (fold batch+spatial into the sublane axis)
# ----------------------------------------------------------------------------
def _row_plan(rows):
    """Returns (padded_rows, tile).  Tile is 512 for big maps, two tiles for
    medium maps (v7x dual TensorCores), a single block for tiny maps.  All
    multi-tile cases use a 128-multiple tile so (4, rows) stats outputs stay
    lane-dense and block-legal."""
    if rows >= 1024:
        tm = 512
        return _ceil_to(rows, tm), tm
    if rows >= 256:
        tm = _ceil_to((rows + 1) // 2, 128)
        return 2 * tm, tm
    rp = _ceil_to(rows, 8)
    return rp, rp


def _pad_rows(a2d, rp):
    rows = a2d.shape[0]
    if rp == rows:
        return a2d
    return jnp.pad(a2d, ((0, rp - rows), (0, 0)))


def _flat_cos_from_stats(st, B, hw):
    # st: (4, rows) ; rows = B*hw.  Per-batch flattened cosine from partials.
    dot_b = jnp.sum(st[1].reshape(B, hw), axis=1)
    d2_b = jnp.sum(st[2].reshape(B, hw), axis=1)
    e2_b = jnp.sum(st[3].reshape(B, hw), axis=1)
    eps = jnp.float32(1e-8)
    return dot_b / (jnp.maximum(jnp.sqrt(d2_b), eps) *
                    jnp.maximum(jnp.sqrt(e2_b), eps))


# ----------------------------------------------------------------------------
# Pallas wrappers (all channels-last, bf16 activation streams)
# ----------------------------------------------------------------------------
def sa_apply_nhwc(x, p):
    """Position attention (SA) module on an NHWC feature map (bf16 in/out)."""
    B, H, W, C = x.shape
    N = H * W
    cqp = p['wq'].shape[1]
    ckv = p['wkv'].shape[1]
    if N <= 512:
        tq = N
    elif N % 512 == 0:
        tq = 512
    elif N % 256 == 0:
        tq = 256
    else:
        tq = N   # TODO(synk): pad N / flash-tile keys for awkward shapes.
    nq = N // tq
    x_nlc = x.reshape(B, N, C).astype(jnp.bfloat16)
    out = pl.pallas_call(
        functools.partial(_sa_kernel, cqp=cqp, tq=tq),
        out_shape=jax.ShapeDtypeStruct((B, N, C), jnp.bfloat16),
        grid=(B, nq),
        in_specs=[
            pl.BlockSpec((pl.Squeezed(), N, C), lambda b, q: (b, 0, 0)),
            pl.BlockSpec((C, cqp), lambda b, q: (0, 0)),
            pl.BlockSpec((1, cqp), lambda b, q: (0, 0)),
            pl.BlockSpec((C, ckv), lambda b, q: (0, 0)),
            pl.BlockSpec((1, ckv), lambda b, q: (0, 0)),
            pl.BlockSpec(memory_space=pltpu.MemorySpace.SMEM),   # gamma scalar
        ],
        out_specs=pl.BlockSpec((pl.Squeezed(), tq, C), lambda b, q: (b, q, 0)),
        compiler_params=pltpu.CompilerParams(
            dimension_semantics=("parallel", "parallel"),
            vmem_limit_bytes=64 * 1024 * 1024),
    )(x_nlc, p['wq'], p['bq'], p['wkv'], p['bkv'], p['gamma'])
    return out.reshape(B, H, W, C)


def pwconv_nhwc(x, w, b, relu=True):
    """1x1 convolution on NHWC via a batch-folded Pallas matmul kernel."""
    B, H, W, Cin = x.shape
    Cout = w.shape[1]
    rows = B * H * W
    rp, tm = _row_plan(rows)
    xr = _pad_rows(x.reshape(rows, Cin).astype(jnp.bfloat16), rp)
    y = pl.pallas_call(
        functools.partial(_pwconv_kernel, relu=relu),
        out_shape=jax.ShapeDtypeStruct((rp, Cout), jnp.bfloat16),
        grid=(rp // tm,),
        in_specs=[pl.BlockSpec((tm, Cin), lambda i: (i, 0)),
                  pl.BlockSpec((Cin, Cout), lambda i: (0, 0)),
                  pl.BlockSpec((1, Cout), lambda i: (0, 0))],
        out_specs=pl.BlockSpec((tm, Cout), lambda i: (i, 0)),
        compiler_params=pltpu.CompilerParams(
            dimension_semantics=("parallel",)),
    )(xr, w, b)
    return y[:rows].reshape(B, H, W, Cout)


def pwconv_add_cos_nhwc(x, w, b, a, e, relu=True):
    """Fused decoder stage: (x @ w + b + a), ReLU, channel cosine vs target e.

    Returns (d_nhwc bf16, per-pixel cos map (B,H,W) f32, per-batch flat cos).
    """
    B, H, W, Cin = x.shape
    Cout = w.shape[1]
    rows = B * H * W
    rp, tm = _row_plan(rows)
    xr = _pad_rows(x.reshape(rows, Cin).astype(jnp.bfloat16), rp)
    ar = _pad_rows(a.reshape(rows, Cout).astype(jnp.bfloat16), rp)
    er = _pad_rows(e.reshape(rows, Cout).astype(jnp.bfloat16), rp)
    d, st = pl.pallas_call(
        functools.partial(_pwconv_add_cos_kernel, relu=relu),
        out_shape=(jax.ShapeDtypeStruct((rp, Cout), jnp.bfloat16),
                   jax.ShapeDtypeStruct((4, rp), jnp.float32)),
        grid=(rp // tm,),
        in_specs=[pl.BlockSpec((tm, Cin), lambda i: (i, 0)),
                  pl.BlockSpec((Cin, Cout), lambda i: (0, 0)),
                  pl.BlockSpec((1, Cout), lambda i: (0, 0)),
                  pl.BlockSpec((tm, Cout), lambda i: (i, 0)),
                  pl.BlockSpec((tm, Cout), lambda i: (i, 0))],
        out_specs=(pl.BlockSpec((tm, Cout), lambda i: (i, 0)),
                   pl.BlockSpec((4, tm), lambda i: (0, i))),
        compiler_params=pltpu.CompilerParams(
            dimension_semantics=("parallel",)),
    )(xr, w, b, ar, er)
    d = d[:rows].reshape(B, H, W, Cout)
    st = st[:, :rows]
    cos_map = st[0].reshape(B, H, W)
    return d, cos_map, _flat_cos_from_stats(st, B, H * W)


def cos_nhwc(d, e):
    """Channel cosine of two NHWC maps (lane-dense (4, rows) stats output)."""
    B, H, W, C = d.shape
    rows = B * H * W
    rp, tm = _row_plan(rows)
    dr = _pad_rows(d.reshape(rows, C).astype(jnp.bfloat16), rp)
    er = _pad_rows(e.reshape(rows, C).astype(jnp.bfloat16), rp)
    st = pl.pallas_call(
        _cos_kernel,
        out_shape=jax.ShapeDtypeStruct((4, rp), jnp.float32),
        grid=(rp // tm,),
        in_specs=[pl.BlockSpec((tm, C), lambda i: (i, 0)),
                  pl.BlockSpec((tm, C), lambda i: (i, 0))],
        out_specs=pl.BlockSpec((4, tm), lambda i: (0, i)),
        compiler_params=pltpu.CompilerParams(
            dimension_semantics=("parallel",)),
    )(dr, er)
    st = st[:, :rows]
    cos_map = st[0].reshape(B, H, W)
    return cos_map, _flat_cos_from_stats(st, B, H * W)


# ----------------------------------------------------------------------------
# JAX glue (pooling, upsampling, stand-in backbones, loss assembly)
# ----------------------------------------------------------------------------
def avg_pool_nhwc(x, k):
    B, H, W, C = x.shape
    return x.reshape(B, H // k, k, W // k, k, C).mean(axis=(2, 4))


def upsample_nearest_nhwc(x, k):
    return jnp.repeat(jnp.repeat(x, k, axis=1), k, axis=2)


def upsample_nearest_nchw(x, k):        # F.interpolate(..., mode='nearest')
    return jnp.repeat(jnp.repeat(x, k, axis=2), k, axis=3)


def encoder_forward(x, ep):
    # stand-in for resnet50 feature pyramid (strides 4/8/16/32), NHWC, bf16 out
    h = avg_pool_nhwc(x, 4)
    e1 = pwconv_nhwc(h, ep['w1'], ep['b1'])
    h = avg_pool_nhwc(e1, 2)
    e2 = pwconv_nhwc(h, ep['w2'], ep['b2'])
    h = avg_pool_nhwc(e2, 2)
    e3 = pwconv_nhwc(h, ep['w3'], ep['b3'])
    h = avg_pool_nhwc(e3, 2)
    e4 = pwconv_nhwc(h, ep['w4'], ep['b4'])
    return e1, e2, e3, e4


def decoder_cos_forward(feats, targets, dp):
    """Stand-in skip-connected decoder with the per-scale cosine stats fused in.

    The 1x1 conv over concat([upsample(coarse), skip]) is split at the channel
    boundary; the coarse branch is convolved at coarse resolution (nearest
    upsample commutes with a 1x1 conv) and only its small result is upsampled.
    """
    _, e2_sa, e3_sa, e4 = feats
    t1, t2, t3 = targets
    z3 = jnp.zeros((1, dp['w3a'].shape[1]), jnp.float32)
    z2 = jnp.zeros((1, dp['w2a'].shape[1]), jnp.float32)

    u3 = upsample_nearest_nhwc(pwconv_nhwc(e4, dp['w3a'], z3, relu=False), 2)
    d3, cm3, fc3 = pwconv_add_cos_nhwc(e3_sa, dp['w3b'], dp['b3'], u3, t3)

    u2 = upsample_nearest_nhwc(pwconv_nhwc(d3, dp['w2a'], z2, relu=False), 2)
    d2, cm2, fc2 = pwconv_add_cos_nhwc(e2_sa, dp['w2b'], dp['b2'], u2, t2)

    # Stage 1 has no skip: conv+bias+ReLU at coarse res, upsample, cosine.
    d1 = upsample_nearest_nhwc(pwconv_nhwc(d2, dp['w1'], dp['b1'], relu=True), 2)
    cm1, fc1 = cos_nhwc(d1, t1)
    return (cm1, cm2, cm3), (fc1, fc2, fc3)


def channel_std_nhwc(e):
    # F.normalize(e.permute(1,0,2,3).flatten(1), dim=0).std(dim=1).mean()
    C = e.shape[-1]
    f = e.astype(jnp.float32).reshape(-1, C).T                # (C, B*H*W)
    norms = jnp.sqrt(jnp.sum(f * f, axis=0, keepdims=True))
    fn = f / jnp.maximum(norms, 1e-12)
    return jnp.mean(jnp.std(fn, axis=1, ddof=1))              # unbiased std


def e2ad_forward(x_nchw, params):
    # Single NCHW -> NHWC transpose at the model boundary; everything inside
    # stays channels-last.  x and rot180(x) share encoder weights, so they are
    # batched through the encoder in one set of pallas_calls.
    x = jnp.transpose(x_nchw, (0, 2, 3, 1)).astype(jnp.float32)
    B = x.shape[0]
    x_rot = x[:, ::-1, ::-1, :]                               # rot90 x2 (180 deg)
    xx = jnp.concatenate([x, x_rot], axis=0)                  # (2B, H, W, 3)

    e1, e2, e3, e4 = encoder_forward(xx, params['enc'])
    e1_1, e1_2 = e1[:B], e1[B:]
    e2_1, e2_2 = e2[:B], e2[B:]
    e3_1, e3_2 = e3[:B], e3[B:]
    e4_1, e4_2 = e4[:B], e4[B:]

    e4_1_g = jnp.mean(e4_1.astype(jnp.float32), axis=(1, 2))  # adaptive avgpool
    e4_2_g = jnp.mean(e4_2.astype(jnp.float32), axis=(1, 2))

    e2_1_sa = sa_apply_nhwc(e2_1, params['sa2'])
    e3_1_sa = sa_apply_nhwc(e3_1, params['sa1'])
    e2_2_sa = sa_apply_nhwc(e2_2, params['sa4'])
    e3_2_sa = sa_apply_nhwc(e3_2, params['sa3'])

    cms_1, fcs_1 = decoder_cos_forward([e1_1, e2_1_sa, e3_1_sa, e4_1],
                                       (e1_1, e2_1, e3_1), params['dec1'])
    cms_2, fcs_2 = decoder_cos_forward([e1_2, e2_2_sa, e3_2_sa, e4_2],
                                       (e1_2, e2_2, e3_2), params['dec2'])

    l1, l2, l3 = (1.0 - jnp.mean(fc) for fc in fcs_1)
    l4, l5, l6 = (1.0 - jnp.mean(fc) for fc in fcs_2)
    p1, p2, p3 = ((1.0 - cm)[:, None] for cm in cms_1)        # (B,1,H,W)
    p4, p5, p6 = ((1.0 - cm)[:, None] for cm in cms_2)

    # e4 global cosine on (B, C4) vectors in plain JAX (a pallas_call here is
    # pure launch overhead).
    eps = jnp.float32(1e-8)
    dotg = jnp.sum(e4_1_g * e4_2_g, axis=1)
    n1 = jnp.maximum(jnp.sqrt(jnp.sum(e4_1_g * e4_1_g, axis=1)), eps)
    n2 = jnp.maximum(jnp.sqrt(jnp.sum(e4_2_g * e4_2_g, axis=1)), eps)
    e_loss = 1.0 - jnp.mean(dotg / (n1 * n2))

    loss_1 = l1 + l2 + l3
    loss_2 = l4 + l5 + l6
    loss = 0.5 * loss_1 + 0.5 * loss_2 + 0.5 * e_loss

    p2 = upsample_nearest_nchw(p2, 2)
    p3 = upsample_nearest_nchw(p3, 4)
    p5 = upsample_nearest_nchw(p5, 2)
    p6 = upsample_nearest_nchw(p6, 4)

    p_all_1 = jnp.concatenate([p1, p2, p3], axis=1).mean(axis=1, keepdims=True)
    p_all_2 = jnp.concatenate([p4, p5, p6], axis=1).mean(axis=1, keepdims=True)

    e1_std = channel_std_nhwc(e1_1)
    e2_std = channel_std_nhwc(e2_1)
    e3_std = channel_std_nhwc(e3_1)

    return {'loss': loss, 'p_all_1': p_all_1, 'p_all_2': p_all_2,
            'p1': p1, 'p2': p2, 'p3': p3, 'p4': p4, 'p5': p5, 'p6': p6,
            'e1_std': e1_std, 'e2_std': e2_std, 'e3_std': e3_std}


# ----------------------------------------------------------------------------
# Deterministic parameter construction
# ----------------------------------------------------------------------------
CH = (32, 64, 128, 256)   # scaled-down resnet50 channels (256/512/1024/2048 / 8)


def init_params(key):
    keys = iter(jax.random.split(key, 128))

    def w(shape, scale=0.1):
        return (scale * jax.random.normal(next(keys), shape)).astype(jnp.float32)

    def wb(shape, scale=0.1):              # matmul weights live in bf16
        return w(shape, scale).astype(jnp.bfloat16)

    c1, c2, c3, c4 = CH
    enc = {'w1': wb((3, c1)), 'b1': w((1, c1), 0.01),
           'w2': wb((c1, c2)), 'b2': w((1, c2), 0.01),
           'w3': wb((c2, c3)), 'b3': w((1, c3), 0.01),
           'w4': wb((c3, c4)), 'b4': w((1, c4), 0.01)}

    def sa(C):
        c8 = C // 8
        cqp = _ceil_to(c8, 128)            # 128-lane-aligned q/k column blocks
        wq = jnp.zeros((C, cqp), jnp.float32).at[:, :c8].set(w((C, c8)))
        wk = jnp.zeros((C, cqp), jnp.float32).at[:, :c8].set(w((C, c8)))
        wv = w((C, C))
        bq = jnp.zeros((1, cqp), jnp.float32).at[:, :c8].set(w((1, c8), 0.01))
        bk = jnp.zeros((1, cqp), jnp.float32).at[:, :c8].set(w((1, c8), 0.01))
        bv = w((1, C), 0.01)
        return {'wq': wq.astype(jnp.bfloat16),
                'bq': bq,
                'wkv': jnp.concatenate([wk, wv], axis=1).astype(jnp.bfloat16),
                'bkv': jnp.concatenate([bk, bv], axis=1),
                'gamma': jnp.zeros((1, 1), jnp.float32)}   # nn.Parameter(zeros(1))

    def dec():
        # concat-conv split at the channel boundary: w*a acts on the coarse
        # (upsampled) branch, w*b on the skip branch.
        return {'w3a': wb((c4, c3)), 'w3b': wb((c3, c3)), 'b3': w((1, c3), 0.01),
                'w2a': wb((c3, c2)), 'w2b': wb((c2, c2)), 'b2': w((1, c2), 0.01),
                'w1': wb((c2, c1)), 'b1': w((1, c1), 0.01)}

    return {'enc': enc,
            'sa1': sa(c3), 'sa2': sa(c2), 'sa3': sa(c3), 'sa4': sa(c2),
            'dec1': dec(), 'dec2': dec()}


if __name__ == "__main__":
    key = jax.random.PRNGKey(0)
    k_x, k_p = jax.random.split(key)
    x = jax.random.normal(k_x, (2, 3, 64, 64), dtype=jnp.float32)  # NCHW input
    params = init_params(k_p)

    fwd = jax.jit(e2ad_forward)
    out = fwd(x, params)
    jax.block_until_ready(out['loss'])
    jax.block_until_ready(out['p_all_1'])
    print("KERNEL_OK")
</pallas_src>

<mosaic_0001>
module attributes {stable_mosaic.version = 11 : i64} {
  func.func @_pwconv_kernel(%arg0: i32, %arg1: memref<512x3xbf16, #tpu.memory_space<vmem>>, %arg2: memref<3x32xbf16, #tpu.memory_space<vmem>>, %arg3: memref<1x32xf32, #tpu.memory_space<vmem>>, %arg4: memref<512x32xbf16, #tpu.memory_space<vmem>>) attributes {dimension_semantics = [#tpu.dimension_semantics<parallel>], iteration_bounds = array<i64: 2>, scalar_prefetch = 0 : i64, scratch_operands = 0 : i64, tpu.core_type = #tpu.core_type<tc>, window_params = [{transform_indices = @transform_0, window_bounds = array<i64: 512, 3>}, {pipeline_mode = #tpu.pipeline_mode<synchronous>, transform_indices = @transform_1, window_bounds = array<i64: 3, 32>}, {pipeline_mode = #tpu.pipeline_mode<synchronous>, transform_indices = @transform_2, window_bounds = array<i64: 1, 32>}, {transform_indices = @transform_3, window_bounds = array<i64: 512, 32>}]} {
    %c0 = arith.constant 0 : index
    %c0_0 = arith.constant 0 : index
    %0 = vector.load %arg1[%c0, %c0_0] : memref<512x3xbf16, #tpu.memory_space<vmem>>, vector<512x3xbf16>
    %c0_1 = arith.constant 0 : index
    %c0_2 = arith.constant 0 : index
    %1 = vector.load %arg2[%c0_1, %c0_2] : memref<3x32xbf16, #tpu.memory_space<vmem>>, vector<3x32xbf16>
    %cst = arith.constant dense<0.000000e+00> : vector<512x32xf32>
    %2 = tpu.matmul %0, %1, %cst {dimension_numbers = #tpu.dot_dimension_numbers<[1], [0], [0], [1], [0, 0, 1, 1], [], []>} : vector<512x3xbf16>, vector<3x32xbf16>, vector<512x32xf32> -> vector<512x32xf32>
    %c0_3 = arith.constant 0 : index
    %c0_4 = arith.constant 0 : index
    %3 = vector.load %arg3[%c0_3, %c0_4] : memref<1x32xf32, #tpu.memory_space<vmem>>, vector<1x32xf32>
    %4 = vector.broadcast %3 : vector<1x32xf32> to vector<512x32xf32>
    %5 = arith.addf %2, %4 : vector<512x32xf32>
    %cst_5 = arith.constant 0.000000e+00 : f32
    %6 = vector.broadcast %cst_5 : f32 to vector<512x32xf32>
    %7 = arith.maximumf %5, %6 : vector<512x32xf32>
    %8 = arith.truncf %7 : vector<512x32xf32> to vector<512x32xbf16>
    %c0_6 = arith.constant 0 : index
    %c0_7 = arith.constant 0 : index
    %9 = vector.load %arg4[%c0_6, %c0_7] : memref<512x32xbf16, #tpu.memory_space<vmem>>, vector<512x32xbf16>
    tpu.vector_store %arg4[%c0_6, %c0_7], %8 {strides = array<i32>} : memref<512x32xbf16, #tpu.memory_space<vmem>>, vector<512x32xbf16>,
    return
  }
  func.func @transform_0(%arg0: i32) -> (i32, i32) {
    %c0_i32 = arith.constant 0 : i32
    %c0_i32_0 = arith.constant 0 : i32
    return %arg0, %c0_i32 : i32, i32
  }
  func.func @transform_1(%arg0: i32) -> (i32, i32) {
    %c0_i32 = arith.constant 0 : i32
    %c0_i32_0 = arith.constant 0 : i32
    %c0_i32_1 = arith.constant 0 : i32
    return %c0_i32, %c0_i32_0 : i32, i32
  }
  func.func @transform_2(%arg0: i32) -> (i32, i32) {
    %c0_i32 = arith.constant 0 : i32
    %c0_i32_0 = arith.constant 0 : i32
    %c0_i32_1 = arith.constant 0 : i32
    return %c0_i32, %c0_i32_0 : i32, i32
  }
  func.func @transform_3(%arg0: i32) -> (i32, i32) {
    %c0_i32 = arith.constant 0 : i32
    %c0_i32_0 = arith.constant 0 : i32
    return %arg0, %c0_i32 : i32, i32
  }
}

module attributes {stable_mosaic.version = 11 : i64} {
  func.func @_pwconv_kernel(%arg0: i32, %arg1: memref<128x32xbf16, #tpu.memory_space<vmem>>, %arg2: memref<32x64xbf16, #tpu.memory_space<vmem>>, %arg3: memref<1x64xf32, #tpu.memory_space<vmem>>, %arg4: memref<128x64xbf16, #tpu.memory_space<vmem>>) attributes {dimension_semantics = [#tpu.dimension_semantics<parallel>], iteration_bounds = array<i64: 2>, scalar_prefetch = 0 : i64, scratch_operands = 0 : i64, tpu.core_type = #tpu.core_type<tc>, window_params = [{transform_indices = @transform_0, window_bounds = array<i64: 128, 32>}, {pipeline_mode = #tpu.pipeline_mode<synchronous>, transform_indices = @transform_1, window_bounds = array<i64: 32, 64>}, {pipeline_mode = #tpu.pipeline_mode<synchronous>, transform_indices = @transform_2, window_bounds = array<i64: 1, 64>}, {transform_indices = @transform_3, window_bounds = array<i64: 128, 64>}]} {
    %c0 = arith.constant 0 : index
    %c0_0 = arith.constant 0 : index
    %0 = vector.load %arg1[%c0, %c0_0] : memref<128x32xbf16, #tpu.memory_space<vmem>>, vector<128x32xbf16>
    %c0_1 = arith.constant 0 : index
    %c0_2 = arith.constant 0 : index
    %1 = vector.load %arg2[%c0_1, %c0_2] : memref<32x64xbf16, #tpu.memory_space<vmem>>, vector<32x64xbf16>
    %cst = arith.constant dense<0.000000e+00> : vector<128x64xf32>
    %2 = tpu.matmul %0, %1, %cst {dimension_numbers = #tpu.dot_dimension_numbers<[1], [0], [0], [1], [0, 0, 1, 1], [], []>} : vector<128x32xbf16>, vector<32x64xbf16>, vector<128x64xf32> -> vector<128x64xf32>
    %c0_3 = arith.constant 0 : index
    %c0_4 = arith.constant 0 : index
    %3 = vector.load %arg3[%c0_3, %c0_4] : memref<1x64xf32, #tpu.memory_space<vmem>>, vector<1x64xf32>
    %4 = vector.broadcast %3 : vector<1x64xf32> to vector<128x64xf32>
    %5 = arith.addf %2, %4 : vector<128x64xf32>
    %cst_5 = arith.constant 0.000000e+00 : f32
    %6 = vector.broadcast %cst_5 : f32 to vector<128x64xf32>
    %7 = arith.maximumf %5, %6 : vector<128x64xf32>
    %8 = arith.truncf %7 : vector<128x64xf32> to vector<128x64xbf16>
    %c0_6 = arith.constant 0 : index
    %c0_7 = arith.constant 0 : index
    %9 = vector.load %arg4[%c0_6, %c0_7] : memref<128x64xbf16, #tpu.memory_space<vmem>>, vector<128x64xbf16>
    tpu.vector_store %arg4[%c0_6, %c0_7], %8 {strides = array<i32>} : memref<128x64xbf16, #tpu.memory_space<vmem>>, vector<128x64xbf16>,
    return
  }
  func.func @transform_0(%arg0: i32) -> (i32, i32) {
    %c0_i32 = arith.constant 0 : i32
    %c0_i32_0 = arith.constant 0 : i32
    return %arg0, %c0_i32 : i32, i32
  }
  func.func @transform_1(%arg0: i32) -> (i32, i32) {
    %c0_i32 = arith.constant 0 : i32
    %c0_i32_0 = arith.constant 0 : i32
    %c0_i32_1 = arith.constant 0 : i32
    return %c0_i32, %c0_i32_0 : i32, i32
  }
  func.func @transform_2(%arg0: i32) -> (i32, i32) {
    %c0_i32 = arith.constant 0 : i32
    %c0_i32_0 = arith.constant 0 : i32
    %c0_i32_1 = arith.constant 0 : i32
    return %c0_i32, %c0_i32_0 : i32, i32
  }
  func.func @transform_3(%arg0: i32) -> (i32, i32) {
    %c0_i32 = arith.constant 0 : i32
    %c0_i32_0 = arith.constant 0 : i32
    return %arg0, %c0_i32 : i32, i32
  }
}

module attributes {stable_mosaic.version = 11 : i64} {
  func.func @_pwconv_kernel(%arg0: i32, %arg1: memref<64x64xbf16, #tpu.memory_space<vmem>>, %arg2: memref<64x128xbf16, #tpu.memory_space<vmem>>, %arg3: memref<1x128xf32, #tpu.memory_space<vmem>>, %arg4: memref<64x128xbf16, #tpu.memory_space<vmem>>) attributes {dimension_semantics = [#tpu.dimension_semantics<parallel>], iteration_bounds = array<i64: 1>, scalar_prefetch = 0 : i64, scratch_operands = 0 : i64, tpu.core_type = #tpu.core_type<tc>, window_params = [{transform_indices = @transform_0, window_bounds = array<i64: 64, 64>}, {pipeline_mode = #tpu.pipeline_mode<synchronous>, transform_indices = @transform_1, window_bounds = array<i64: 64, 128>}, {pipeline_mode = #tpu.pipeline_mode<synchronous>, transform_indices = @transform_2, window_bounds = array<i64: 1, 128>}, {transform_indices = @transform_3, window_bounds = array<i64: 64, 128>}]} {
    %c0 = arith.constant 0 : index
    %c0_0 = arith.constant 0 : index
    %0 = vector.load %arg1[%c0, %c0_0] : memref<64x64xbf16, #tpu.memory_space<vmem>>, vector<64x64xbf16>
    %c0_1 = arith.constant 0 : index
    %c0_2 = arith.constant 0 : index
    %1 = vector.load %arg2[%c0_1, %c0_2] : memref<64x128xbf16, #tpu.memory_space<vmem>>, vector<64x128xbf16>
    %cst = arith.constant dense<0.000000e+00> : vector<64x128xf32>
    %2 = tpu.matmul %0, %1, %cst {dimension_numbers = #tpu.dot_dimension_numbers<[1], [0], [0], [1], [0, 0, 1, 1], [], []>} : vector<64x64xbf16>, vector<64x128xbf16>, vector<64x128xf32> -> vector<64x128xf32>
    %c0_3 = arith.constant 0 : index
    %c0_4 = arith.constant 0 : index
    %3 = vector.load %arg3[%c0_3, %c0_4] : memref<1x128xf32, #tpu.memory_space<vmem>>, vector<1x128xf32>
    %4 = vector.broadcast %3 : vector<1x128xf32> to vector<64x128xf32>
    %5 = arith.addf %2, %4 : vector<64x128xf32>
    %cst_5 = arith.constant 0.000000e+00 : f32
    %6 = vector.broadcast %cst_5 : f32 to vector<64x128xf32>
    %7 = arith.maximumf %5, %6 : vector<64x128xf32>
    %8 = arith.truncf %7 : vector<64x128xf32> to vector<64x128xbf16>
    %c0_6 = arith.constant 0 : index
    %c0_7 = arith.constant 0 : index
    %9 = vector.load %arg4[%c0_6, %c0_7] : memref<64x128xbf16, #tpu.memory_space<vmem>>, vector<64x128xbf16>
    tpu.vector_store %arg4[%c0_6, %c0_7], %8 {strides = array<i32>} : memref<64x128xbf16, #tpu.memory_space<vmem>>, vector<64x128xbf16>,
    return
  }
  func.func @transform_0(%arg0: i32) -> (i32, i32) {
    %c0_i32 = arith.constant 0 : i32
    %c0_i32_0 = arith.constant 0 : i32
    return %arg0, %c0_i32 : i32, i32
  }
  func.func @transform_1(%arg0: i32) -> (i32, i32) {
    %c0_i32 = arith.constant 0 : i32
    %c0_i32_0 = arith.constant 0 : i32
    %c0_i32_1 = arith.constant 0 : i32
    return %c0_i32, %c0_i32_0 : i32, i32
  }
  func.func @transform_2(%arg0: i32) -> (i32, i32) {
    %c0_i32 = arith.constant 0 : i32
    %c0_i32_0 = arith.constant 0 : i32
    %c0_i32_1 = arith.constant 0 : i32
    return %c0_i32, %c0_i32_0 : i32, i32
  }
  func.func @transform_3(%arg0: i32) -> (i32, i32) {
    %c0_i32 = arith.constant 0 : i32
    %c0_i32_0 = arith.constant 0 : i32
    return %arg0, %c0_i32 : i32, i32
  }
}

module attributes {stable_mosaic.version = 11 : i64} {
  func.func @_pwconv_kernel(%arg0: i32, %arg1: memref<16x128xbf16, #tpu.memory_space<vmem>>, %arg2: memref<128x256xbf16, #tpu.memory_space<vmem>>, %arg3: memref<1x256xf32, #tpu.memory_space<vmem>>, %arg4: memref<16x256xbf16, #tpu.memory_space<vmem>>) attributes {dimension_semantics = [#tpu.dimension_semantics<parallel>], iteration_bounds = array<i64: 1>, scalar_prefetch = 0 : i64, scratch_operands = 0 : i64, tpu.core_type = #tpu.core_type<tc>, window_params = [{transform_indices = @transform_0, window_bounds = array<i64: 16, 128>}, {pipeline_mode = #tpu.pipeline_mode<synchronous>, transform_indices = @transform_1, window_bounds = array<i64: 128, 256>}, {pipeline_mode = #tpu.pipeline_mode<synchronous>, transform_indices = @transform_2, window_bounds = array<i64: 1, 256>}, {transform_indices = @transform_3, window_bounds = array<i64: 16, 256>}]} {
    %c0 = arith.constant 0 : index
    %c0_0 = arith.constant 0 : index
    %0 = vector.load %arg1[%c0, %c0_0] : memref<16x128xbf16, #tpu.memory_space<vmem>>, vector<16x128xbf16>
    %c0_1 = arith.constant 0 : index
    %c0_2 = arith.constant 0 : index
    %1 = vector.load %arg2[%c0_1, %c0_2] : memref<128x256xbf16, #tpu.memory_space<vmem>>, vector<128x256xbf16>
    %cst = arith.constant dense<0.000000e+00> : vector<16x256xf32>
    %2 = tpu.matmul %0, %1, %cst {dimension_numbers = #tpu.dot_dimension_numbers<[1], [0], [0], [1], [0, 0, 1, 1], [], []>} : vector<16x128xbf16>, vector<128x256xbf16>, vector<16x256xf32> -> vector<16x256xf32>
    %c0_3 = arith.constant 0 : index
    %c0_4 = arith.constant 0 : index
    %3 = vector.load %arg3[%c0_3, %c0_4] : memref<1x256xf32, #tpu.memory_space<vmem>>, vector<1x256xf32>
    %4 = vector.broadcast %3 : vector<1x256xf32> to vector<16x256xf32>
    %5 = arith.addf %2, %4 : vector<16x256xf32>
    %cst_5 = arith.constant 0.000000e+00 : f32
    %6 = vector.broadcast %cst_5 : f32 to vector<16x256xf32>
    %7 = arith.maximumf %5, %6 : vector<16x256xf32>
    %8 = arith.truncf %7 : vector<16x256xf32> to vector<16x256xbf16>
    %c0_6 = arith.constant 0 : index
    %c0_7 = arith.constant 0 : index
    %9 = vector.load %arg4[%c0_6, %c0_7] : memref<16x256xbf16, #tpu.memory_space<vmem>>, vector<16x256xbf16>
    tpu.vector_store %arg4[%c0_6, %c0_7], %8 {strides = array<i32>} : memref<16x256xbf16, #tpu.memory_space<vmem>>, vector<16x256xbf16>,
    return
  }
  func.func @transform_0(%arg0: i32) -> (i32, i32) {
    %c0_i32 = arith.constant 0 : i32
    %c0_i32_0 = arith.constant 0 : i32
    return %arg0, %c0_i32 : i32, i32
  }
  func.func @transform_1(%arg0: i32) -> (i32, i32) {
    %c0_i32 = arith.constant 0 : i32
    %c0_i32_0 = arith.constant 0 : i32
    %c0_i32_1 = arith.constant 0 : i32
    return %c0_i32, %c0_i32_0 : i32, i32
  }
  func.func @transform_2(%arg0: i32) -> (i32, i32) {
    %c0_i32 = arith.constant 0 : i32
    %c0_i32_0 = arith.constant 0 : i32
    %c0_i32_1 = arith.constant 0 : i32
    return %c0_i32, %c0_i32_0 : i32, i32
  }
  func.func @transform_3(%arg0: i32) -> (i32, i32) {
    %c0_i32 = arith.constant 0 : i32
    %c0_i32_0 = arith.constant 0 : i32
    return %arg0, %c0_i32 : i32, i32
  }
}

module attributes {stable_mosaic.version = 11 : i64} {
  func.func @_pwconv_kernel(%arg0: i32, %arg1: memref<8x256xbf16, #tpu.memory_space<vmem>>, %arg2: memref<256x128xbf16, #tpu.memory_space<vmem>>, %arg3: memref<1x128xf32, #tpu.memory_space<vmem>>, %arg4: memref<8x128xbf16, #tpu.memory_space<vmem>>) attributes {dimension_semantics = [#tpu.dimension_semantics<parallel>], iteration_bounds = array<i64: 1>, scalar_prefetch = 0 : i64, scratch_operands = 0 : i64, tpu.core_type = #tpu.core_type<tc>, window_params = [{transform_indices = @transform_0, window_bounds = array<i64: 8, 256>}, {pipeline_mode = #tpu.pipeline_mode<synchronous>, transform_indices = @transform_1, window_bounds = array<i64: 256, 128>}, {pipeline_mode = #tpu.pipeline_mode<synchronous>, transform_indices = @transform_2, window_bounds = array<i64: 1, 128>}, {transform_indices = @transform_3, window_bounds = array<i64: 8, 128>}]} {
    %c0 = arith.constant 0 : index
    %c0_0 = arith.constant 0 : index
    %0 = vector.load %arg1[%c0, %c0_0] : memref<8x256xbf16, #tpu.memory_space<vmem>>, vector<8x256xbf16>
    %c0_1 = arith.constant 0 : index
    %c0_2 = arith.constant 0 : index
    %1 = vector.load %arg2[%c0_1, %c0_2] : memref<256x128xbf16, #tpu.memory_space<vmem>>, vector<256x128xbf16>
    %cst = arith.constant dense<0.000000e+00> : vector<8x128xf32>
    %2 = tpu.matmul %0, %1, %cst {dimension_numbers = #tpu.dot_dimension_numbers<[1], [0], [0], [1], [0, 0, 1, 1], [], []>} : vector<8x256xbf16>, vector<256x128xbf16>, vector<8x128xf32> -> vector<8x128xf32>
    %c0_3 = arith.constant 0 : index
    %c0_4 = arith.constant 0 : index
    %3 = vector.load %arg3[%c0_3, %c0_4] : memref<1x128xf32, #tpu.memory_space<vmem>>, vector<1x128xf32>
    %4 = vector.broadcast %3 : vector<1x128xf32> to vector<8x128xf32>
    %5 = arith.addf %2, %4 : vector<8x128xf32>
    %6 = arith.truncf %5 : vector<8x128xf32> to vector<8x128xbf16>
    %c0_5 = arith.constant 0 : index
    %c0_6 = arith.constant 0 : index
    %7 = vector.load %arg4[%c0_5, %c0_6] : memref<8x128xbf16, #tpu.memory_space<vmem>>, vector<8x128xbf16>
    tpu.vector_store %arg4[%c0_5, %c0_6], %6 {strides = array<i32>} : memref<8x128xbf16, #tpu.memory_space<vmem>>, vector<8x128xbf16>,
    return
  }
  func.func @transform_0(%arg0: i32) -> (i32, i32) {
    %c0_i32 = arith.constant 0 : i32
    %c0_i32_0 = arith.constant 0 : i32
    return %arg0, %c0_i32 : i32, i32
  }
  func.func @transform_1(%arg0: i32) -> (i32, i32) {
    %c0_i32 = arith.constant 0 : i32
    %c0_i32_0 = arith.constant 0 : i32
    %c0_i32_1 = arith.constant 0 : i32
    return %c0_i32, %c0_i32_0 : i32, i32
  }
  func.func @transform_2(%arg0: i32) -> (i32, i32) {
    %c0_i32 = arith.constant 0 : i32
    %c0_i32_0 = arith.constant 0 : i32
    %c0_i32_1 = arith.constant 0 : i32
    return %c0_i32, %c0_i32_0 : i32, i32
  }
  func.func @transform_3(%arg0: i32) -> (i32, i32) {
    %c0_i32 = arith.constant 0 : i32
    %c0_i32_0 = arith.constant 0 : i32
    return %arg0, %c0_i32 : i32, i32
  }
}

module attributes {stable_mosaic.version = 11 : i64} {
  func.func @_sa_kernel(%arg0: i32, %arg1: i32, %arg2: memref<1x16x128xbf16, #tpu.memory_space<vmem>>, %arg3: memref<128x128xbf16, #tpu.memory_space<vmem>>, %arg4: memref<1x128xf32, #tpu.memory_space<vmem>>, %arg5: memref<128x256xbf16, #tpu.memory_space<vmem>>, %arg6: memref<1x256xf32, #tpu.memory_space<vmem>>, %arg7: memref<1x1xf32, #tpu.memory_space<smem>>, %arg8: memref<1x16x128xbf16, #tpu.memory_space<vmem>>) attributes {dimension_semantics = [#tpu.dimension_semantics<parallel>, #tpu.dimension_semantics<parallel>], iteration_bounds = array<i64: 2, 1>, scalar_prefetch = 0 : i64, scratch_operands = 0 : i64, tpu.core_type = #tpu.core_type<tc>, window_params = [{transform_indices = @transform_0, window_bounds = array<i64: 1, 16, 128>}, {pipeline_mode = #tpu.pipeline_mode<synchronous>, transform_indices = @transform_1, window_bounds = array<i64: 128, 128>}, {pipeline_mode = #tpu.pipeline_mode<synchronous>, transform_indices = @transform_2, window_bounds = array<i64: 1, 128>}, {pipeline_mode = #tpu.pipeline_mode<synchronous>, transform_indices = @transform_3, window_bounds = array<i64: 128, 256>}, {pipeline_mode = #tpu.pipeline_mode<synchronous>, transform_indices = @transform_4, window_bounds = array<i64: 1, 256>}, {transform_indices = @transform_5, window_bounds = array<i64: 1, 1>}, {transform_indices = @transform_6, window_bounds = array<i64: 1, 16, 128>}]} {
    %c16_i32 = arith.constant 16 : i32
    %0 = arith.muli %arg1, %c16_i32 : i32
    %1 = tpu.assume_multiple %0, 8 : i32
    %c0 = arith.constant 0 : index
    %2 = arith.index_cast %1 : i32 to index
    %c0_0 = arith.constant 0 : index
    %3 = vector.load %arg2[%c0, %2, %c0_0] : memref<1x16x128xbf16, #tpu.memory_space<vmem>>, vector<1x16x128xbf16>
    %4 = vector.shape_cast %3 : vector<1x16x128xbf16> to vector<16x128xbf16>
    %c0_1 = arith.constant 0 : index
    %c0_2 = arith.constant 0 : index
    %c0_3 = arith.constant 0 : index
    %5 = vector.load %arg2[%c0_1, %c0_2, %c0_3] : memref<1x16x128xbf16, #tpu.memory_space<vmem>>, vector<1x16x128xbf16>
    %6 = vector.shape_cast %5 : vector<1x16x128xbf16> to vector<16x128xbf16>
    %c0_4 = arith.constant 0 : index
    %c0_5 = arith.constant 0 : index
    %7 = vector.load %arg3[%c0_4, %c0_5] : memref<128x128xbf16, #tpu.memory_space<vmem>>, vector<128x128xbf16>
    %cst = arith.constant dense<0.000000e+00> : vector<16x128xf32>
    %8 = tpu.matmul %4, %7, %cst {dimension_numbers = #tpu.dot_dimension_numbers<[1], [0], [0], [1], [0, 0, 1, 1], [], []>} : vector<16x128xbf16>, vector<128x128xbf16>, vector<16x128xf32> -> vector<16x128xf32>
    %c0_6 = arith.constant 0 : index
    %c0_7 = arith.constant 0 : index
    %9 = vector.load %arg4[%c0_6, %c0_7] : memref<1x128xf32, #tpu.memory_space<vmem>>, vector<1x128xf32>
    %10 = vector.broadcast %9 : vector<1x128xf32> to vector<16x128xf32>
    %11 = arith.addf %8, %10 : vector<16x128xf32>
    %c0_8 = arith.constant 0 : index
    %c0_9 = arith.constant 0 : index
    %12 = vector.load %arg5[%c0_8, %c0_9] : memref<128x256xbf16, #tpu.memory_space<vmem>>, vector<128x256xbf16>
    %cst_10 = arith.constant dense<0.000000e+00> : vector<16x256xf32>
    %13 = tpu.matmul %6, %12, %cst_10 {dimension_numbers = #tpu.dot_dimension_numbers<[1], [0], [0], [1], [0, 0, 1, 1], [], []>} : vector<16x128xbf16>, vector<128x256xbf16>, vector<16x256xf32> -> vector<16x256xf32>
    %c0_11 = arith.constant 0 : index
    %c0_12 = arith.constant 0 : index
    %14 = vector.load %arg6[%c0_11, %c0_12] : memref<1x256xf32, #tpu.memory_space<vmem>>, vector<1x256xf32>
    %15 = vector.broadcast %14 : vector<1x256xf32> to vector<16x256xf32>
    %16 = arith.addf %13, %15 : vector<16x256xf32>
    %17 = vector.extract_strided_slice %16 {offsets = [0, 0], sizes = [16, 128], strides = [1, 1]} : vector<16x256xf32> to vector<16x128xf32>
    %18 = vector.extract_strided_slice %16 {offsets = [0, 128], sizes = [16, 128], strides = [1, 1]} : vector<16x256xf32> to vector<16x128xf32>
    %19 = arith.truncf %11 : vector<16x128xf32> to vector<16x128xbf16>
    %20 = arith.truncf %17 : vector<16x128xf32> to vector<16x128xbf16>
    %cst_13 = arith.constant dense<0.000000e+00> : vector<16x16xf32>
    %21 = tpu.matmul %19, %20, %cst_13 {dimension_numbers = #tpu.dot_dimension_numbers<[1], [1], [0], [0], [0, 0, 1, 0], [], []>} : vector<16x128xbf16>, vector<16x128xbf16>, vector<16x16xf32> -> vector<16x16xf32>
    %cst_14 = arith.constant dense<0xFF800000> : vector<16xf32>
    %22 = vector.multi_reduction <maximumf>, %21, %cst_14 [1] : vector<16x16xf32> to vector<16xf32>
    %23 = vector.shape_cast %22 : vector<16xf32> to vector<16x1xf32>
    %24 = vector.broadcast %23 : vector<16x1xf32> to vector<16x16xf32>
    %25 = arith.subf %21, %24 : vector<16x16xf32>
    %26 = math.exp %25 : vector<16x16xf32>
    %cst_15 = arith.constant dense<0.000000e+00> : vector<16xf32>
    %27 = vector.multi_reduction <add>, %26, %cst_15 [1] : vector<16x16xf32> to vector<16xf32>
    %28 = vector.shape_cast %27 : vector<16xf32> to vector<16x1xf32>
    %29 = arith.truncf %26 : vector<16x16xf32> to vector<16x16xbf16>
    %30 = arith.truncf %18 : vector<16x128xf32> to vector<16x128xbf16>
    %cst_16 = arith.constant dense<0.000000e+00> : vector<16x128xf32>
    %31 = tpu.matmul %29, %30, %cst_16 {dimension_numbers = #tpu.dot_dimension_numbers<[1], [0], [0], [1], [0, 0, 1, 1], [], []>} : vector<16x16xbf16>, vector<16x128xbf16>, vector<16x128xf32> -> vector<16x128xf32>
    %c0_17 = arith.constant 0 : index
    %c0_18 = arith.constant 0 : index
    %32 = memref.load %arg7[%c0_17, %c0_18] : memref<1x1xf32, #tpu.memory_space<smem>>
    %33 = tpu.reciprocal %28 {approx = true} : vector<16x1xf32> -> vector<16x1xf32>
    %34 = vector.broadcast %33 : vector<16x1xf32> to vector<16x128xf32>
    %35 = arith.mulf %31, %34 : vector<16x128xf32>
    %36 = vector.broadcast %32 : f32 to vector<16x128xf32>
    %37 = arith.mulf %36, %35 : vector<16x128xf32>
    %38 = arith.extf %4 : vector<16x128xbf16> to vector<16x128xf32>
    %39 = arith.addf %37, %38 : vector<16x128xf32>
    %40 = arith.truncf %39 : vector<16x128xf32> to vector<16x128xbf16>
    %c0_19 = arith.constant 0 : index
    %c0_20 = arith.constant 0 : index
    %c0_21 = arith.constant 0 : index
    %41 = vector.load %arg8[%c0_19, %c0_20, %c0_21] : memref<1x16x128xbf16, #tpu.memory_space<vmem>>, vector<1x16x128xbf16>
    %42 = vector.shape_cast %41 : vector<1x16x128xbf16> to vector<16x128xbf16>
    %43 = vector.shape_cast %40 : vector<16x128xbf16> to vector<1x16x128xbf16>
    tpu.vector_store %arg8[%c0_19, %c0_20, %c0_21], %43 {strides = array<i32>} : memref<1x16x128xbf16, #tpu.memory_space<vmem>>, vector<1x16x128xbf16>,
    return
  }
  func.func @transform_0(%arg0: i32, %arg1: i32) -> (i32, i32, i32) {
    %c0_i32 = arith.constant 0 : i32
    %c0_i32_0 = arith.constant 0 : i32
    %c0_i32_1 = arith.constant 0 : i32
    return %arg0, %c0_i32, %c0_i32_0 : i32, i32, i32
  }
  func.func @transform_1(%arg0: i32, %arg1: i32) -> (i32, i32) {
    %c0_i32 = arith.constant 0 : i32
    %c0_i32_0 = arith.constant 0 : i32
    %c0_i32_1 = arith.constant 0 : i32
    return %c0_i32, %c0_i32_0 : i32, i32
  }
  func.func @transform_2(%arg0: i32, %arg1: i32) -> (i32, i32) {
    %c0_i32 = arith.constant 0 : i32
    %c0_i32_0 = arith.constant 0 : i32
    %c0_i32_1 = arith.constant 0 : i32
    return %c0_i32, %c0_i32_0 : i32, i32
  }
  func.func @transform_3(%arg0: i32, %arg1: i32) -> (i32, i32) {
    %c0_i32 = arith.constant 0 : i32
    %c0_i32_0 = arith.constant 0 : i32
    %c0_i32_1 = arith.constant 0 : i32
    return %c0_i32, %c0_i32_0 : i32, i32
  }
  func.func @transform_4(%arg0: i32, %arg1: i32) -> (i32, i32) {
    %c0_i32 = arith.constant 0 : i32
    %c0_i32_0 = arith.constant 0 : i32
    %c0_i32_1 = arith.constant 0 : i32
    return %c0_i32, %c0_i32_0 : i32, i32
  }
  func.func @transform_5(%arg0: i32, %arg1: i32) -> (i32, i32) {
    %c0_i32 = arith.constant 0 : i32
    %c0_i32_0 = arith.constant 0 : i32
    %c0_i32_1 = arith.constant 0 : i32
    return %c0_i32, %c0_i32_0 : i32, i32
  }
  func.func @transform_6(%arg0: i32, %arg1: i32) -> (i32, i32, i32) {
    %c0_i32 = arith.constant 0 : i32
    %c0_i32_0 = arith.constant 0 : i32
    return %arg0, %arg1, %c0_i32 : i32, i32, i32
  }
}

module attributes {stable_mosaic.version = 11 : i64} {
  func.func @_pwconv_add_cos_kernel(%arg0: i32, %arg1: memref<32x128xbf16, #tpu.memory_space<vmem>>, %arg2: memref<128x128xbf16, #tpu.memory_space<vmem>>, %arg3: memref<1x128xf32, #tpu.memory_space<vmem>>, %arg4: memref<32x128xbf16, #tpu.memory_space<vmem>>, %arg5: memref<32x128xbf16, #tpu.memory_space<vmem>>, %arg6: memref<32x128xbf16, #tpu.memory_space<vmem>>, %arg7: memref<4x32xf32, #tpu.memory_space<vmem>>) attributes {dimension_semantics = [#tpu.dimension_semantics<parallel>], iteration_bounds = array<i64: 1>, scalar_prefetch = 0 : i64, scratch_operands = 0 : i64, tpu.core_type = #tpu.core_type<tc>, window_params = [{transform_indices = @transform_0, window_bounds = array<i64: 32, 128>}, {pipeline_mode = #tpu.pipeline_mode<synchronous>, transform_indices = @transform_1, window_bounds = array<i64: 128, 128>}, {pipeline_mode = #tpu.pipeline_mode<synchronous>, transform_indices = @transform_2, window_bounds = array<i64: 1, 128>}, {transform_indices = @transform_3, window_bounds = array<i64: 32, 128>}, {transform_indices = @transform_4, window_bounds = array<i64: 32, 128>}, {transform_indices = @transform_5, window_bounds = array<i64: 32, 128>}, {transform_indices = @transform_6, window_bounds = array<i64: 4, 32>}]} {
    %c0 = arith.constant 0 : index
    %c0_0 = arith.constant 0 : index
    %0 = vector.load %arg1[%c0, %c0_0] : memref<32x128xbf16, #tpu.memory_space<vmem>>, vector<32x128xbf16>
    %c0_1 = arith.constant 0 : index
    %c0_2 = arith.constant 0 : index
    %1 = vector.load %arg2[%c0_1, %c0_2] : memref<128x128xbf16, #tpu.memory_space<vmem>>, vector<128x128xbf16>
    %cst = arith.constant dense<0.000000e+00> : vector<32x128xf32>
    %2 = tpu.matmul %0, %1, %cst {dimension_numbers = #tpu.dot_dimension_numbers<[1], [0], [0], [1], [0, 0, 1, 1], [], []>} : vector<32x128xbf16>, vector<128x128xbf16>, vector<32x128xf32> -> vector<32x128xf32>
    %c0_3 = arith.constant 0 : index
    %c0_4 = arith.constant 0 : index
    %3 = vector.load %arg3[%c0_3, %c0_4] : memref<1x128xf32, #tpu.memory_space<vmem>>, vector<1x128xf32>
    %4 = vector.broadcast %3 : vector<1x128xf32> to vector<32x128xf32>
    %5 = arith.addf %2, %4 : vector<32x128xf32>
    %c0_5 = arith.constant 0 : index
    %c0_6 = arith.constant 0 : index
    %6 = vector.load %arg4[%c0_5, %c0_6] : memref<32x128xbf16, #tpu.memory_space<vmem>>, vector<32x128xbf16>
    %7 = arith.extf %6 : vector<32x128xbf16> to vector<32x128xf32>
    %8 = arith.addf %5, %7 : vector<32x128xf32>
    %cst_7 = arith.constant 0.000000e+00 : f32
    %9 = vector.broadcast %cst_7 : f32 to vector<32x128xf32>
    %10 = arith.maximumf %8, %9 : vector<32x128xf32>
    %11 = arith.truncf %10 : vector<32x128xf32> to vector<32x128xbf16>
    %c0_8 = arith.constant 0 : index
    %c0_9 = arith.constant 0 : index
    %12 = vector.load %arg6[%c0_8, %c0_9] : memref<32x128xbf16, #tpu.memory_space<vmem>>, vector<32x128xbf16>
    tpu.vector_store %arg6[%c0_8, %c0_9], %11 {strides = array<i32>} : memref<32x128xbf16, #tpu.memory_space<vmem>>, vector<32x128xbf16>,
    %c0_10 = arith.constant 0 : index
    %c0_11 = arith.constant 0 : index
    %13 = vector.load %arg5[%c0_10, %c0_11] : memref<32x128xbf16, #tpu.memory_space<vmem>>, vector<32x128xbf16>
    %14 = arith.extf %13 : vector<32x128xbf16> to vector<32x128xf32>
    %cst_12 = arith.constant 1.000000e+00 : f32
    %15 = vector.broadcast %cst_12 : f32 to vector<1x128xf32>
    %16 = arith.mulf %10, %14 : vector<32x128xf32>
    %cst_13 = arith.constant dense<0.000000e+00> : vector<1x32xf32>
    %17 = tpu.matmul %15, %16, %cst_13 {dimension_numbers = #tpu.dot_dimension_numbers<[1], [1], [0], [0], [0, 0, 1, 0], [], []>} : vector<1x128xf32>, vector<32x128xf32>, vector<1x32xf32> -> vector<1x32xf32>
    %18 = arith.mulf %10, %10 : vector<32x128xf32>
    %cst_14 = arith.constant dense<0.000000e+00> : vector<1x32xf32>
    %19 = tpu.matmul %15, %18, %cst_14 {dimension_numbers = #tpu.dot_dimension_numbers<[1], [1], [0], [0], [0, 0, 1, 0], [], []>} : vector<1x128xf32>, vector<32x128xf32>, vector<1x32xf32> -> vector<1x32xf32>
    %20 = arith.mulf %14, %14 : vector<32x128xf32>
    %cst_15 = arith.constant dense<0.000000e+00> : vector<1x32xf32>
    %21 = tpu.matmul %15, %20, %cst_15 {dimension_numbers = #tpu.dot_dimension_numbers<[1], [1], [0], [0], [0, 0, 1, 0], [], []>} : vector<1x128xf32>, vector<32x128xf32>, vector<1x32xf32> -> vector<1x32xf32>
    %22 = math.sqrt %19 : vector<1x32xf32>
    %cst_16 = arith.constant 9.99999993E-9 : f32
    %23 = vector.broadcast %cst_16 : f32 to vector<1x32xf32>
    %24 = arith.maximumf %22, %23 : vector<1x32xf32>
    %25 = math.sqrt %21 : vector<1x32xf32>
    %cst_17 = arith.constant 9.99999993E-9 : f32
    %26 = vector.broadcast %cst_17 : f32 to vector<1x32xf32>
    %27 = arith.maximumf %25, %26 : vector<1x32xf32>
    %28 = arith.mulf %24, %27 : vector<1x32xf32>
    %29 = arith.divf %17, %28 : vector<1x32xf32>
    %30 = tpu.concatenate %29, %17, %19, %21 in 0 : vector<1x32xf32>, vector<1x32xf32>, vector<1x32xf32>, vector<1x32xf32> -> vector<4x32xf32>
    %c0_18 = arith.constant 0 : index
    %c0_19 = arith.constant 0 : index
    %31 = vector.load %arg7[%c0_18, %c0_19] : memref<4x32xf32, #tpu.memory_space<vmem>>, vector<4x32xf32>
    tpu.vector_store %arg7[%c0_18, %c0_19], %30 {strides = array<i32>} : memref<4x32xf32, #tpu.memory_space<vmem>>, vector<4x32xf32>,
    return
  }
  func.func @transform_0(%arg0: i32) -> (i32, i32) {
    %c0_i32 = arith.constant 0 : i32
    %c0_i32_0 = arith.constant 0 : i32
    return %arg0, %c0_i32 : i32, i32
  }
  func.func @transform_1(%arg0: i32) -> (i32, i32) {
    %c0_i32 = arith.constant 0 : i32
    %c0_i32_0 = arith.constant 0 : i32
    %c0_i32_1 = arith.constant 0 : i32
    return %c0_i32, %c0_i32_0 : i32, i32
  }
  func.func @transform_2(%arg0: i32) -> (i32, i32) {
    %c0_i32 = arith.constant 0 : i32
    %c0_i32_0 = arith.constant 0 : i32
    %c0_i32_1 = arith.constant 0 : i32
    return %c0_i32, %c0_i32_0 : i32, i32
  }
  func.func @transform_3(%arg0: i32) -> (i32, i32) {
    %c0_i32 = arith.constant 0 : i32
    %c0_i32_0 = arith.constant 0 : i32
    return %arg0, %c0_i32 : i32, i32
  }
  func.func @transform_4(%arg0: i32) -> (i32, i32) {
    %c0_i32 = arith.constant 0 : i32
    %c0_i32_0 = arith.constant 0 : i32
    return %arg0, %c0_i32 : i32, i32
  }
  func.func @transform_5(%arg0: i32) -> (i32, i32) {
    %c0_i32 = arith.constant 0 : i32
    %c0_i32_0 = arith.constant 0 : i32
    return %arg0, %c0_i32 : i32, i32
  }
  func.func @transform_6(%arg0: i32) -> (i32, i32) {
    %c0_i32 = arith.constant 0 : i32
    %c0_i32_0 = arith.constant 0 : i32
    return %c0_i32, %arg0 : i32, i32
  }
}

module attributes {stable_mosaic.version = 11 : i64} {
  func.func @_pwconv_kernel(%arg0: i32, %arg1: memref<32x128xbf16, #tpu.memory_space<vmem>>, %arg2: memref<128x64xbf16, #tpu.memory_space<vmem>>, %arg3: memref<1x64xf32, #tpu.memory_space<vmem>>, %arg4: memref<32x64xbf16, #tpu.memory_space<vmem>>) attributes {dimension_semantics = [#tpu.dimension_semantics<parallel>], iteration_bounds = array<i64: 1>, scalar_prefetch = 0 : i64, scratch_operands = 0 : i64, tpu.core_type = #tpu.core_type<tc>, window_params = [{transform_indices = @transform_0, window_bounds = array<i64: 32, 128>}, {pipeline_mode = #tpu.pipeline_mode<synchronous>, transform_indices = @transform_1, window_bounds = array<i64: 128, 64>}, {pipeline_mode = #tpu.pipeline_mode<synchronous>, transform_indices = @transform_2, window_bounds = array<i64: 1, 64>}, {transform_indices = @transform_3, window_bounds = array<i64: 32, 64>}]} {
    %c0 = arith.constant 0 : index
    %c0_0 = arith.constant 0 : index
    %0 = vector.load %arg1[%c0, %c0_0] : memref<32x128xbf16, #tpu.memory_space<vmem>>, vector<32x128xbf16>
    %c0_1 = arith.constant 0 : index
    %c0_2 = arith.constant 0 : index
    %1 = vector.load %arg2[%c0_1, %c0_2] : memref<128x64xbf16, #tpu.memory_space<vmem>>, vector<128x64xbf16>
    %cst = arith.constant dense<0.000000e+00> : vector<32x64xf32>
    %2 = tpu.matmul %0, %1, %cst {dimension_numbers = #tpu.dot_dimension_numbers<[1], [0], [0], [1], [0, 0, 1, 1], [], []>} : vector<32x128xbf16>, vector<128x64xbf16>, vector<32x64xf32> -> vector<32x64xf32>
    %c0_3 = arith.constant 0 : index
    %c0_4 = arith.constant 0 : index
    %3 = vector.load %arg3[%c0_3, %c0_4] : memref<1x64xf32, #tpu.memory_space<vmem>>, vector<1x64xf32>
    %4 = vector.broadcast %3 : vector<1x64xf32> to vector<32x64xf32>
    %5 = arith.addf %2, %4 : vector<32x64xf32>
    %6 = arith.truncf %5 : vector<32x64xf32> to vector<32x64xbf16>
    %c0_5 = arith.constant 0 : index
    %c0_6 = arith.constant 0 : index
    %7 = vector.load %arg4[%c0_5, %c0_6] : memref<32x64xbf16, #tpu.memory_space<vmem>>, vector<32x64xbf16>
    tpu.vector_store %arg4[%c0_5, %c0_6], %6 {strides = array<i32>} : memref<32x64xbf16, #tpu.memory_space<vmem>>, vector<32x64xbf16>,
    return
  }
  func.func @transform_0(%arg0: i32) -> (i32, i32) {
    %c0_i32 = arith.constant 0 : i32
    %c0_i32_0 = arith.constant 0 : i32
    return %arg0, %c0_i32 : i32, i32
  }
  func.func @transform_1(%arg0: i32) -> (i32, i32) {
    %c0_i32 = arith.constant 0 : i32
    %c0_i32_0 = arith.constant 0 : i32
    %c0_i32_1 = arith.constant 0 : i32
    return %c0_i32, %c0_i32_0 : i32, i32
  }
  func.func @transform_2(%arg0: i32) -> (i32, i32) {
    %c0_i32 = arith.constant 0 : i32
    %c0_i32_0 = arith.constant 0 : i32
    %c0_i32_1 = arith.constant 0 : i32
    return %c0_i32, %c0_i32_0 : i32, i32
  }
  func.func @transform_3(%arg0: i32) -> (i32, i32) {
    %c0_i32 = arith.constant 0 : i32
    %c0_i32_0 = arith.constant 0 : i32
    return %arg0, %c0_i32 : i32, i32
  }
}

module attributes {stable_mosaic.version = 11 : i64} {
  func.func @_sa_kernel(%arg0: i32, %arg1: i32, %arg2: memref<1x64x64xbf16, #tpu.memory_space<vmem>>, %arg3: memref<64x128xbf16, #tpu.memory_space<vmem>>, %arg4: memref<1x128xf32, #tpu.memory_space<vmem>>, %arg5: memref<64x192xbf16, #tpu.memory_space<vmem>>, %arg6: memref<1x192xf32, #tpu.memory_space<vmem>>, %arg7: memref<1x1xf32, #tpu.memory_space<smem>>, %arg8: memref<1x64x64xbf16, #tpu.memory_space<vmem>>) attributes {dimension_semantics = [#tpu.dimension_semantics<parallel>, #tpu.dimension_semantics<parallel>], iteration_bounds = array<i64: 2, 1>, scalar_prefetch = 0 : i64, scratch_operands = 0 : i64, tpu.core_type = #tpu.core_type<tc>, window_params = [{transform_indices = @transform_0, window_bounds = array<i64: 1, 64, 64>}, {pipeline_mode = #tpu.pipeline_mode<synchronous>, transform_indices = @transform_1, window_bounds = array<i64: 64, 128>}, {pipeline_mode = #tpu.pipeline_mode<synchronous>, transform_indices = @transform_2, window_bounds = array<i64: 1, 128>}, {pipeline_mode = #tpu.pipeline_mode<synchronous>, transform_indices = @transform_3, window_bounds = array<i64: 64, 192>}, {pipeline_mode = #tpu.pipeline_mode<synchronous>, transform_indices = @transform_4, window_bounds = array<i64: 1, 192>}, {transform_indices = @transform_5, window_bounds = array<i64: 1, 1>}, {transform_indices = @transform_6, window_bounds = array<i64: 1, 64, 64>}]} {
    %c64_i32 = arith.constant 64 : i32
    %0 = arith.muli %arg1, %c64_i32 : i32
    %1 = tpu.assume_multiple %0, 8 : i32
    %c0 = arith.constant 0 : index
    %2 = arith.index_cast %1 : i32 to index
    %c0_0 = arith.constant 0 : index
    %3 = vector.load %arg2[%c0, %2, %c0_0] : memref<1x64x64xbf16, #tpu.memory_space<vmem>>, vector<1x64x64xbf16>
    %4 = vector.shape_cast %3 : vector<1x64x64xbf16> to vector<64x64xbf16>
    %c0_1 = arith.constant 0 : index
    %c0_2 = arith.constant 0 : index
    %c0_3 = arith.constant 0 : index
    %5 = vector.load %arg2[%c0_1, %c0_2, %c0_3] : memref<1x64x64xbf16, #tpu.memory_space<vmem>>, vector<1x64x64xbf16>
    %6 = vector.shape_cast %5 : vector<1x64x64xbf16> to vector<64x64xbf16>
    %c0_4 = arith.constant 0 : index
    %c0_5 = arith.constant 0 : index
    %7 = vector.load %arg3[%c0_4, %c0_5] : memref<64x128xbf16, #tpu.memory_space<vmem>>, vector<64x128xbf16>
    %cst = arith.constant dense<0.000000e+00> : vector<64x128xf32>
    %8 = tpu.matmul %4, %7, %cst {dimension_numbers = #tpu.dot_dimension_numbers<[1], [0], [0], [1], [0, 0, 1, 1], [], []>} : vector<64x64xbf16>, vector<64x128xbf16>, vector<64x128xf32> -> vector<64x128xf32>
    %c0_6 = arith.constant 0 : index
    %c0_7 = arith.constant 0 : index
    %9 = vector.load %arg4[%c0_6, %c0_7] : memref<1x128xf32, #tpu.memory_space<vmem>>, vector<1x128xf32>
    %10 = vector.broadcast %9 : vector<1x128xf32> to vector<64x128xf32>
    %11 = arith.addf %8, %10 : vector<64x128xf32>
    %c0_8 = arith.constant 0 : index
    %c0_9 = arith.constant 0 : index
    %12 = vector.load %arg5[%c0_8, %c0_9] : memref<64x192xbf16, #tpu.memory_space<vmem>>, vector<64x192xbf16>
    %cst_10 = arith.constant dense<0.000000e+00> : vector<64x192xf32>
    %13 = tpu.matmul %6, %12, %cst_10 {dimension_numbers = #tpu.dot_dimension_numbers<[1], [0], [0], [1], [0, 0, 1, 1], [], []>} : vector<64x64xbf16>, vector<64x192xbf16>, vector<64x192xf32> -> vector<64x192xf32>
    %c0_11 = arith.constant 0 : index
    %c0_12 = arith.constant 0 : index
    %14 = vector.load %arg6[%c0_11, %c0_12] : memref<1x192xf32, #tpu.memory_space<vmem>>, vector<1x192xf32>
    %15 = vector.broadcast %14 : vector<1x192xf32> to vector<64x192xf32>
    %16 = arith.addf %13, %15 : vector<64x192xf32>
    %17 = vector.extract_strided_slice %16 {offsets = [0, 0], sizes = [64, 128], strides = [1, 1]} : vector<64x192xf32> to vector<64x128xf32>
    %18 = vector.extract_strided_slice %16 {offsets = [0, 128], sizes = [64, 64], strides = [1, 1]} : vector<64x192xf32> to vector<64x64xf32>
    %19 = arith.truncf %11 : vector<64x128xf32> to vector<64x128xbf16>
    %20 = arith.truncf %17 : vector<64x128xf32> to vector<64x128xbf16>
    %cst_13 = arith.constant dense<0.000000e+00> : vector<64x64xf32>
    %21 = tpu.matmul %19, %20, %cst_13 {dimension_numbers = #tpu.dot_dimension_numbers<[1], [1], [0], [0], [0, 0, 1, 0], [], []>} : vector<64x128xbf16>, vector<64x128xbf16>, vector<64x64xf32> -> vector<64x64xf32>
    %cst_14 = arith.constant dense<0xFF800000> : vector<64xf32>
    %22 = vector.multi_reduction <maximumf>, %21, %cst_14 [1] : vector<64x64xf32> to vector<64xf32>
    %23 = vector.shape_cast %22 : vector<64xf32> to vector<64x1xf32>
    %24 = vector.broadcast %23 : vector<64x1xf32> to vector<64x64xf32>
    %25 = arith.subf %21, %24 : vector<64x64xf32>
    %26 = math.exp %25 : vector<64x64xf32>
    %cst_15 = arith.constant dense<0.000000e+00> : vector<64xf32>
    %27 = vector.multi_reduction <add>, %26, %cst_15 [1] : vector<64x64xf32> to vector<64xf32>
    %28 = vector.shape_cast %27 : vector<64xf32> to vector<64x1xf32>
    %29 = arith.truncf %26 : vector<64x64xf32> to vector<64x64xbf16>
    %30 = arith.truncf %18 : vector<64x64xf32> to vector<64x64xbf16>
    %cst_16 = arith.constant dense<0.000000e+00> : vector<64x64xf32>
    %31 = tpu.matmul %29, %30, %cst_16 {dimension_numbers = #tpu.dot_dimension_numbers<[1], [0], [0], [1], [0, 0, 1, 1], [], []>} : vector<64x64xbf16>, vector<64x64xbf16>, vector<64x64xf32> -> vector<64x64xf32>
    %c0_17 = arith.constant 0 : index
    %c0_18 = arith.constant 0 : index
    %32 = memref.load %arg7[%c0_17, %c0_18] : memref<1x1xf32, #tpu.memory_space<smem>>
    %33 = tpu.reciprocal %28 {approx = true} : vector<64x1xf32> -> vector<64x1xf32>
    %34 = vector.broadcast %33 : vector<64x1xf32> to vector<64x64xf32>
    %35 = arith.mulf %31, %34 : vector<64x64xf32>
    %36 = vector.broadcast %32 : f32 to vector<64x64xf32>
    %37 = arith.mulf %36, %35 : vector<64x64xf32>
    %38 = arith.extf %4 : vector<64x64xbf16> to vector<64x64xf32>
    %39 = arith.addf %37, %38 : vector<64x64xf32>
    %40 = arith.truncf %39 : vector<64x64xf32> to vector<64x64xbf16>
    %c0_19 = arith.constant 0 : index
    %c0_20 = arith.constant 0 : index
    %c0_21 = arith.constant 0 : index
    %41 = vector.load %arg8[%c0_19, %c0_20, %c0_21] : memref<1x64x64xbf16, #tpu.memory_space<vmem>>, vector<1x64x64xbf16>
    %42 = vector.shape_cast %41 : vector<1x64x64xbf16> to vector<64x64xbf16>
    %43 = vector.shape_cast %40 : vector<64x64xbf16> to vector<1x64x64xbf16>
    tpu.vector_store %arg8[%c0_19, %c0_20, %c0_21], %43 {strides = array<i32>} : memref<1x64x64xbf16, #tpu.memory_space<vmem>>, vector<1x64x64xbf16>,
    return
  }
  func.func @transform_0(%arg0: i32, %arg1: i32) -> (i32, i32, i32) {
    %c0_i32 = arith.constant 0 : i32
    %c0_i32_0 = arith.constant 0 : i32
    %c0_i32_1 = arith.constant 0 : i32
    return %arg0, %c0_i32, %c0_i32_0 : i32, i32, i32
  }
  func.func @transform_1(%arg0: i32, %arg1: i32) -> (i32, i32) {
    %c0_i32 = arith.constant 0 : i32
    %c0_i32_0 = arith.constant 0 : i32
    %c0_i32_1 = arith.constant 0 : i32
    return %c0_i32, %c0_i32_0 : i32, i32
  }
  func.func @transform_2(%arg0: i32, %arg1: i32) -> (i32, i32) {
    %c0_i32 = arith.constant 0 : i32
    %c0_i32_0 = arith.constant 0 : i32
    %c0_i32_1 = arith.constant 0 : i32
    return %c0_i32, %c0_i32_0 : i32, i32
  }
  func.func @transform_3(%arg0: i32, %arg1: i32) -> (i32, i32) {
    %c0_i32 = arith.constant 0 : i32
    %c0_i32_0 = arith.constant 0 : i32
    %c0_i32_1 = arith.constant 0 : i32
    return %c0_i32, %c0_i32_0 : i32, i32
  }
  func.func @transform_4(%arg0: i32, %arg1: i32) -> (i32, i32) {
    %c0_i32 = arith.constant 0 : i32
    %c0_i32_0 = arith.constant 0 : i32
    %c0_i32_1 = arith.constant 0 : i32
    return %c0_i32, %c0_i32_0 : i32, i32
  }
  func.func @transform_5(%arg0: i32, %arg1: i32) -> (i32, i32) {
    %c0_i32 = arith.constant 0 : i32
    %c0_i32_0 = arith.constant 0 : i32
    %c0_i32_1 = arith.constant 0 : i32
    return %c0_i32, %c0_i32_0 : i32, i32
  }
  func.func @transform_6(%arg0: i32, %arg1: i32) -> (i32, i32, i32) {
    %c0_i32 = arith.constant 0 : i32
    %c0_i32_0 = arith.constant 0 : i32
    return %arg0, %arg1, %c0_i32 : i32, i32, i32
  }
}

module attributes {stable_mosaic.version = 11 : i64} {
  func.func @_pwconv_add_cos_kernel(%arg0: i32, %arg1: memref<128x64xbf16, #tpu.memory_space<vmem>>, %arg2: memref<64x64xbf16, #tpu.memory_space<vmem>>, %arg3: memref<1x64xf32, #tpu.memory_space<vmem>>, %arg4: memref<128x64xbf16, #tpu.memory_space<vmem>>, %arg5: memref<128x64xbf16, #tpu.memory_space<vmem>>, %arg6: memref<128x64xbf16, #tpu.memory_space<vmem>>, %arg7: memref<4x128xf32, #tpu.memory_space<vmem>>) attributes {dimension_semantics = [#tpu.dimension_semantics<parallel>], iteration_bounds = array<i64: 1>, scalar_prefetch = 0 : i64, scratch_operands = 0 : i64, tpu.core_type = #tpu.core_type<tc>, window_params = [{transform_indices = @transform_0, window_bounds = array<i64: 128, 64>}, {pipeline_mode = #tpu.pipeline_mode<synchronous>, transform_indices = @transform_1, window_bounds = array<i64: 64, 64>}, {pipeline_mode = #tpu.pipeline_mode<synchronous>, transform_indices = @transform_2, window_bounds = array<i64: 1, 64>}, {transform_indices = @transform_3, window_bounds = array<i64: 128, 64>}, {transform_indices = @transform_4, window_bounds = array<i64: 128, 64>}, {transform_indices = @transform_5, window_bounds = array<i64: 128, 64>}, {transform_indices = @transform_6, window_bounds = array<i64: 4, 128>}]} {
    %c0 = arith.constant 0 : index
    %c0_0 = arith.constant 0 : index
    %0 = vector.load %arg1[%c0, %c0_0] : memref<128x64xbf16, #tpu.memory_space<vmem>>, vector<128x64xbf16>
    %c0_1 = arith.constant 0 : index
    %c0_2 = arith.constant 0 : index
    %1 = vector.load %arg2[%c0_1, %c0_2] : memref<64x64xbf16, #tpu.memory_space<vmem>>, vector<64x64xbf16>
    %cst = arith.constant dense<0.000000e+00> : vector<128x64xf32>
    %2 = tpu.matmul %0, %1, %cst {dimension_numbers = #tpu.dot_dimension_numbers<[1], [0], [0], [1], [0, 0, 1, 1], [], []>} : vector<128x64xbf16>, vector<64x64xbf16>, vector<128x64xf32> -> vector<128x64xf32>
    %c0_3 = arith.constant 0 : index
    %c0_4 = arith.constant 0 : index
    %3 = vector.load %arg3[%c0_3, %c0_4] : memref<1x64xf32, #tpu.memory_space<vmem>>, vector<1x64xf32>
    %4 = vector.broadcast %3 : vector<1x64xf32> to vector<128x64xf32>
    %5 = arith.addf %2, %4 : vector<128x64xf32>
    %c0_5 = arith.constant 0 : index
    %c0_6 = arith.constant 0 : index
    %6 = vector.load %arg4[%c0_5, %c0_6] : memref<128x64xbf16, #tpu.memory_space<vmem>>, vector<128x64xbf16>
    %7 = arith.extf %6 : vector<128x64xbf16> to vector<128x64xf32>
    %8 = arith.addf %5, %7 : vector<128x64xf32>
    %cst_7 = arith.constant 0.000000e+00 : f32
    %9 = vector.broadcast %cst_7 : f32 to vector<128x64xf32>
    %10 = arith.maximumf %8, %9 : vector<128x64xf32>
    %11 = arith.truncf %10 : vector<128x64xf32> to vector<128x64xbf16>
    %c0_8 = arith.constant 0 : index
    %c0_9 = arith.constant 0 : index
    %12 = vector.load %arg6[%c0_8, %c0_9] : memref<128x64xbf16, #tpu.memory_space<vmem>>, vector<128x64xbf16>
    tpu.vector_store %arg6[%c0_8, %c0_9], %11 {strides = array<i32>} : memref<128x64xbf16, #tpu.memory_space<vmem>>, vector<128x64xbf16>,
    %c0_10 = arith.constant 0 : index
    %c0_11 = arith.constant 0 : index
    %13 = vector.load %arg5[%c0_10, %c0_11] : memref<128x64xbf16, #tpu.memory_space<vmem>>, vector<128x64xbf16>
    %14 = arith.extf %13 : vector<128x64xbf16> to vector<128x64xf32>
    %cst_12 = arith.constant 1.000000e+00 : f32
    %15 = vector.broadcast %cst_12 : f32 to vector<1x64xf32>
    %16 = arith.mulf %10, %14 : vector<128x64xf32>
    %cst_13 = arith.constant dense<0.000000e+00> : vector<1x128xf32>
    %17 = tpu.matmul %15, %16, %cst_13 {dimension_numbers = #tpu.dot_dimension_numbers<[1], [1], [0], [0], [0, 0, 1, 0], [], []>} : vector<1x64xf32>, vector<128x64xf32>, vector<1x128xf32> -> vector<1x128xf32>
    %18 = arith.mulf %10, %10 : vector<128x64xf32>
    %cst_14 = arith.constant dense<0.000000e+00> : vector<1x128xf32>
    %19 = tpu.matmul %15, %18, %cst_14 {dimension_numbers = #tpu.dot_dimension_numbers<[1], [1], [0], [0], [0, 0, 1, 0], [], []>} : vector<1x64xf32>, vector<128x64xf32>, vector<1x128xf32> -> vector<1x128xf32>
    %20 = arith.mulf %14, %14 : vector<128x64xf32>
    %cst_15 = arith.constant dense<0.000000e+00> : vector<1x128xf32>
    %21 = tpu.matmul %15, %20, %cst_15 {dimension_numbers = #tpu.dot_dimension_numbers<[1], [1], [0], [0], [0, 0, 1, 0], [], []>} : vector<1x64xf32>, vector<128x64xf32>, vector<1x128xf32> -> vector<1x128xf32>
    %22 = math.sqrt %19 : vector<1x128xf32>
    %cst_16 = arith.constant 9.99999993E-9 : f32
    %23 = vector.broadcast %cst_16 : f32 to vector<1x128xf32>
    %24 = arith.maximumf %22, %23 : vector<1x128xf32>
    %25 = math.sqrt %21 : vector<1x128xf32>
    %cst_17 = arith.constant 9.99999993E-9 : f32
    %26 = vector.broadcast %cst_17 : f32 to vector<1x128xf32>
    %27 = arith.maximumf %25, %26 : vector<1x128xf32>
    %28 = arith.mulf %24, %27 : vector<1x128xf32>
    %29 = arith.divf %17, %28 : vector<1x128xf32>
    %30 = tpu.concatenate %29, %17, %19, %21 in 0 : vector<1x128xf32>, vector<1x128xf32>, vector<1x128xf32>, vector<1x128xf32> -> vector<4x128xf32>
    %c0_18 = arith.constant 0 : index
    %c0_19 = arith.constant 0 : index
    %31 = vector.load %arg7[%c0_18, %c0_19] : memref<4x128xf32, #tpu.memory_space<vmem>>, vector<4x128xf32>
    tpu.vector_store %arg7[%c0_18, %c0_19], %30 {strides = array<i32>} : memref<4x128xf32, #tpu.memory_space<vmem>>, vector<4x128xf32>,
    return
  }
  func.func @transform_0(%arg0: i32) -> (i32, i32) {
    %c0_i32 = arith.constant 0 : i32
    %c0_i32_0 = arith.constant 0 : i32
    return %arg0, %c0_i32 : i32, i32
  }
  func.func @transform_1(%arg0: i32) -> (i32, i32) {
    %c0_i32 = arith.constant 0 : i32
    %c0_i32_0 = arith.constant 0 : i32
    %c0_i32_1 = arith.constant 0 : i32
    return %c0_i32, %c0_i32_0 : i32, i32
  }
  func.func @transform_2(%arg0: i32) -> (i32, i32) {
    %c0_i32 = arith.constant 0 : i32
    %c0_i32_0 = arith.constant 0 : i32
    %c0_i32_1 = arith.constant 0 : i32
    return %c0_i32, %c0_i32_0 : i32, i32
  }
  func.func @transform_3(%arg0: i32) -> (i32, i32) {
    %c0_i32 = arith.constant 0 : i32
    %c0_i32_0 = arith.constant 0 : i32
    return %arg0, %c0_i32 : i32, i32
  }
  func.func @transform_4(%arg0: i32) -> (i32, i32) {
    %c0_i32 = arith.constant 0 : i32
    %c0_i32_0 = arith.constant 0 : i32
    return %arg0, %c0_i32 : i32, i32
  }
  func.func @transform_5(%arg0: i32) -> (i32, i32) {
    %c0_i32 = arith.constant 0 : i32
    %c0_i32_0 = arith.constant 0 : i32
    return %arg0, %c0_i32 : i32, i32
  }
  func.func @transform_6(%arg0: i32) -> (i32, i32) {
    %c0_i32 = arith.constant 0 : i32
    %c0_i32_0 = arith.constant 0 : i32
    return %c0_i32, %arg0 : i32, i32
  }
}

module attributes {stable_mosaic.version = 11 : i64} {
  func.func @_pwconv_kernel(%arg0: i32, %arg1: memref<128x64xbf16, #tpu.memory_space<vmem>>, %arg2: memref<64x32xbf16, #tpu.memory_space<vmem>>, %arg3: memref<1x32xf32, #tpu.memory_space<vmem>>, %arg4: memref<128x32xbf16, #tpu.memory_space<vmem>>) attributes {dimension_semantics = [#tpu.dimension_semantics<parallel>], iteration_bounds = array<i64: 1>, scalar_prefetch = 0 : i64, scratch_operands = 0 : i64, tpu.core_type = #tpu.core_type<tc>, window_params = [{transform_indices = @transform_0, window_bounds = array<i64: 128, 64>}, {pipeline_mode = #tpu.pipeline_mode<synchronous>, transform_indices = @transform_1, window_bounds = array<i64: 64, 32>}, {pipeline_mode = #tpu.pipeline_mode<synchronous>, transform_indices = @transform_2, window_bounds = array<i64: 1, 32>}, {transform_indices = @transform_3, window_bounds = array<i64: 128, 32>}]} {
    %c0 = arith.constant 0 : index
    %c0_0 = arith.constant 0 : index
    %0 = vector.load %arg1[%c0, %c0_0] : memref<128x64xbf16, #tpu.memory_space<vmem>>, vector<128x64xbf16>
    %c0_1 = arith.constant 0 : index
    %c0_2 = arith.constant 0 : index
    %1 = vector.load %arg2[%c0_1, %c0_2] : memref<64x32xbf16, #tpu.memory_space<vmem>>, vector<64x32xbf16>
    %cst = arith.constant dense<0.000000e+00> : vector<128x32xf32>
    %2 = tpu.matmul %0, %1, %cst {dimension_numbers = #tpu.dot_dimension_numbers<[1], [0], [0], [1], [0, 0, 1, 1], [], []>} : vector<128x64xbf16>, vector<64x32xbf16>, vector<128x32xf32> -> vector<128x32xf32>
    %c0_3 = arith.constant 0 : index
    %c0_4 = arith.constant 0 : index
    %3 = vector.load %arg3[%c0_3, %c0_4] : memref<1x32xf32, #tpu.memory_space<vmem>>, vector<1x32xf32>
    %4 = vector.broadcast %3 : vector<1x32xf32> to vector<128x32xf32>
    %5 = arith.addf %2, %4 : vector<128x32xf32>
    %cst_5 = arith.constant 0.000000e+00 : f32
    %6 = vector.broadcast %cst_5 : f32 to vector<128x32xf32>
    %7 = arith.maximumf %5, %6 : vector<128x32xf32>
    %8 = arith.truncf %7 : vector<128x32xf32> to vector<128x32xbf16>
    %c0_6 = arith.constant 0 : index
    %c0_7 = arith.constant 0 : index
    %9 = vector.load %arg4[%c0_6, %c0_7] : memref<128x32xbf16, #tpu.memory_space<vmem>>, vector<128x32xbf16>
    tpu.vector_store %arg4[%c0_6, %c0_7], %8 {strides = array<i32>} : memref<128x32xbf16, #tpu.memory_space<vmem>>, vector<128x32xbf16>,
    return
  }
  func.func @transform_0(%arg0: i32) -> (i32, i32) {
    %c0_i32 = arith.constant 0 : i32
    %c0_i32_0 = arith.constant 0 : i32
    return %arg0, %c0_i32 : i32, i32
  }
  func.func @transform_1(%arg0: i32) -> (i32, i32) {
    %c0_i32 = arith.constant 0 : i32
    %c0_i32_0 = arith.constant 0 : i32
    %c0_i32_1 = arith.constant 0 : i32
    return %c0_i32, %c0_i32_0 : i32, i32
  }
  func.func @transform_2(%arg0: i32) -> (i32, i32) {
    %c0_i32 = arith.constant 0 : i32
    %c0_i32_0 = arith.constant 0 : i32
    %c0_i32_1 = arith.constant 0 : i32
    return %c0_i32, %c0_i32_0 : i32, i32
  }
  func.func @transform_3(%arg0: i32) -> (i32, i32) {
    %c0_i32 = arith.constant 0 : i32
    %c0_i32_0 = arith.constant 0 : i32
    return %arg0, %c0_i32 : i32, i32
  }
}

module attributes {stable_mosaic.version = 11 : i64} {
  func.func @_cos_kernel(%arg0: i32, %arg1: memref<256x32xbf16, #tpu.memory_space<vmem>>, %arg2: memref<256x32xbf16, #tpu.memory_space<vmem>>, %arg3: memref<4x256xf32, #tpu.memory_space<vmem>>) attributes {dimension_semantics = [#tpu.dimension_semantics<parallel>], iteration_bounds = array<i64: 2>, scalar_prefetch = 0 : i64, scratch_operands = 0 : i64, tpu.core_type = #tpu.core_type<tc>, window_params = [{transform_indices = @transform_0, window_bounds = array<i64: 256, 32>}, {transform_indices = @transform_1, window_bounds = array<i64: 256, 32>}, {transform_indices = @transform_2, window_bounds = array<i64: 4, 256>}]} {
    %c0 = arith.constant 0 : index
    %c0_0 = arith.constant 0 : index
    %0 = vector.load %arg1[%c0, %c0_0] : memref<256x32xbf16, #tpu.memory_space<vmem>>, vector<256x32xbf16>
    %1 = arith.extf %0 : vector<256x32xbf16> to vector<256x32xf32>
    %c0_1 = arith.constant 0 : index
    %c0_2 = arith.constant 0 : index
    %2 = vector.load %arg2[%c0_1, %c0_2] : memref<256x32xbf16, #tpu.memory_space<vmem>>, vector<256x32xbf16>
    %3 = arith.extf %2 : vector<256x32xbf16> to vector<256x32xf32>
    %cst = arith.constant 1.000000e+00 : f32
    %4 = vector.broadcast %cst : f32 to vector<1x32xf32>
    %5 = arith.mulf %1, %3 : vector<256x32xf32>
    %cst_3 = arith.constant dense<0.000000e+00> : vector<1x256xf32>
    %6 = tpu.matmul %4, %5, %cst_3 {dimension_numbers = #tpu.dot_dimension_numbers<[1], [1], [0], [0], [0, 0, 1, 0], [], []>} : vector<1x32xf32>, vector<256x32xf32>, vector<1x256xf32> -> vector<1x256xf32>
    %7 = arith.mulf %1, %1 : vector<256x32xf32>
    %cst_4 = arith.constant dense<0.000000e+00> : vector<1x256xf32>
    %8 = tpu.matmul %4, %7, %cst_4 {dimension_numbers = #tpu.dot_dimension_numbers<[1], [1], [0], [0], [0, 0, 1, 0], [], []>} : vector<1x32xf32>, vector<256x32xf32>, vector<1x256xf32> -> vector<1x256xf32>
    %9 = arith.mulf %3, %3 : vector<256x32xf32>
    %cst_5 = arith.constant dense<0.000000e+00> : vector<1x256xf32>
    %10 = tpu.matmul %4, %9, %cst_5 {dimension_numbers = #tpu.dot_dimension_numbers<[1], [1], [0], [0], [0, 0, 1, 0], [], []>} : vector<1x32xf32>, vector<256x32xf32>, vector<1x256xf32> -> vector<1x256xf32>
    %11 = math.sqrt %8 : vector<1x256xf32>
    %cst_6 = arith.constant 9.99999993E-9 : f32
    %12 = vector.broadcast %cst_6 : f32 to vector<1x256xf32>
    %13 = arith.maximumf %11, %12 : vector<1x256xf32>
    %14 = math.sqrt %10 : vector<1x256xf32>
    %cst_7 = arith.constant 9.99999993E-9 : f32
    %15 = vector.broadcast %cst_7 : f32 to vector<1x256xf32>
    %16 = arith.maximumf %14, %15 : vector<1x256xf32>
    %17 = arith.mulf %13, %16 : vector<1x256xf32>
    %18 = arith.divf %6, %17 : vector<1x256xf32>
    %19 = tpu.concatenate %18, %6, %8, %10 in 0 : vector<1x256xf32>, vector<1x256xf32>, vector<1x256xf32>, vector<1x256xf32> -> vector<4x256xf32>
    %c0_8 = arith.constant 0 : index
    %c0_9 = arith.constant 0 : index
    %20 = vector.load %arg3[%c0_8, %c0_9] : memref<4x256xf32, #tpu.memory_space<vmem>>, vector<4x256xf32>
    tpu.vector_store %arg3[%c0_8, %c0_9], %19 {strides = array<i32>} : memref<4x256xf32, #tpu.memory_space<vmem>>, vector<4x256xf32>,
    return
  }
  func.func @transform_0(%arg0: i32) -> (i32, i32) {
    %c0_i32 = arith.constant 0 : i32
    %c0_i32_0 = arith.constant 0 : i32
    return %arg0, %c0_i32 : i32, i32
  }
  func.func @transform_1(%arg0: i32) -> (i32, i32) {
    %c0_i32 = arith.constant 0 : i32
    %c0_i32_0 = arith.constant 0 : i32
    return %arg0, %c0_i32 : i32, i32
  }
  func.func @transform_2(%arg0: i32) -> (i32, i32) {
    %c0_i32 = arith.constant 0 : i32
    %c0_i32_0 = arith.constant 0 : i32
    return %c0_i32, %arg0 : i32, i32
  }
}

</mosaic_0001>

<bundles_post_ra>
// kernel: e2ad_forward.20
= control target key start
LH: loop header
LB: loop body
LE: loop exit
PB: predicated region body
PF: predicated region fallthrough
CT: control target
= control target key end

     0   :  { %s1171_s12 = smov 0   ;;  %s1463_s0 = inlined_call_operand.vmem [shape: bf16[1024,3], index: 0, kind: input, shape index: {}]   ;;  %s1464_s1 = inlined_call_operand.vmem [shape: bf16[3,32], index: 1, kind: input, shape index: {}]   ;;  %s1465_s2 = inlined_call_operand.vmem [shape: f32[1,32], index: 2, kind: input, shape index: {}]   ;;  %s1466_s3 = inlined_call_operand.vmem [shape: bf16[1024,32], index: 3, kind: output, shape index: {}]  }
   0x1 LB: > { %s926_s13 = sadd.s32 4294967295, %s1148_s12   ;;  %p930_p0 = scmp.ge.s32.totalorder %s1148_s12, 1  ;;  %s1148_s12 = sphi %s1171_s12, %s13_s12  }
   0x2   : > { %p138_p1 = scmp.lt.s32.totalorder %s1148_s12, 3 }
   0x4   : > { %p139_p2 = pnand %p930_p0, %p138_p1 }
   0x5   : > { %s931_s16 = sshll.u32 (!%p139_p2), %s926_s13, 6 }
   0x6   : > { %142 = sbr.rel (%p139_p2) target bundleno = 280 (0x118), region = 32  ;;  %p163_p3 = scmp.lt.s32.totalorder (!%p139_p2), %s931_s16, 127 }
   0xb   : > { %v239_v0 = vld [vmem:[%s1464_s1] sm:$0x3]  ;;  %vm501_vm0 = vcmask 1040384   ;;  %vm502_vm1 = vcmask 1041408   ;;  %v1150_v1 = vmov 65535   ;;  %s1468_s16 = smov (!%p163_p3, %s931_s16), 127 }
   0xc   : > { %v503_v2 = vsel %vm501_vm0, 4294967295, %v1150_v1  ;;  %s932_s17 = sshll.u32 %s1468_s16, 2  ;;  %vm404_vm2 = vcmask 23552   ;;  %v1259_v37 = vld [vmem:[%s1465_s2] ss:$0 sm:$0xff]  ;;  %vm805_vm3 = vcmask 257024  }
   0xd   : > { %v504_v3 = vsel %vm502_vm1, %v503_v2, 0  ;;  %s1190_s20 = scalar_lea.vmem %s1463_s0, %s932_s17  ;;  %s1268_s25 = scalar_lea.vmem %s1466_s3, %s932_s17 }
   0xe   : > { %v506_v4 = vand.u32 %v504_v3, %v239_v0  ;;  %v1097_v5 = vld [vmem:[%s1190_s20] sm:$0xff]  ;;  %v1098_v9 = vld [vmem:[%s1190_s20 + $0x8] sm:$0xff]  ;;  %v1099_v13 = vld [vmem:[%s1190_s20 + $0x10] sm:$0xff] }
   0xf   : > { %v1105_v6 = vld [vmem:[%s1190_s20 + $0x40] sm:$0xff]  ;;  %v1106_v10 = vld [vmem:[%s1190_s20 + $0x48] sm:$0xff]  ;;  %v1107_v14 = vld [vmem:[%s1190_s20 + $0x50] sm:$0xff] }
  0x10   : > { %515 = vmatpush.bf16.msra.mxu0 %v506_v4  ;;  %1129 = vmatpush.bf16.msra.mxu1 %v506_v4  ;;  %v1113_v7 = vld [vmem:[%s1190_s20 + $0x80] sm:$0xff]  ;;  %v1114_v11 = vld [vmem:[%s1190_s20 + $0x88] sm:$0xff]  ;;  %v1115_v15 = vld [vmem:[%s1190_s20 + $0x90] sm:$0xff] }
  0x11   : > { %1130 = vmatpush.bf16.msra.mxu2 %v506_v4  ;;  %1131 = vmatpush.bf16.msra.mxu3 %v506_v4  ;;  %v1121_v8 = vld [vmem:[%s1190_s20 + $0xc0] sm:$0xff]  ;;  %v1122_v12 = vld [vmem:[%s1190_s20 + $0xc8] sm:$0xff]  ;;  %v1123_v16 = vld [vmem:[%s1190_s20 + $0xd0] sm:$0xff] }
  0x12   : > { %v1100_v17 = vld [vmem:[%s1190_s20 + $0x18] sm:$0xff]  ;;  %v1101_v21 = vld [vmem:[%s1190_s20 + $0x20] sm:$0xff]  ;;  %v1102_v25 = vld [vmem:[%s1190_s20 + $0x28] sm:$0xff] }
  0x13   : > { %1063 = vmatmul.msk.bf16.vlgmr.msra.gmra.mxu0 %vm404_vm2, %v1097_v5  ;;  %1071 = vmatmul.msk.bf16.vlgmr.msra.gmra.mxu1 %vm404_vm2, %v1105_v6  ;;  %v1108_v18 = vld [vmem:[%s1190_s20 + $0x58] sm:$0xff]  ;;  %v1109_v22 = vld [vmem:[%s1190_s20 + $0x60] sm:$0xff]  ;;  %v1110_v26 = vld [vmem:[%s1190_s20 + $0x68] sm:$0xff] }
  0x14   : > { %1079 = vmatmul.msk.bf16.vlgmr.msra.gmra.mxu2 %vm404_vm2, %v1113_v7  ;;  %1087 = vmatmul.msk.bf16.vlgmr.msra.gmra.mxu3 %vm404_vm2, %v1121_v8  ;;  %v1116_v19 = vld [vmem:[%s1190_s20 + $0x98] sm:$0xff]  ;;  %v1117_v23 = vld [vmem:[%s1190_s20 + $0xa0] sm:$0xff]  ;;  %v1118_v27 = vld [vmem:[%s1190_s20 + $0xa8] sm:$0xff] }
  0x15   : > { %v1124_v20 = vld [vmem:[%s1190_s20 + $0xd8] sm:$0xff]  ;;  %v1125_v24 = vld [vmem:[%s1190_s20 + $0xe0] sm:$0xff]  ;;  %v1126_v28 = vld [vmem:[%s1190_s20 + $0xe8] sm:$0xff] }
  0x16   : > { %v1103_v29 = vld [vmem:[%s1190_s20 + $0x30] sm:$0xff]  ;;  %v1104_v33 = vld [vmem:[%s1190_s20 + $0x38] sm:$0xff] }
  0x17   : > { %v1111_v30 = vld [vmem:[%s1190_s20 + $0x70] sm:$0xff]  ;;  %v1112_v34 = vld [vmem:[%s1190_s20 + $0x78] sm:$0xff] }
  0x18   : > { %v1119_v31 = vld [vmem:[%s1190_s20 + $0xb0] sm:$0xff]  ;;  %v1120_v35 = vld [vmem:[%s1190_s20 + $0xb8] sm:$0xff] }
  0x19   : > { %v1127_v32 = vld [vmem:[%s1190_s20 + $0xf0] sm:$0xff]  ;;  %v1128_v36 = vld [vmem:[%s1190_s20 + $0xf8] sm:$0xff] }
  0x23   : > { %1064 = vmatmul.msk.bf16.gmra.mxu0 %vm404_vm2, %v1098_v9  ;;  %1072 = vmatmul.msk.bf16.gmra.mxu1 %vm404_vm2, %v1106_v10 }
  0x24   : > { %1080 = vmatmul.msk.bf16.gmra.mxu2 %vm404_vm2, %v1114_v11  ;;  %1088 = vmatmul.msk.bf16.gmra.mxu3 %vm404_vm2, %v1122_v12 }
  0x33   : > { %1065 = vmatmul.msk.bf16.gmra.mxu0 %vm404_vm2, %v1099_v13  ;;  %1073 = vmatmul.msk.bf16.gmra.mxu1 %vm404_vm2, %v1107_v14 }
  0x34   : > { %1081 = vmatmul.msk.bf16.gmra.mxu2 %vm404_vm2, %v1115_v15  ;;  %1089 = vmatmul.msk.bf16.gmra.mxu3 %vm404_vm2, %v1123_v16 }
  0x43   : > { %1066 = vmatmul.msk.bf16.gmra.mxu0 %vm404_vm2, %v1100_v17  ;;  %1074 = vmatmul.msk.bf16.gmra.mxu1 %vm404_vm2, %v1108_v18 }
  0x44   : > { %1082 = vmatmul.msk.bf16.gmra.mxu2 %vm404_vm2, %v1116_v19  ;;  %1090 = vmatmul.msk.bf16.gmra.mxu3 %vm404_vm2, %v1124_v20 }
  0x53   : > { %1067 = vmatmul.msk.bf16.gmra.mxu0 %vm404_vm2, %v1101_v21  ;;  %1075 = vmatmul.msk.bf16.gmra.mxu1 %vm404_vm2, %v1109_v22 }
  0x54   : > { %1083 = vmatmul.msk.bf16.gmra.mxu2 %vm404_vm2, %v1117_v23  ;;  %1091 = vmatmul.msk.bf16.gmra.mxu3 %vm404_vm2, %v1125_v24 }
  0x63   : > { %1068 = vmatmul.msk.bf16.gmra.mxu0 %vm404_vm2, %v1102_v25  ;;  %1076 = vmatmul.msk.bf16.gmra.mxu1 %vm404_vm2, %v1110_v26 }
  0x64   : > { %1084 = vmatmul.msk.bf16.gmra.mxu2 %vm404_vm2, %v1118_v27  ;;  %1092 = vmatmul.msk.bf16.gmra.mxu3 %vm404_vm2, %v1126_v28 }
  0x73   : > { %1069 = vmatmul.msk.bf16.gmra.mxu0 %vm404_vm2, %v1103_v29  ;;  %1077 = vmatmul.msk.bf16.gmra.mxu1 %vm404_vm2, %v1111_v30 }
  0x74   : > { %1085 = vmatmul.msk.bf16.gmra.mxu2 %vm404_vm2, %v1119_v31  ;;  %1093 = vmatmul.msk.bf16.gmra.mxu3 %vm404_vm2, %v1127_v32 }
  0x83   : > { %1070 = vmatmul.msk.bf16.gmra.mxu0 %vm404_vm2, %v1104_v33  ;;  %1078 = vmatmul.msk.bf16.gmra.mxu1 %vm404_vm2, %v1112_v34 }
  0x84   : > { %1086 = vmatmul.msk.bf16.gmra.mxu2 %vm404_vm2, %v1120_v35  ;;  %1094 = vmatmul.msk.bf16.gmra.mxu3 %vm404_vm2, %v1128_v36 }
  0x90   : > { %v517_v38 = vpop.f32.mrf.mxu0  ;;  %v557_v39 = vpop.f32.mrf.mxu1 }
  0x91   : > { %v518_v40 = vadd.f32 %v1259_v37, %v517_v38  ;;  %v558_v41 = vadd.f32 %v1259_v37, %v557_v39 }
  0x93   : > { %v677_v42 = vmax.f32 %v518_v40, 0.0  ;;  %v693_v43 = vmax.f32 %v558_v41, 0.0 }
  0x95   : > { %v741_v44 = vpack.c.bf16 %v677_v42, %v677_v42  ;;  %v757_v45 = vpack.c.bf16 %v693_v43, %v693_v43 }
  0x97   : > { %806 = vst.msk [vmem:[%s1268_s25] sm:$0xf] %vm805_vm3, %v741_v44  ;;  %v597_v46 = vpop.f32.mrf.mxu2  ;;  %v637_v47 = vpop.f32.mrf.mxu3 }
  0x98   : > { %822 = vst.msk [vmem:[%s1268_s25 + $0x40] sm:$0xf] %vm805_vm3, %v757_v45  ;;  %v598_v48 = vadd.f32 %v1259_v37, %v597_v46  ;;  %v638_v49 = vadd.f32 %v1259_v37, %v637_v47  ;;  %v519_v50 = vpop.f32.mrf.mxu0  ;;  %v559_v51 = vpop.f32.mrf.mxu1 }
  0x99   : > { %v520_v52 = vadd.f32 %v1259_v37, %v519_v50  ;;  %v560_v53 = vadd.f32 %v1259_v37, %v559_v51 }
  0x9a   : > { %v709_v54 = vmax.f32 %v598_v48, 0.0  ;;  %v725_v55 = vmax.f32 %v638_v49, 0.0 }
  0x9b   : > { %v678_v56 = vmax.f32 %v520_v52, 0.0  ;;  %v694_v57 = vmax.f32 %v560_v53, 0.0 }
  0x9c   : > { %v773_v58 = vpack.c.bf16 %v709_v54, %v709_v54  ;;  %v789_v59 = vpack.c.bf16 %v725_v55, %v725_v55 }
  0x9d   : > { %v742_v60 = vpack.c.bf16 %v678_v56, %v678_v56  ;;  %v758_v61 = vpack.c.bf16 %v694_v57, %v694_v57 }
  0x9e   : > { %838 = vst.msk [vmem:[%s1268_s25 + $0x80] sm:$0xf] %vm805_vm3, %v773_v58 }
  0x9f   : > { %854 = vst.msk [vmem:[%s1268_s25 + $0xc0] sm:$0xf] %vm805_vm3, %v789_v59  ;;  %v599_v62 = vpop.f32.mrf.mxu2  ;;  %v639_v63 = vpop.f32.mrf.mxu3 }
  0xa0   : > { %807 = vst.msk [vmem:[%s1268_s25 + $0x4] sm:$0xf] %vm805_vm3, %v742_v60  ;;  %v600_v0 = vadd.f32 %v1259_v37, %v599_v62  ;;  %v640_v1 = vadd.f32 %v1259_v37, %v639_v63  ;;  %v522_v2 = vpop.f32.mrf.mxu0  ;;  %v562_v3 = vpop.f32.mrf.mxu1 }
  0xa1   : > { %823 = vst.msk [vmem:[%s1268_s25 + $0x44] sm:$0xf] %vm805_vm3, %v758_v61  ;;  %v523_v4 = vadd.f32 %v1259_v37, %v522_v2  ;;  %v563_v5 = vadd.f32 %v1259_v37, %v562_v3 }
  0xa2   : > { %v710_v6 = vmax.f32 %v600_v0, 0.0  ;;  %v726_v7 = vmax.f32 %v640_v1, 0.0 }
  0xa3   : > { %v679_v8 = vmax.f32 %v523_v4, 0.0  ;;  %v695_v9 = vmax.f32 %v563_v5, 0.0 }
  0xa4   : > { %v774_v10 = vpack.c.bf16 %v710_v6, %v710_v6  ;;  %v790_v11 = vpack.c.bf16 %v726_v7, %v726_v7 }
  0xa5   : > { %v743_v12 = vpack.c.bf16 %v679_v8, %v679_v8  ;;  %v759_v13 = vpack.c.bf16 %v695_v9, %v695_v9 }
  0xa6   : > { %839 = vst.msk [vmem:[%s1268_s25 + $0x84] sm:$0xf] %vm805_vm3, %v774_v10 }
  0xa7   : > { %855 = vst.msk [vmem:[%s1268_s25 + $0xc4] sm:$0xf] %vm805_vm3, %v790_v11  ;;  %v602_v14 = vpop.f32.mrf.mxu2  ;;  %v642_v15 = vpop.f32.mrf.mxu3 }
  0xa8   : > { %808 = vst.msk [vmem:[%s1268_s25 + $0x8] sm:$0xf] %vm805_vm3, %v743_v12  ;;  %v603_v16 = vadd.f32 %v1259_v37, %v602_v14  ;;  %v643_v17 = vadd.f32 %v1259_v37, %v642_v15  ;;  %v524_v18 = vpop.f32.mrf.mxu0  ;;  %v564_v19 = vpop.f32.mrf.mxu1 }
  0xa9   : > { %824 = vst.msk [vmem:[%s1268_s25 + $0x48] sm:$0xf] %vm805_vm3, %v759_v13  ;;  %v525_v20 = vadd.f32 %v1259_v37, %v524_v18  ;;  %v565_v21 = vadd.f32 %v1259_v37, %v564_v19 }
  0xaa   : > { %v711_v22 = vmax.f32 %v603_v16, 0.0  ;;  %v727_v23 = vmax.f32 %v643_v17, 0.0 }
  0xab   : > { %v680_v24 = vmax.f32 %v525_v20, 0.0  ;;  %v696_v25 = vmax.f32 %v565_v21, 0.0 }
  0xac   : > { %v775_v26 = vpack.c.bf16 %v711_v22, %v711_v22  ;;  %v791_v27 = vpack.c.bf16 %v727_v23, %v727_v23 }
  0xad   : > { %v744_v28 = vpack.c.bf16 %v680_v24, %v680_v24  ;;  %v760_v29 = vpack.c.bf16 %v696_v25, %v696_v25 }
  0xae   : > { %840 = vst.msk [vmem:[%s1268_s25 + $0x88] sm:$0xf] %vm805_vm3, %v775_v26 }
  0xaf   : > { %856 = vst.msk [vmem:[%s1268_s25 + $0xc8] sm:$0xf] %vm805_vm3, %v791_v27  ;;  %v604_v30 = vpop.f32.mrf.mxu2  ;;  %v644_v31 = vpop.f32.mrf.mxu3 }
  0xb0   : > { %809 = vst.msk [vmem:[%s1268_s25 + $0xc] sm:$0xf] %vm805_vm3, %v744_v28  ;;  %v605_v32 = vadd.f32 %v1259_v37, %v604_v30  ;;  %v645_v33 = vadd.f32 %v1259_v37, %v644_v31  ;;  %v527_v34 = vpop.f32.mrf.mxu0  ;;  %v567_v35 = vpop.f32.mrf.mxu1 }
  0xb1   : > { %825 = vst.msk [vmem:[%s1268_s25 + $0x4c] sm:$0xf] %vm805_vm3, %v760_v29  ;;  %v528_v36 = vadd.f32 %v1259_v37, %v527_v34  ;;  %v568_v38 = vadd.f32 %v1259_v37, %v567_v35 }
  0xb2   : > { %v712_v39 = vmax.f32 %v605_v32, 0.0  ;;  %v728_v40 = vmax.f32 %v645_v33, 0.0 }
  0xb3   : > { %v681_v41 = vmax.f32 %v528_v36, 0.0  ;;  %v697_v42 = vmax.f32 %v568_v38, 0.0 }
  0xb4   : > { %v776_v43 = vpack.c.bf16 %v712_v39, %v712_v39  ;;  %v792_v44 = vpack.c.bf16 %v728_v40, %v728_v40 }
  0xb5   : > { %v745_v45 = vpack.c.bf16 %v681_v41, %v681_v41  ;;  %v761_v46 = vpack.c.bf16 %v697_v42, %v697_v42 }
  0xb6   : > { %841 = vst.msk [vmem:[%s1268_s25 + $0x8c] sm:$0xf] %vm805_vm3, %v776_v43 }
  0xb7   : > { %857 = vst.msk [vmem:[%s1268_s25 + $0xcc] sm:$0xf] %vm805_vm3, %v792_v44  ;;  %v607_v47 = vpop.f32.mrf.mxu2  ;;  %v647_v48 = vpop.f32.mrf.mxu3 }
  0xb8   : > { %810 = vst.msk [vmem:[%s1268_s25 + $0x10] sm:$0xf] %vm805_vm3, %v745_v45  ;;  %v608_v49 = vadd.f32 %v1259_v37, %v607_v47  ;;  %v648_v50 = vadd.f32 %v1259_v37, %v647_v48  ;;  %v529_v51 = vpop.f32.mrf.mxu0  ;;  %v569_v52 = vpop.f32.mrf.mxu1 }
  0xb9   : > { %826 = vst.msk [vmem:[%s1268_s25 + $0x50] sm:$0xf] %vm805_vm3, %v761_v46  ;;  %v530_v53 = vadd.f32 %v1259_v37, %v529_v51  ;;  %v570_v54 = vadd.f32 %v1259_v37, %v569_v52 }
  0xba   : > { %v713_v55 = vmax.f32 %v608_v49, 0.0  ;;  %v729_v56 = vmax.f32 %v648_v50, 0.0 }
  0xbb   : > { %v682_v57 = vmax.f32 %v530_v53, 0.0  ;;  %v698_v58 = vmax.f32 %v570_v54, 0.0 }
  0xbc   : > { %v777_v59 = vpack.c.bf16 %v713_v55, %v713_v55  ;;  %v793_v60 = vpack.c.bf16 %v729_v56, %v729_v56 }
  0xbd   : > { %v746_v61 = vpack.c.bf16 %v682_v57, %v682_v57  ;;  %v762_v62 = vpack.c.bf16 %v698_v58, %v698_v58 }
  0xbe   : > { %842 = vst.msk [vmem:[%s1268_s25 + $0x90] sm:$0xf] %vm805_vm3, %v777_v59 }
  0xbf   : > { %858 = vst.msk [vmem:[%s1268_s25 + $0xd0] sm:$0xf] %vm805_vm3, %v793_v60  ;;  %v609_v63 = vpop.f32.mrf.mxu2  ;;  %v649_v0 = vpop.f32.mrf.mxu3 }
  0xc0   : > { %811 = vst.msk [vmem:[%s1268_s25 + $0x14] sm:$0xf] %vm805_vm3, %v746_v61  ;;  %v610_v1 = vadd.f32 %v1259_v37, %v609_v63  ;;  %v650_v2 = vadd.f32 %v1259_v37, %v649_v0  ;;  %v532_v3 = vpop.f32.mrf.mxu0  ;;  %v572_v4 = vpop.f32.mrf.mxu1 }
  0xc1   : > { %827 = vst.msk [vmem:[%s1268_s25 + $0x54] sm:$0xf] %vm805_vm3, %v762_v62  ;;  %v533_v5 = vadd.f32 %v1259_v37, %v532_v3  ;;  %v573_v6 = vadd.f32 %v1259_v37, %v572_v4 }
  0xc2   : > { %v714_v7 = vmax.f32 %v610_v1, 0.0  ;;  %v730_v8 = vmax.f32 %v650_v2, 0.0 }
  0xc3   : > { %v683_v9 = vmax.f32 %v533_v5, 0.0  ;;  %v699_v10 = vmax.f32 %v573_v6, 0.0 }
  0xc4   : > { %v778_v11 = vpack.c.bf16 %v714_v7, %v714_v7  ;;  %v794_v12 = vpack.c.bf16 %v730_v8, %v730_v8 }
  0xc5   : > { %v747_v13 = vpack.c.bf16 %v683_v9, %v683_v9  ;;  %v763_v14 = vpack.c.bf16 %v699_v10, %v699_v10 }
  0xc6   : > { %843 = vst.msk [vmem:[%s1268_s25 + $0x94] sm:$0xf] %vm805_vm3, %v778_v11 }
  0xc7   : > { %859 = vst.msk [vmem:[%s1268_s25 + $0xd4] sm:$0xf] %vm805_vm3, %v794_v12  ;;  %v612_v15 = vpop.f32.mrf.mxu2  ;;  %v652_v16 = vpop.f32.mrf.mxu3 }
  0xc8   : > { %812 = vst.msk [vmem:[%s1268_s25 + $0x18] sm:$0xf] %vm805_vm3, %v747_v13  ;;  %v613_v17 = vadd.f32 %v1259_v37, %v612_v15  ;;  %v653_v18 = vadd.f32 %v1259_v37, %v652_v16  ;;  %v534_v19 = vpop.f32.mrf.mxu0  ;;  %v574_v20 = vpop.f32.mrf.mxu1 }
  0xc9   : > { %828 = vst.msk [vmem:[%s1268_s25 + $0x58] sm:$0xf] %vm805_vm3, %v763_v14  ;;  %v535_v21 = vadd.f32 %v1259_v37, %v534_v19  ;;  %v575_v22 = vadd.f32 %v1259_v37, %v574_v20 }
  0xca   : > { %v715_v23 = vmax.f32 %v613_v17, 0.0  ;;  %v731_v24 = vmax.f32 %v653_v18, 0.0 }
  0xcb   : > { %v684_v25 = vmax.f32 %v535_v21, 0.0  ;;  %v700_v26 = vmax.f32 %v575_v22, 0.0 }
  0xcc   : > { %v779_v27 = vpack.c.bf16 %v715_v23, %v715_v23  ;;  %v795_v28 = vpack.c.bf16 %v731_v24, %v731_v24 }
  0xcd   : > { %v748_v29 = vpack.c.bf16 %v684_v25, %v684_v25  ;;  %v764_v30 = vpack.c.bf16 %v700_v26, %v700_v26 }
  0xce   : > { %844 = vst.msk [vmem:[%s1268_s25 + $0x98] sm:$0xf] %vm805_vm3, %v779_v27 }
  0xcf   : > { %860 = vst.msk [vmem:[%s1268_s25 + $0xd8] sm:$0xf] %vm805_vm3, %v795_v28  ;;  %v614_v31 = vpop.f32.mrf.mxu2  ;;  %v654_v32 = vpop.f32.mrf.mxu3 }
  0xd0   : > { %813 = vst.msk [vmem:[%s1268_s25 + $0x1c] sm:$0xf] %vm805_vm3, %v748_v29  ;;  %v615_v33 = vadd.f32 %v1259_v37, %v614_v31  ;;  %v655_v34 = vadd.f32 %v1259_v37, %v654_v32  ;;  %v537_v35 = vpop.f32.mrf.mxu0  ;;  %v577_v36 = vpop.f32.mrf.mxu1 }
  0xd1   : > { %829 = vst.msk [vmem:[%s1268_s25 + $0x5c] sm:$0xf] %vm805_vm3, %v764_v30  ;;  %v538_v38 = vadd.f32 %v1259_v37, %v537_v35  ;;  %v578_v39 = vadd.f32 %v1259_v37, %v577_v36 }
  0xd2   : > { %v716_v40 = vmax.f32 %v615_v33, 0.0  ;;  %v732_v41 = vmax.f32 %v655_v34, 0.0 }
  0xd3   : > { %v685_v42 = vmax.f32 %v538_v38, 0.0  ;;  %v701_v43 = vmax.f32 %v578_v39, 0.0 }
  0xd4   : > { %v780_v44 = vpack.c.bf16 %v716_v40, %v716_v40  ;;  %v796_v45 = vpack.c.bf16 %v732_v41, %v732_v41 }
  0xd5   : > { %v749_v46 = vpack.c.bf16 %v685_v42, %v685_v42  ;;  %v765_v47 = vpack.c.bf16 %v701_v43, %v701_v43 }
  0xd6   : > { %845 = vst.msk [vmem:[%s1268_s25 + $0x9c] sm:$0xf] %vm805_vm3, %v780_v44 }
  0xd7   : > { %861 = vst.msk [vmem:[%s1268_s25 + $0xdc] sm:$0xf] %vm805_vm3, %v796_v45  ;;  %v617_v48 = vpop.f32.mrf.mxu2  ;;  %v657_v49 = vpop.f32.mrf.mxu3 }
  0xd8   : > { %814 = vst.msk [vmem:[%s1268_s25 + $0x20] sm:$0xf] %vm805_vm3, %v749_v46  ;;  %v618_v50 = vadd.f32 %v1259_v37, %v617_v48  ;;  %v658_v51 = vadd.f32 %v1259_v37, %v657_v49  ;;  %v539_v52 = vpop.f32.mrf.mxu0  ;;  %v579_v53 = vpop.f32.mrf.mxu1 }
  0xd9   : > { %830 = vst.msk [vmem:[%s1268_s25 + $0x60] sm:$0xf] %vm805_vm3, %v765_v47  ;;  %v540_v54 = vadd.f32 %v1259_v37, %v539_v52  ;;  %v580_v55 = vadd.f32 %v1259_v37, %v579_v53 }
  0xda   : > { %v717_v56 = vmax.f32 %v618_v50, 0.0  ;;  %v733_v57 = vmax.f32 %v658_v51, 0.0 }
  0xdb   : > { %v686_v58 = vmax.f32 %v540_v54, 0.0  ;;  %v702_v59 = vmax.f32 %v580_v55, 0.0 }
  0xdc   : > { %v781_v60 = vpack.c.bf16 %v717_v56, %v717_v56  ;;  %v797_v61 = vpack.c.bf16 %v733_v57, %v733_v57 }
  0xdd   : > { %v750_v62 = vpack.c.bf16 %v686_v58, %v686_v58  ;;  %v766_v63 = vpack.c.bf16 %v702_v59, %v702_v59 }
  0xde   : > { %846 = vst.msk [vmem:[%s1268_s25 + $0xa0] sm:$0xf] %vm805_vm3, %v781_v60 }
  0xdf   : > { %862 = vst.msk [vmem:[%s1268_s25 + $0xe0] sm:$0xf] %vm805_vm3, %v797_v61  ;;  %v619_v0 = vpop.f32.mrf.mxu2  ;;  %v659_v1 = vpop.f32.mrf.mxu3 }
  0xe0   : > { %815 = vst.msk [vmem:[%s1268_s25 + $0x24] sm:$0xf] %vm805_vm3, %v750_v62  ;;  %v620_v2 = vadd.f32 %v1259_v37, %v619_v0  ;;  %v660_v3 = vadd.f32 %v1259_v37, %v659_v1  ;;  %v542_v4 = vpop.f32.mrf.mxu0  ;;  %v582_v5 = vpop.f32.mrf.mxu1 }
  0xe1   : > { %831 = vst.msk [vmem:[%s1268_s25 + $0x64] sm:$0xf] %vm805_vm3, %v766_v63  ;;  %v543_v6 = vadd.f32 %v1259_v37, %v542_v4  ;;  %v583_v7 = vadd.f32 %v1259_v37, %v582_v5 }
  0xe2   : > { %v718_v8 = vmax.f32 %v620_v2, 0.0  ;;  %v734_v9 = vmax.f32 %v660_v3, 0.0 }
  0xe3   : > { %v687_v10 = vmax.f32 %v543_v6, 0.0  ;;  %v703_v11 = vmax.f32 %v583_v7, 0.0 }
  0xe4   : > { %v782_v12 = vpack.c.bf16 %v718_v8, %v718_v8  ;;  %v798_v13 = vpack.c.bf16 %v734_v9, %v734_v9 }
  0xe5   : > { %v751_v14 = vpack.c.bf16 %v687_v10, %v687_v10  ;;  %v767_v15 = vpack.c.bf16 %v703_v11, %v703_v11 }
  0xe6   : > { %847 = vst.msk [vmem:[%s1268_s25 + $0xa4] sm:$0xf] %vm805_vm3, %v782_v12 }
  0xe7   : > { %863 = vst.msk [vmem:[%s1268_s25 + $0xe4] sm:$0xf] %vm805_vm3, %v798_v13  ;;  %v622_v16 = vpop.f32.mrf.mxu2  ;;  %v662_v17 = vpop.f32.mrf.mxu3 }
  0xe8   : > { %816 = vst.msk [vmem:[%s1268_s25 + $0x28] sm:$0xf] %vm805_vm3, %v751_v14  ;;  %v623_v18 = vadd.f32 %v1259_v37, %v622_v16  ;;  %v663_v19 = vadd.f32 %v1259_v37, %v662_v17  ;;  %v544_v20 = vpop.f32.mrf.mxu0  ;;  %v584_v21 = vpop.f32.mrf.mxu1 }
  0xe9   : > { %832 = vst.msk [vmem:[%s1268_s25 + $0x68] sm:$0xf] %vm805_vm3, %v767_v15  ;;  %v545_v22 = vadd.f32 %v1259_v37, %v544_v20  ;;  %v585_v23 = vadd.f32 %v1259_v37, %v584_v21 }
  0xea   : > { %v719_v24 = vmax.f32 %v623_v18, 0.0  ;;  %v735_v25 = vmax.f32 %v663_v19, 0.0 }
  0xeb   : > { %v688_v26 = vmax.f32 %v545_v22, 0.0  ;;  %v704_v27 = vmax.f32 %v585_v23, 0.0 }
  0xec   : > { %v783_v28 = vpack.c.bf16 %v719_v24, %v719_v24  ;;  %v799_v29 = vpack.c.bf16 %v735_v25, %v735_v25 }
  0xed   : > { %v752_v30 = vpack.c.bf16 %v688_v26, %v688_v26  ;;  %v768_v31 = vpack.c.bf16 %v704_v27, %v704_v27 }
  0xee   : > { %848 = vst.msk [vmem:[%s1268_s25 + $0xa8] sm:$0xf] %vm805_vm3, %v783_v28 }
  0xef   : > { %864 = vst.msk [vmem:[%s1268_s25 + $0xe8] sm:$0xf] %vm805_vm3, %v799_v29  ;;  %v624_v32 = vpop.f32.mrf.mxu2  ;;  %v664_v33 = vpop.f32.mrf.mxu3 }
  0xf0   : > { %817 = vst.msk [vmem:[%s1268_s25 + $0x2c] sm:$0xf] %vm805_vm3, %v752_v30  ;;  %v625_v34 = vadd.f32 %v1259_v37, %v624_v32  ;;  %v665_v35 = vadd.f32 %v1259_v37, %v664_v33  ;;  %v547_v36 = vpop.f32.mrf.mxu0  ;;  %v587_v38 = vpop.f32.mrf.mxu1 }
  0xf1   : > { %833 = vst.msk [vmem:[%s1268_s25 + $0x6c] sm:$0xf] %vm805_vm3, %v768_v31  ;;  %v548_v39 = vadd.f32 %v1259_v37, %v547_v36  ;;  %v588_v40 = vadd.f32 %v1259_v37, %v587_v38 }
  0xf2   : > { %v720_v41 = vmax.f32 %v625_v34, 0.0  ;;  %v736_v42 = vmax.f32 %v665_v35, 0.0 }
  0xf3   : > { %v689_v43 = vmax.f32 %v548_v39, 0.0  ;;  %v705_v44 = vmax.f32 %v588_v40, 0.0 }
  0xf4   : > { %v784_v45 = vpack.c.bf16 %v720_v41, %v720_v41  ;;  %v800_v46 = vpack.c.bf16 %v736_v42, %v736_v42 }
  0xf5   : > { %v753_v47 = vpack.c.bf16 %v689_v43, %v689_v43  ;;  %v769_v48 = vpack.c.bf16 %v705_v44, %v705_v44 }
  0xf6   : > { %849 = vst.msk [vmem:[%s1268_s25 + $0xac] sm:$0xf] %vm805_vm3, %v784_v45 }
  0xf7   : > { %865 = vst.msk [vmem:[%s1268_s25 + $0xec] sm:$0xf] %vm805_vm3, %v800_v46  ;;  %v627_v49 = vpop.f32.mrf.mxu2  ;;  %v667_v50 = vpop.f32.mrf.mxu3 }
  0xf8   : > { %818 = vst.msk [vmem:[%s1268_s25 + $0x30] sm:$0xf] %vm805_vm3, %v753_v47  ;;  %v628_v51 = vadd.f32 %v1259_v37, %v627_v49  ;;  %v668_v52 = vadd.f32 %v1259_v37, %v667_v50  ;;  %v549_v53 = vpop.f32.mrf.mxu0  ;;  %v589_v54 = vpop.f32.mrf.mxu1 }
  0xf9   : > { %834 = vst.msk [vmem:[%s1268_s25 + $0x70] sm:$0xf] %vm805_vm3, %v769_v48  ;;  %v550_v55 = vadd.f32 %v1259_v37, %v549_v53  ;;  %v590_v56 = vadd.f32 %v1259_v37, %v589_v54 }
  0xfa   : > { %v721_v57 = vmax.f32 %v628_v51, 0.0  ;;  %v737_v58 = vmax.f32 %v668_v52, 0.0 }
  0xfb   : > { %v690_v59 = vmax.f32 %v550_v55, 0.0  ;;  %v706_v60 = vmax.f32 %v590_v56, 0.0 }
  0xfc   : > { %v785_v61 = vpack.c.bf16 %v721_v57, %v721_v57  ;;  %v801_v62 = vpack.c.bf16 %v737_v58, %v737_v58 }
  0xfd   : > { %v754_v63 = vpack.c.bf16 %v690_v59, %v690_v59  ;;  %v770_v0 = vpack.c.bf16 %v706_v60, %v706_v60 }
  0xfe   : > { %850 = vst.msk [vmem:[%s1268_s25 + $0xb0] sm:$0xf] %vm805_vm3, %v785_v61 }
  0xff   : > { %866 = vst.msk [vmem:[%s1268_s25 + $0xf0] sm:$0xf] %vm805_vm3, %v801_v62  ;;  %v629_v1 = vpop.f32.mrf.mxu2  ;;  %v669_v2 = vpop.f32.mrf.mxu3 }
 0x100   : > { %819 = vst.msk [vmem:[%s1268_s25 + $0x34] sm:$0xf] %vm805_vm3, %v754_v63  ;;  %v630_v3 = vadd.f32 %v1259_v37, %v629_v1  ;;  %v670_v4 = vadd.f32 %v1259_v37, %v669_v2  ;;  %v552_v5 = vpop.f32.mrf.mxu0  ;;  %v592_v6 = vpop.f32.mrf.mxu1 }
 0x101   : > { %835 = vst.msk [vmem:[%s1268_s25 + $0x74] sm:$0xf] %vm805_vm3, %v770_v0  ;;  %v553_v7 = vadd.f32 %v1259_v37, %v552_v5  ;;  %v593_v8 = vadd.f32 %v1259_v37, %v592_v6 }
 0x102   : > { %v722_v9 = vmax.f32 %v630_v3, 0.0  ;;  %v738_v10 = vmax.f32 %v670_v4, 0.0 }
 0x103   : > { %v691_v11 = vmax.f32 %v553_v7, 0.0  ;;  %v707_v12 = vmax.f32 %v593_v8, 0.0 }
 0x104   : > { %v786_v13 = vpack.c.bf16 %v722_v9, %v722_v9  ;;  %v802_v14 = vpack.c.bf16 %v738_v10, %v738_v10 }
 0x105   : > { %v755_v15 = vpack.c.bf16 %v691_v11, %v691_v11  ;;  %v771_v16 = vpack.c.bf16 %v707_v12, %v707_v12 }
 0x106   : > { %851 = vst.msk [vmem:[%s1268_s25 + $0xb4] sm:$0xf] %vm805_vm3, %v786_v13 }
 0x107   : > { %867 = vst.msk [vmem:[%s1268_s25 + $0xf4] sm:$0xf] %vm805_vm3, %v802_v14  ;;  %v632_v17 = vpop.f32.mrf.mxu2  ;;  %v672_v18 = vpop.f32.mrf.mxu3 }
 0x108   : > { %820 = vst.msk [vmem:[%s1268_s25 + $0x38] sm:$0xf] %vm805_vm3, %v755_v15  ;;  %v633_v19 = vadd.f32 %v1259_v37, %v632_v17  ;;  %v673_v20 = vadd.f32 %v1259_v37, %v672_v18  ;;  %v554_v21 = vpop.f32.mrf.mxu0  ;;  %v594_v22 = vpop.f32.mrf.mxu1 }
 0x109   : > { %836 = vst.msk [vmem:[%s1268_s25 + $0x78] sm:$0xf] %vm805_vm3, %v771_v16  ;;  %v555_v23 = vadd.f32 %v1259_v37, %v554_v21  ;;  %v595_v24 = vadd.f32 %v1259_v37, %v594_v22 }
 0x10a   : > { %v723_v25 = vmax.f32 %v633_v19, 0.0  ;;  %v739_v26 = vmax.f32 %v673_v20, 0.0 }
 0x10b   : > { %v692_v27 = vmax.f32 %v555_v23, 0.0  ;;  %v708_v28 = vmax.f32 %v595_v24, 0.0 }
 0x10c   : > { %v787_v29 = vpack.c.bf16 %v723_v25, %v723_v25  ;;  %v803_v30 = vpack.c.bf16 %v739_v26, %v739_v26 }
 0x10d   : > { %v756_v31 = vpack.c.bf16 %v692_v27, %v692_v27  ;;  %v772_v32 = vpack.c.bf16 %v708_v28, %v708_v28 }
 0x10e   : > { %852 = vst.msk [vmem:[%s1268_s25 + $0xb8] sm:$0xf] %vm805_vm3, %v787_v29 }
 0x10f   : > { %868 = vst.msk [vmem:[%s1268_s25 + $0xf8] sm:$0xf] %vm805_vm3, %v803_v30  ;;  %v634_v33 = vpop.f32.mrf.mxu2  ;;  %v674_v34 = vpop.f32.mrf.mxu3 }
 0x110   : > { %821 = vst.msk [vmem:[%s1268_s25 + $0x3c] sm:$0xf] %vm805_vm3, %v756_v31  ;;  %v635_v35 = vadd.f32 %v1259_v37, %v634_v33  ;;  %v675_v36 = vadd.f32 %v1259_v37, %v674_v34 }
 0x111   : > { %837 = vst.msk [vmem:[%s1268_s25 + $0x7c] sm:$0xf] %vm805_vm3, %v772_v32 }
 0x112   : > { %v724_v38 = vmax.f32 %v635_v35, 0.0  ;;  %v740_v39 = vmax.f32 %v675_v36, 0.0 }
 0x114   : > { %v788_v40 = vpack.c.bf16 %v724_v38, %v724_v38  ;;  %v804_v41 = vpack.c.bf16 %v740_v39, %v740_v39 }
 0x116   : > { %853 = vst.msk [vmem:[%s1268_s25 + $0xbc] sm:$0xf] %vm805_vm3, %v788_v40 }
 0x117   : > { %869 = vst.msk [vmem:[%s1268_s25 + $0xfc] sm:$0xf] %vm805_vm3, %v804_v41 }
 0x118 PF: > { %s13_s12 = sadd.s32 1, %s1148_s12  }
 0x119   : > { %p10_p4 = scmp.ge.s32.totalorder %s13_s12, 4  }
 0x11b   :  { %12 = sbr.rel (!%p10_p4) target bundleno = 1 (0x1), region = 62 }

// kernel: e2ad_forward.21
= control target key start
LH: loop header
LB: loop body
LE: loop exit
PB: predicated region body
PF: predicated region fallthrough
CT: control target
= control target key end

     0   :  { %s542_s12 = smov 0   ;;  %s635_s0 = inlined_call_operand.vmem [shape: bf16[256,32], index: 0, kind: input, shape index: {}]   ;;  %s636_s1 = inlined_call_operand.vmem [shape: bf16[32,64], index: 1, kind: input, shape index: {}]   ;;  %s637_s2 = inlined_call_operand.vmem [shape: f32[1,64], index: 2, kind: input, shape index: {}]   ;;  %s638_s3 = inlined_call_operand.vmem [shape: bf16[256,64], index: 3, kind: output, shape index: {}]  }
   0x1 LB: > { %s430_s13 = sadd.s32 4294967295, %s520_s12   ;;  %p434_p0 = scmp.ge.s32.totalorder %s520_s12, 1  ;;  %s520_s12 = sphi %s542_s12, %s13_s12  }
   0x2   : > { %p138_p1 = scmp.lt.s32.totalorder %s520_s12, 3 }
   0x4   : > { %p139_p2 = pnand %p434_p0, %p138_p1 }
   0x5   : > { %s435_s16 = sshll.u32 (!%p139_p2), %s430_s13, 4 }
   0x6   : > { %142 = sbr.rel (%p139_p2) target bundleno = 184 (0xb8), region = 32  ;;  %p163_p3 = scmp.lt.s32.totalorder (!%p139_p2), %s435_s16, 31 }
   0xb   : > { %v498_v0 = vld [vmem:[%s636_s1 + $0x8] sm:$0xff]  ;;  %v497_v1 = vld [vmem:[%s636_s1] sm:$0xff]  ;;  %s640_s16 = smov (!%p163_p3, %s435_s16), 31  ;;  %vm251_vm0 = vcmask 261120   ;;  %vm357_vm1 = vcmask 519168  }
   0xc   : > { %282 = vmatpush.bf16.msra.mxu0 %v498_v0  ;;  %499 = vmatpush.bf16.msra.mxu1 %v498_v0  ;;  %s436_s19 = sshll.u32 %s640_s16, 2  ;;  %v575_v10 = vld [vmem:[%s637_s2] ss:$0 sm:$0xff] }
   0xd   : > { %500 = vmatpush.bf16.msra.mxu2 %v498_v0  ;;  %501 = vmatpush.bf16.msra.mxu3 %v498_v0  ;;  %s166_s22 = scalar_lea.vmem %s635_s0, %s436_s19  ;;  %s584_s27 = scalar_lea.vmem %s638_s3, %s436_s19 }
   0xe   : > { %v489_v2 = vld [vmem:[%s166_s22] sm:$0xff]  ;;  %v491_v3 = vld [vmem:[%s166_s22 + $0x10] sm:$0xff]  ;;  %v490_v6 = vld [vmem:[%s166_s22 + $0x8] sm:$0xff] }
   0xf   : > { %v493_v4 = vld [vmem:[%s166_s22 + $0x20] sm:$0xff]  ;;  %v495_v5 = vld [vmem:[%s166_s22 + $0x30] sm:$0xff]  ;;  %v492_v7 = vld [vmem:[%s166_s22 + $0x18] sm:$0xff] }
  0x10   : > { %283 = vmatpush.bf16.msra.mxu0 %v497_v1  ;;  %502 = vmatpush.bf16.msra.mxu1 %v497_v1  ;;  %v494_v8 = vld [vmem:[%s166_s22 + $0x28] sm:$0xff]  ;;  %v496_v9 = vld [vmem:[%s166_s22 + $0x38] sm:$0xff] }
  0x11   : > { %503 = vmatpush.bf16.msra.mxu2 %v497_v1  ;;  %504 = vmatpush.bf16.msra.mxu3 %v497_v1 }
  0x13   : > { %479 = vmatmul.msk.bf16.vlgmr.msra.gmra.mxu0 %vm251_vm0, %v489_v2  ;;  %481 = vmatmul.msk.bf16.vlgmr.msra.gmra.mxu1 %vm251_vm0, %v491_v3 }
  0x14   : > { %483 = vmatmul.msk.bf16.vlgmr.msra.gmra.mxu2 %vm251_vm0, %v493_v4  ;;  %485 = vmatmul.msk.bf16.vlgmr.msra.gmra.mxu3 %vm251_vm0, %v495_v5 }
  0x23   : > { %480 = vmatmul.msk.bf16.gmra.mxu0 %vm251_vm0, %v490_v6  ;;  %482 = vmatmul.msk.bf16.gmra.mxu1 %vm251_vm0, %v492_v7 }
  0x24   : > { %484 = vmatmul.msk.bf16.gmra.mxu2 %vm251_vm0, %v494_v8  ;;  %486 = vmatmul.msk.bf16.gmra.mxu3 %vm251_vm0, %v496_v9 }
  0x90   : > { %v285_v11 = vpop.f32.mrf.mxu0  ;;  %v295_v12 = vpop.f32.mrf.mxu1 }
  0x91   : > { %v286_v13 = vadd.f32 %v575_v10, %v285_v11  ;;  %v296_v14 = vadd.f32 %v575_v10, %v295_v12 }
  0x93   : > { %v325_v15 = vmax.f32 %v286_v13, 0.0  ;;  %v329_v16 = vmax.f32 %v296_v14, 0.0 }
  0x95   : > { %v341_v17 = vpack.c.bf16 %v325_v15, %v325_v15  ;;  %v345_v18 = vpack.c.bf16 %v329_v16, %v329_v16 }
  0x97   : > { %358 = vst.msk [vmem:[%s584_s27] sm:$0xf] %vm357_vm1, %v341_v17  ;;  %v305_v19 = vpop.f32.mrf.mxu2  ;;  %v315_v20 = vpop.f32.mrf.mxu3 }
  0x98   : > { %362 = vst.msk [vmem:[%s584_s27 + $0x10] sm:$0xf] %vm357_vm1, %v345_v18  ;;  %v306_v21 = vadd.f32 %v575_v10, %v305_v19  ;;  %v316_v22 = vadd.f32 %v575_v10, %v315_v20  ;;  %v287_v23 = vpop.f32.mrf.mxu0  ;;  %v297_v24 = vpop.f32.mrf.mxu1 }
  0x99   : > { %v288_v25 = vadd.f32 %v575_v10, %v287_v23  ;;  %v298_v26 = vadd.f32 %v575_v10, %v297_v24 }
  0x9a   : > { %v333_v27 = vmax.f32 %v306_v21, 0.0  ;;  %v337_v28 = vmax.f32 %v316_v22, 0.0 }
  0x9b   : > { %v326_v29 = vmax.f32 %v288_v25, 0.0  ;;  %v330_v30 = vmax.f32 %v298_v26, 0.0 }
  0x9c   : > { %v349_v31 = vpack.c.bf16 %v333_v27, %v333_v27  ;;  %v353_v32 = vpack.c.bf16 %v337_v28, %v337_v28 }
  0x9d   : > { %v342_v33 = vpack.c.bf16 %v326_v29, %v326_v29  ;;  %v346_v34 = vpack.c.bf16 %v330_v30, %v330_v30 }
  0x9e   : > { %366 = vst.msk [vmem:[%s584_s27 + $0x20] sm:$0xf] %vm357_vm1, %v349_v31 }
  0x9f   : > { %370 = vst.msk [vmem:[%s584_s27 + $0x30] sm:$0xf] %vm357_vm1, %v353_v32  ;;  %v307_v35 = vpop.f32.mrf.mxu2  ;;  %v317_v36 = vpop.f32.mrf.mxu3 }
  0xa0   : > { %359 = vst.msk [vmem:[%s584_s27 + $0x4] sm:$0xf] %vm357_vm1, %v342_v33  ;;  %v308_v37 = vadd.f32 %v575_v10, %v307_v35  ;;  %v318_v38 = vadd.f32 %v575_v10, %v317_v36  ;;  %v290_v39 = vpop.f32.mrf.mxu0  ;;  %v300_v40 = vpop.f32.mrf.mxu1 }
  0xa1   : > { %363 = vst.msk [vmem:[%s584_s27 + $0x14] sm:$0xf] %vm357_vm1, %v346_v34  ;;  %v291_v41 = vadd.f32 %v575_v10, %v290_v39  ;;  %v301_v42 = vadd.f32 %v575_v10, %v300_v40 }
  0xa2   : > { %v334_v43 = vmax.f32 %v308_v37, 0.0  ;;  %v338_v44 = vmax.f32 %v318_v38, 0.0 }
  0xa3   : > { %v327_v45 = vmax.f32 %v291_v41, 0.0  ;;  %v331_v46 = vmax.f32 %v301_v42, 0.0 }
  0xa4   : > { %v350_v47 = vpack.c.bf16 %v334_v43, %v334_v43  ;;  %v354_v48 = vpack.c.bf16 %v338_v44, %v338_v44 }
  0xa5   : > { %v343_v49 = vpack.c.bf16 %v327_v45, %v327_v45  ;;  %v347_v50 = vpack.c.bf16 %v331_v46, %v331_v46 }
  0xa6   : > { %367 = vst.msk [vmem:[%s584_s27 + $0x24] sm:$0xf] %vm357_vm1, %v350_v47 }
  0xa7   : > { %371 = vst.msk [vmem:[%s584_s27 + $0x34] sm:$0xf] %vm357_vm1, %v354_v48  ;;  %v310_v51 = vpop.f32.mrf.mxu2  ;;  %v320_v52 = vpop.f32.mrf.mxu3 }
  0xa8   : > { %360 = vst.msk [vmem:[%s584_s27 + $0x8] sm:$0xf] %vm357_vm1, %v343_v49  ;;  %v311_v53 = vadd.f32 %v575_v10, %v310_v51  ;;  %v321_v54 = vadd.f32 %v575_v10, %v320_v52  ;;  %v292_v55 = vpop.f32.mrf.mxu0  ;;  %v302_v56 = vpop.f32.mrf.mxu1 }
  0xa9   : > { %364 = vst.msk [vmem:[%s584_s27 + $0x18] sm:$0xf] %vm357_vm1, %v347_v50  ;;  %v293_v57 = vadd.f32 %v575_v10, %v292_v55  ;;  %v303_v58 = vadd.f32 %v575_v10, %v302_v56 }
  0xaa   : > { %v335_v59 = vmax.f32 %v311_v53, 0.0  ;;  %v339_v60 = vmax.f32 %v321_v54, 0.0 }
  0xab   : > { %v328_v61 = vmax.f32 %v293_v57, 0.0  ;;  %v332_v62 = vmax.f32 %v303_v58, 0.0 }
  0xac   : > { %v351_v63 = vpack.c.bf16 %v335_v59, %v335_v59  ;;  %v355_v0 = vpack.c.bf16 %v339_v60, %v339_v60 }
  0xad   : > { %v344_v1 = vpack.c.bf16 %v328_v61, %v328_v61  ;;  %v348_v2 = vpack.c.bf16 %v332_v62, %v332_v62 }
  0xae   : > { %368 = vst.msk [vmem:[%s584_s27 + $0x28] sm:$0xf] %vm357_vm1, %v351_v63 }
  0xaf   : > { %372 = vst.msk [vmem:[%s584_s27 + $0x38] sm:$0xf] %vm357_vm1, %v355_v0  ;;  %v312_v3 = vpop.f32.mrf.mxu2  ;;  %v322_v4 = vpop.f32.mrf.mxu3 }
  0xb0   : > { %361 = vst.msk [vmem:[%s584_s27 + $0xc] sm:$0xf] %vm357_vm1, %v344_v1  ;;  %v313_v5 = vadd.f32 %v575_v10, %v312_v3  ;;  %v323_v6 = vadd.f32 %v575_v10, %v322_v4 }
  0xb1   : > { %365 = vst.msk [vmem:[%s584_s27 + $0x1c] sm:$0xf] %vm357_vm1, %v348_v2 }
  0xb2   : > { %v336_v7 = vmax.f32 %v313_v5, 0.0  ;;  %v340_v8 = vmax.f32 %v323_v6, 0.0 }
  0xb4   : > { %v352_v9 = vpack.c.bf16 %v336_v7, %v336_v7  ;;  %v356_v11 = vpack.c.bf16 %v340_v8, %v340_v8 }
  0xb6   : > { %369 = vst.msk [vmem:[%s584_s27 + $0x2c] sm:$0xf] %vm357_vm1, %v352_v9 }
  0xb7   : > { %373 = vst.msk [vmem:[%s584_s27 + $0x3c] sm:$0xf] %vm357_vm1, %v356_v11 }
  0xb8 PF: > { %s13_s12 = sadd.s32 1, %s520_s12  }
  0xb9   : > { %p10_p4 = scmp.ge.s32.totalorder %s13_s12, 4  }
  0xbb   :  { %12 = sbr.rel (!%p10_p4) target bundleno = 1 (0x1), region = 62 }

// kernel: e2ad_forward.22
= control target key start
LH: loop header
LB: loop body
LE: loop exit
PB: predicated region body
PF: predicated region fallthrough
CT: control target
= control target key end

     0   :  { %vm79_vm0 = vcmask 523264   ;;  %s288_s1 = inlined_call_operand.vmem [shape: bf16[64,128], index: 1, kind: input, shape index: {}]   ;;  %s289_s2 = inlined_call_operand.vmem [shape: f32[1,128], index: 2, kind: input, shape index: {}]   ;;  %s290_s0 = inlined_call_operand.vmem [shape: bf16[64,64], index: 0, kind: input, shape index: {}]   ;;  %s291_s3 = inlined_call_operand.vmem [shape: bf16[64,128], index: 3, kind: output, shape index: {}]  }
   0x1   :  { %v192_v0 = vld [vmem:[%s288_s1 + $0x18] sm:$0xff]  ;;  %v191_v1 = vld [vmem:[%s288_s1 + $0x10] sm:$0xff]  ;;  %v190_v2 = vld [vmem:[%s288_s1 + $0x8] sm:$0xff] }
   0x2   :  { %96 = vmatpush.bf16.msra.mxu0 %v192_v0  ;;  %216 = vmatpush.bf16.msra.mxu1 %v192_v0  ;;  %v189_v3 = vld [vmem:[%s288_s1] sm:$0xff]  ;;  %v186_v5 = vld [vmem:[%s290_s0 + $0x8] sm:$0xff]  ;;  %v187_v6 = vld [vmem:[%s290_s0 + $0x10] sm:$0xff] }
   0x3   :  { %217 = vmatpush.bf16.msra.mxu2 %v192_v0  ;;  %218 = vmatpush.bf16.msra.mxu3 %v192_v0  ;;  %v185_v4 = vld [vmem:[%s290_s0] sm:$0xff]  ;;  %v188_v7 = vld [vmem:[%s290_s0 + $0x18] sm:$0xff] }
   0x4   :  { %v228_v10 = vld [vmem:[%s289_s2] ss:$0 sm:$0xff] }
   0x6   :  { %97 = vmatpush.bf16.msra.mxu0 %v191_v1  ;;  %219 = vmatpush.bf16.msra.mxu1 %v191_v1 }
   0x7   :  { %220 = vmatpush.bf16.msra.mxu2 %v191_v1  ;;  %221 = vmatpush.bf16.msra.mxu3 %v191_v1 }
   0xa   :  { %98 = vmatpush.bf16.msra.mxu0 %v190_v2  ;;  %222 = vmatpush.bf16.msra.mxu1 %v190_v2 }
   0xb   :  { %223 = vmatpush.bf16.msra.mxu2 %v190_v2  ;;  %224 = vmatpush.bf16.msra.mxu3 %v190_v2 }
   0xe   :  { %99 = vmatpush.bf16.msra.mxu0 %v189_v3  ;;  %225 = vmatpush.bf16.msra.mxu1 %v189_v3 }
   0xf   :  { %226 = vmatpush.bf16.msra.mxu2 %v189_v3  ;;  %227 = vmatpush.bf16.msra.mxu3 %v189_v3 }
  0x11   :  { %181 = vmatmul.msk.bf16.vlgmr.msra.gmra.mxu0 %vm79_vm0, %v185_v4  ;;  %182 = vmatmul.msk.bf16.vlgmr.msra.gmra.mxu1 %vm79_vm0, %v186_v5 }
  0x12   :  { %183 = vmatmul.msk.bf16.vlgmr.msra.gmra.mxu2 %vm79_vm0, %v187_v6  ;;  %184 = vmatmul.msk.bf16.vlgmr.msra.gmra.mxu3 %vm79_vm0, %v188_v7 }
  0x8e   :  { %v101_v8 = vpop.f32.mrf.mxu0  ;;  %v106_v9 = vpop.f32.mrf.mxu1 }
  0x8f   :  { %v102_v11 = vadd.f32 %v228_v10, %v101_v8  ;;  %v107_v12 = vadd.f32 %v228_v10, %v106_v9 }
  0x91   :  { %v121_v19 = vmax.f32 %v102_v11, 0.0  ;;  %v123_v20 = vmax.f32 %v107_v12, 0.0 }
  0x95   :  { %v111_v13 = vpop.f32.mrf.mxu2  ;;  %v116_v14 = vpop.f32.mrf.mxu3 }
  0x96   :  { %v103_v15 = vpop.f32.mrf.mxu0  ;;  %v108_v16 = vpop.f32.mrf.mxu1  ;;  %v112_v25 = vadd.f32 %v228_v10, %v111_v13  ;;  %v117_v26 = vadd.f32 %v228_v10, %v116_v14 }
  0x97   :  { %v104_v17 = vadd.f32 %v228_v10, %v103_v15  ;;  %v109_v18 = vadd.f32 %v228_v10, %v108_v16 }
  0x98   :  { %v125_v31 = vmax.f32 %v112_v25, 0.0  ;;  %v127_v32 = vmax.f32 %v117_v26, 0.0 }
  0x99   :  { %v122_v21 = vmax.f32 %v104_v17, 0.0  ;;  %v124_v22 = vmax.f32 %v109_v18, 0.0 }
  0x9b   :  { %v196_v23 = vpack.c.bf16 %v122_v21, %v121_v19  ;;  %v201_v24 = vpack.c.bf16 %v124_v22, %v123_v20 }
  0x9d   :  { %197 = vst [vmem:[%s291_s3] sm:$0xff] %v196_v23   ;;  %v113_v27 = vpop.f32.mrf.mxu2  ;;  %v118_v28 = vpop.f32.mrf.mxu3 }
  0x9e   :  { %213 = vst [vmem:[%s291_s3 + $0x8] sm:$0xff] %v201_v24   ;;  %v114_v29 = vadd.f32 %v228_v10, %v113_v27  ;;  %v119_v30 = vadd.f32 %v228_v10, %v118_v28 }
  0xa0   :  { %v126_v33 = vmax.f32 %v114_v29, 0.0  ;;  %v128_v34 = vmax.f32 %v119_v30, 0.0 }
  0xa2   :  { %v206_v35 = vpack.c.bf16 %v126_v33, %v125_v31  ;;  %v211_v36 = vpack.c.bf16 %v128_v34, %v127_v32 }
  0xa4   :  { %214 = vst [vmem:[%s291_s3 + $0x10] sm:$0xff] %v206_v35  }
  0xa5   :  { %215 = vst [vmem:[%s291_s3 + $0x18] sm:$0xff] %v211_v36  }

// kernel: e2ad_forward.23
= control target key start
LH: loop header
LB: loop body
LE: loop exit
PB: predicated region body
PF: predicated region fallthrough
CT: control target
= control target key end

     0   :  { %s377_s1 = inlined_call_operand.vmem [shape: bf16[128,256], index: 1, kind: input, shape index: {}]   ;;  %s378_s0 = inlined_call_operand.vmem [shape: bf16[16,128], index: 0, kind: input, shape index: {}]   ;;  %s379_s2 = inlined_call_operand.vmem [shape: f32[1,256], index: 2, kind: input, shape index: {}]   ;;  %s380_s3 = inlined_call_operand.vmem [shape: bf16[16,256], index: 3, kind: output, shape index: {}]  }
   0x1   :  { %v226_v0 = vld [vmem:[%s377_s1 + $0x70] sm:$0xf]  ;;  %v248_v1 = vld [vmem:[%s377_s1 + $0x74] sm:$0xf0]  ;;  %v247_v2 = vld [vmem:[%s377_s1 + $0x74] sm:$0xf] }
   0x2   :  { %v227_v3 = vor.u32 %v248_v1, %v226_v0  ;;  %v228_v4 = vld [vmem:[%s377_s1 + $0x78] sm:$0xf0]  ;;  %v218_v5 = vld [vmem:[%s377_s1 + $0x60] sm:$0xf]  ;;  %v246_v6 = vld [vmem:[%s377_s1 + $0x64] sm:$0xf0] }
   0x3   :  { %v231_v7 = vor.u32 %v247_v2, %v228_v4  ;;  %v245_v8 = vld [vmem:[%s377_s1 + $0x64] sm:$0xf]  ;;  %v220_v9 = vld [vmem:[%s377_s1 + $0x68] sm:$0xf0]  ;;  %v219_v10 = vor.u32 %v246_v6, %v218_v5  ;;  %v210_v12 = vld [vmem:[%s377_s1 + $0x50] sm:$0xf] }
   0x4   :  { %124 = vmatpush.bf16.msra.mxu0 %v227_v3  ;;  %v223_v11 = vor.u32 %v245_v8, %v220_v9  ;;  %v244_v13 = vld [vmem:[%s377_s1 + $0x54] sm:$0xf0]  ;;  %v243_v14 = vld [vmem:[%s377_s1 + $0x54] sm:$0xf]  ;;  %v212_v15 = vld [vmem:[%s377_s1 + $0x58] sm:$0xf0] }
   0x5   :  { %138 = vmatpush.bf16.msra.mxu1 %v231_v7  ;;  %v211_v16 = vor.u32 %v244_v13, %v210_v12  ;;  %v215_v17 = vor.u32 %v243_v14, %v212_v15  ;;  %v202_v18 = vld [vmem:[%s377_s1 + $0x40] sm:$0xf]  ;;  %v242_v19 = vld [vmem:[%s377_s1 + $0x44] sm:$0xf0]  ;;  %v241_v20 = vld [vmem:[%s377_s1 + $0x44] sm:$0xf] }
   0x6   :  { %v204_v21 = vld [vmem:[%s377_s1 + $0x48] sm:$0xf0]  ;;  %v203_v22 = vor.u32 %v242_v19, %v202_v18  ;;  %v194_v24 = vld [vmem:[%s377_s1 + $0x30] sm:$0xf]  ;;  %v240_v25 = vld [vmem:[%s377_s1 + $0x34] sm:$0xf0] }
   0x7   :  { %v207_v23 = vor.u32 %v241_v20, %v204_v21  ;;  %v239_v26 = vld [vmem:[%s377_s1 + $0x34] sm:$0xf]  ;;  %v196_v27 = vld [vmem:[%s377_s1 + $0x38] sm:$0xf0]  ;;  %v195_v28 = vor.u32 %v240_v25, %v194_v24  ;;  %v186_v30 = vld [vmem:[%s377_s1 + $0x20] sm:$0xf] }
   0x8   :  { %125 = vmatpush.bf16.msra.mxu0 %v219_v10  ;;  %v199_v29 = vor.u32 %v239_v26, %v196_v27  ;;  %v238_v31 = vld [vmem:[%s377_s1 + $0x24] sm:$0xf0]  ;;  %v237_v32 = vld [vmem:[%s377_s1 + $0x24] sm:$0xf]  ;;  %v188_v33 = vld [vmem:[%s377_s1 + $0x28] sm:$0xf0] }
   0x9   :  { %139 = vmatpush.bf16.msra.mxu1 %v223_v11  ;;  %v187_v34 = vor.u32 %v238_v31, %v186_v30  ;;  %v191_v35 = vor.u32 %v237_v32, %v188_v33  ;;  %v178_v36 = vld [vmem:[%s377_s1 + $0x10] sm:$0xf]  ;;  %v236_v37 = vld [vmem:[%s377_s1 + $0x14] sm:$0xf0]  ;;  %v235_v38 = vld [vmem:[%s377_s1 + $0x14] sm:$0xf] }
   0xa   :  { %v180_v39 = vld [vmem:[%s377_s1 + $0x18] sm:$0xf0]  ;;  %v179_v40 = vor.u32 %v236_v37, %v178_v36  ;;  %v170_v42 = vld [vmem:[%s377_s1] sm:$0xf]  ;;  %v234_v43 = vld [vmem:[%s377_s1 + $0x4] sm:$0xf0] }
   0xb   :  { %v183_v41 = vor.u32 %v235_v38, %v180_v39  ;;  %v233_v44 = vld [vmem:[%s377_s1 + $0x4] sm:$0xf]  ;;  %v172_v45 = vld [vmem:[%s377_s1 + $0x8] sm:$0xf0]  ;;  %v171_v46 = vor.u32 %v234_v43, %v170_v42  ;;  %v32_v49 = vld [vmem:[%s379_s2] sm:$0x3] }
   0xc   :  { %126 = vmatpush.bf16.msra.mxu0 %v211_v16  ;;  %v175_v47 = vor.u32 %v233_v44, %v172_v45  ;;  %v232_v48 = vld [vmem:[%s378_s0] sm:$0xff]  ;;  %v34_v50 = vperm.slane %v32_v49, 0  ;;  %v35_v51 = vperm.slane %v32_v49, 1 }
   0xd   :  { %140 = vmatpush.bf16.msra.mxu1 %v215_v17 }
  0x10   :  { %127 = vmatpush.bf16.msra.mxu0 %v203_v22 }
  0x11   :  { %141 = vmatpush.bf16.msra.mxu1 %v207_v23 }
  0x14   :  { %128 = vmatpush.bf16.msra.mxu0 %v195_v28 }
  0x15   :  { %142 = vmatpush.bf16.msra.mxu1 %v199_v29 }
  0x18   :  { %129 = vmatpush.bf16.msra.mxu0 %v187_v34 }
  0x19   :  { %143 = vmatpush.bf16.msra.mxu1 %v191_v35 }
  0x1c   :  { %130 = vmatpush.bf16.msra.mxu0 %v179_v40 }
  0x1d   :  { %144 = vmatpush.bf16.msra.mxu1 %v183_v41 }
  0x20   :  { %131 = vmatpush.bf16.msra.mxu0 %v171_v46 }
  0x21   :  { %145 = vmatpush.bf16.msra.mxu1 %v175_v47 }
  0x23   :  { %132 = vmatmul.bf16.vlgmr.msra.gmra.mxu0 %v232_v48 }
  0x24   :  { %146 = vmatmul.bf16.vlgmr.msra.gmra.mxu1 %v232_v48 }
  0xa0   :  { %v133_v52 = vpop.f32.mrf.mxu0 }
  0xa1   :  { %v134_v53 = vadd.f32 %v133_v52, %v34_v50  ;;  %v147_v54 = vpop.f32.mrf.mxu1 }
  0xa2   :  { %v148_v55 = vadd.f32 %v147_v54, %v35_v51 }
  0xa3   :  { %v152_v56 = vmax.f32 %v134_v53, 0.0 }
  0xa4   :  { %v153_v57 = vmax.f32 %v148_v55, 0.0 }
  0xa6   :  { %v156_v58 = vpack.c.bf16 %v153_v57, %v152_v56 }
  0xa8   :  { %158 = vst [vmem:[%s380_s3] sm:$0xff] %v156_v58  ;;  %v135_v59 = vpop.f32.mrf.mxu0 }
  0xa9   :  { %v136_v60 = vadd.f32 %v135_v59, %v34_v50  ;;  %v149_v61 = vpop.f32.mrf.mxu1 }
  0xaa   :  { %v150_v62 = vadd.f32 %v149_v61, %v35_v51 }
  0xab   :  { %v154_v63 = vmax.f32 %v136_v60, 0.0 }
  0xac   :  { %v155_v0 = vmax.f32 %v150_v62, 0.0 }
  0xae   :  { %v157_v1 = vpack.c.bf16 %v155_v0, %v154_v63 }
  0xb0   :  { %159 = vst [vmem:[%s380_s3 + $0x8] sm:$0xff] %v157_v1 }

// kernel: e2ad_forward.34
= control target key start
LH: loop header
LB: loop body
LE: loop exit
PB: predicated region body
PF: predicated region fallthrough
CT: control target
= control target key end

     0   :  { %s344_s1 = inlined_call_operand.vmem [shape: bf16[256,128], index: 1, kind: input, shape index: {}]   ;;  %s345_s2 = inlined_call_operand.vmem [shape: f32[1,128], index: 2, kind: input, shape index: {}]   ;;  %s346_s0 = inlined_call_operand.vmem [shape: bf16[8,256], index: 0, kind: input, shape index: {}]   ;;  %s347_s3 = inlined_call_operand.vmem [shape: bf16[8,128], index: 3, kind: output, shape index: {}]  }
   0x1   :  { %v257_v0 = vld [vmem:[%s344_s1 + $0x38] sm:$0xff]  ;;  %v256_v2 = vld [vmem:[%s344_s1 + $0x30] sm:$0xff]  ;;  %v255_v4 = vld [vmem:[%s344_s1 + $0x28] sm:$0xff] }
   0x2   :  { %v265_v1 = vld [vmem:[%s344_s1 + $0x78] sm:$0xff]  ;;  %154 = vmatpush.bf16.msra.mxu0 %v257_v0  ;;  %v264_v3 = vld [vmem:[%s344_s1 + $0x70] sm:$0xff]  ;;  %v263_v5 = vld [vmem:[%s344_s1 + $0x68] sm:$0xff] }
   0x3   :  { %167 = vmatpush.bf16.msra.mxu1 %v265_v1  ;;  %v254_v6 = vld [vmem:[%s344_s1 + $0x20] sm:$0xff]  ;;  %v253_v8 = vld [vmem:[%s344_s1 + $0x18] sm:$0xff]  ;;  %v252_v10 = vld [vmem:[%s344_s1 + $0x10] sm:$0xff] }
   0x4   :  { %v262_v7 = vld [vmem:[%s344_s1 + $0x60] sm:$0xff]  ;;  %v261_v9 = vld [vmem:[%s344_s1 + $0x58] sm:$0xff]  ;;  %v260_v11 = vld [vmem:[%s344_s1 + $0x50] sm:$0xff] }
   0x5   :  { %v251_v12 = vld [vmem:[%s344_s1 + $0x8] sm:$0xff]  ;;  %v14_v14 = vld [vmem:[%s346_s0] sm:$0xff] }
   0x6   :  { %155 = vmatpush.bf16.msra.mxu0 %v256_v2  ;;  %v259_v13 = vld [vmem:[%s344_s1 + $0x48] sm:$0xff]  ;;  %v52_v15 = vunpack.c.l.b16 %v14_v14  ;;  %v53_v16 = vunpack.c.h.b16 %v14_v14  ;;  %v250_v17 = vld [vmem:[%s344_s1] sm:$0xff] }
   0x7   :  { %168 = vmatpush.bf16.msra.mxu1 %v264_v3  ;;  %v258_v18 = vld [vmem:[%s344_s1 + $0x40] sm:$0xff] }
   0x8   :  { %v54_v19 = vpack.c.b16 %v52_v15, %v52_v15  ;;  %v55_v20 = vpack.c.b16 %v53_v16, %v53_v16  ;;  %v266_v21 = vld [vmem:[%s345_s2] ss:$0 sm:$0xff] }
   0xa   :  { %156 = vmatpush.bf16.msra.mxu0 %v255_v4 }
   0xb   :  { %169 = vmatpush.bf16.msra.mxu1 %v263_v5 }
   0xe   :  { %157 = vmatpush.bf16.msra.mxu0 %v254_v6 }
   0xf   :  { %170 = vmatpush.bf16.msra.mxu1 %v262_v7 }
  0x12   :  { %158 = vmatpush.bf16.msra.mxu0 %v253_v8 }
  0x13   :  { %171 = vmatpush.bf16.msra.mxu1 %v261_v9 }
  0x16   :  { %159 = vmatpush.bf16.msra.mxu0 %v252_v10 }
  0x17   :  { %172 = vmatpush.bf16.msra.mxu1 %v260_v11 }
  0x1a   :  { %160 = vmatpush.bf16.msra.mxu0 %v251_v12 }
  0x1b   :  { %173 = vmatpush.bf16.msra.mxu1 %v259_v13 }
  0x1e   :  { %161 = vmatpush.bf16.msra.mxu0 %v250_v17 }
  0x1f   :  { %174 = vmatpush.bf16.msra.mxu1 %v258_v18 }
  0x21   :  { %162 = vmatmul.bf16.vlgmr.msra.gmra.mxu0 %v54_v19 }
  0x22   :  { %175 = vmatmul.bf16.vlgmr.msra.gmra.mxu1 %v55_v20 }
  0x9e   :  { %v163_v22 = vpop.f32.mrf.mxu0 }
  0x9f   :  { %v176_v23 = vpop.f32.mrf.mxu1  ;;  %v164_v24 = vadd.f32 %v266_v21, %v163_v22 }
  0xa1   :  { %v177_v25 = vadd.f32 %v176_v23, %v164_v24 }
  0xa3   :  { %v180_v26 = vpack.c.bf16 %v177_v25, %v177_v25 }
  0xa5   :  { %181 = vst [vmem:[%s347_s3] sm:$0xf] %v180_v26 }
  0xa6   :  { %v165_v27 = vpop.f32.mrf.mxu0 }
  0xa7   :  { %v178_v28 = vpop.f32.mrf.mxu1 }

// kernel: e2ad_forward.27
= control target key start
LH: loop header
LB: loop body
LE: loop exit
PB: predicated region body
PF: predicated region fallthrough
CT: control target
= control target key end

     0   :  { %s907_s23 = smov 0   ;;  %s909_s24 = smov 0   ;;  %s1087_s0 = inlined_call_operand.vmem [shape: bf16[2,16,128], index: 0, kind: input, shape index: {}]   ;;  %s1088_s1 = inlined_call_operand.vmem [shape: bf16[128,128], index: 1, kind: input, shape index: {}]   ;;  %s1089_s2 = inlined_call_operand.vmem [shape: f32[1,128], index: 2, kind: input, shape index: {}]   ;;  %s1090_s3 = inlined_call_operand.vmem [shape: bf16[128,256], index: 3, kind: input, shape index: {}]   ;;  %s1091_s4 = inlined_call_operand.vmem [shape: f32[1,256], index: 4, kind: input, shape index: {}]   ;;  %s1092_s5 = inlined_call_operand.<no memory space> [shape: f32[1,1], index: 5, kind: input, shape index: {}]   ;;  %s1093_s6 = inlined_call_operand.vmem [shape: bf16[2,16,128], index: 6, kind: output, shape index: {}]  }
   0x1   :  { %11 = sst [smem:[#allocation2]] %s1092_s5  ;;  %s911_s25 = smov 0  }
   0x2 LB: > { %s29_s5 = sadd.s32 1, %s863_s24  ;;  %p667_p0 = scmp.ge.s32.totalorder %s867_s25, 1  ;;  %s867_s25 = sphi %s911_s25, %s17_s25   ;;  %s863_s24 = sphi %s909_s24, %s1095_s24   ;;  %s859_s23 = sphi %s907_s23, %s1094_s23  }
   0x3   : > { %p31_p1 = scmp.ge.s32.totalorder %s29_s5, 2  ;;  %p227_p2 = scmp.lt.s32.totalorder %s867_s25, 3 }
   0x5   : > { %s1097_s5 = smov (%p31_p1, %s29_s5), 0  ;;  %p228_p3 = pnand %p667_p0, %p227_p2 }
   0x6   : > { %p261_p4 = scmp.lt.s32.totalorder (!%p228_p3), %s859_s23, 1  ;;  %s564_s9 = sld [smem:[#allocation2]] (!%p228_p3) }
   0x7   : > { %231 = sbr.rel (%p228_p3) target bundleno = 611 (0x263), region = 44 }
   0xc   : > { %v790_v0 = vld [vmem:[%s1088_s1 + $0x38] sm:$0xff]  ;;  %v770_v1 = vld [vmem:[%s1090_s3 + $0x70] sm:$0xf]  ;;  %v762_v4 = vld [vmem:[%s1090_s3 + $0x60] sm:$0xf]  ;;  %s1099_s23 = smov (!%p261_p4, %s859_s23), 1 }
   0xd   : > { %v806_v2 = vld [vmem:[%s1090_s3 + $0x74] sm:$0xf0]  ;;  %v804_v5 = vld [vmem:[%s1090_s3 + $0x64] sm:$0xf0]  ;;  %360 = vmatpush.bf16.msra.mxu0 %v790_v0  ;;  %v789_v6 = vld [vmem:[%s1088_s1 + $0x30] sm:$0xff]  ;;  %s779_s26 = sshll.u32 %s1099_s23, 3 }
   0xe   : > { %v771_v3 = vor.u32 %v806_v2, %v770_v1  ;;  %v763_v7 = vor.u32 %v804_v5, %v762_v4  ;;  %v754_v8 = vld [vmem:[%s1090_s3 + $0x50] sm:$0xf]  ;;  %v802_v9 = vld [vmem:[%s1090_s3 + $0x54] sm:$0xf0]  ;;  %v788_v10 = vld [vmem:[%s1088_s1 + $0x28] sm:$0xff]  ;;  %s1009_s11 = scalar_lea.vmem %s1087_s0, %s779_s26  ;;  %vm526_vm0 = vcmask 130048   ;;  %s274_s13 = scalar_lea.vmem %s1093_s6, %s779_s26 }
   0xf   : > { %v755_v11 = vor.u32 %v802_v9, %v754_v8  ;;  %v746_v12 = vld [vmem:[%s1090_s3 + $0x40] sm:$0xf]  ;;  %v800_v13 = vld [vmem:[%s1090_s3 + $0x44] sm:$0xf0]  ;;  %v738_v16 = vld [vmem:[%s1090_s3 + $0x30] sm:$0xf] }
  0x10   : > { %482 = vmatpush.bf16.msra.mxu1 %v771_v3  ;;  %v787_v14 = vld [vmem:[%s1088_s1 + $0x20] sm:$0xff]  ;;  %v747_v15 = vor.u32 %v800_v13, %v746_v12  ;;  %v798_v17 = vld [vmem:[%s1090_s3 + $0x34] sm:$0xf0]  ;;  %v796_v21 = vld [vmem:[%s1090_s3 + $0x24] sm:$0xf0] }
  0x11   : > { %361 = vmatpush.bf16.msra.mxu0 %v789_v6  ;;  %v786_v18 = vld [vmem:[%s1088_s1 + $0x18] sm:$0xff]  ;;  %v739_v19 = vor.u32 %v798_v17, %v738_v16  ;;  %v730_v20 = vld [vmem:[%s1090_s3 + $0x20] sm:$0xf]  ;;  %v785_v22 = vld [vmem:[%s1088_s1 + $0x10] sm:$0xff] }
  0x12   : > { %v731_v23 = vor.u32 %v796_v21, %v730_v20  ;;  %v722_v24 = vld [vmem:[%s1090_s3 + $0x10] sm:$0xf]  ;;  %v794_v25 = vld [vmem:[%s1090_s3 + $0x14] sm:$0xf0]  ;;  %v784_v26 = vld [vmem:[%s1088_s1 + $0x8] sm:$0xff] }
  0x13   : > { %v723_v27 = vor.u32 %v794_v25, %v722_v24  ;;  %v714_v28 = vld [vmem:[%s1090_s3] sm:$0xf]  ;;  %v792_v29 = vld [vmem:[%s1090_s3 + $0x4] sm:$0xf0]  ;;  %v805_v34 = vld [vmem:[%s1090_s3 + $0x74] sm:$0xf] }
  0x14   : > { %483 = vmatpush.bf16.msra.mxu1 %v763_v7  ;;  %v783_v30 = vld [vmem:[%s1088_s1] sm:$0xff]  ;;  %v715_v31 = vor.u32 %v792_v29, %v714_v28  ;;  %v772_v35 = vld [vmem:[%s1090_s3 + $0x78] sm:$0xf0]  ;;  %v764_v38 = vld [vmem:[%s1090_s3 + $0x68] sm:$0xf0] }
  0x15   : > { %362 = vmatpush.bf16.msra.mxu0 %v788_v10  ;;  %v781_v32 = vld [vmem:[%s1009_s11] sm:$0xff]  ;;  %v775_v37 = vor.u32 %v805_v34, %v772_v35  ;;  %v801_v40 = vld [vmem:[%s1090_s3 + $0x54] sm:$0xf]  ;;  %v756_v41 = vld [vmem:[%s1090_s3 + $0x58] sm:$0xf0]  ;;  %v569_v34 = vstv %s564_s9 }
  0x16   : > { %v782_v33 = vld [vmem:[%s1009_s11] sm:$0xff]  ;;  %v759_v42 = vor.u32 %v801_v40, %v756_v41  ;;  %v748_v44 = vld [vmem:[%s1090_s3 + $0x48] sm:$0xf0]  ;;  %v797_v47 = vld [vmem:[%s1090_s3 + $0x34] sm:$0xf] }
  0x17   : > { %v803_v36 = vld [vmem:[%s1090_s3 + $0x64] sm:$0xf]  ;;  %496 = vmatpush.bf16.msra.mxu2 %v775_v37  ;;  %v740_v48 = vld [vmem:[%s1090_s3 + $0x38] sm:$0xf0]  ;;  %v390_v50 = vld [vmem:[%s1091_s4] sm:$0x3] }
  0x18   : > { %484 = vmatpush.bf16.msra.mxu1 %v755_v11  ;;  %v767_v39 = vor.u32 %v803_v36, %v764_v38  ;;  %v799_v43 = vld [vmem:[%s1090_s3 + $0x44] sm:$0xf]  ;;  %v743_v51 = vor.u32 %v797_v47, %v740_v48  ;;  %v732_v53 = vld [vmem:[%s1090_s3 + $0x28] sm:$0xf0]  ;;  %v392_v54 = vperm.slane %v390_v50, 0  ;;  %v393_v10 = vperm.slane %v390_v50, 1 }
  0x19   : > { %363 = vmatpush.bf16.msra.mxu0 %v787_v14  ;;  %v751_v45 = vor.u32 %v799_v43, %v748_v44  ;;  %v795_v52 = vld [vmem:[%s1090_s3 + $0x24] sm:$0xf]  ;;  %v793_v57 = vld [vmem:[%s1090_s3 + $0x14] sm:$0xf]  ;;  %v724_v58 = vld [vmem:[%s1090_s3 + $0x18] sm:$0xf0] }
  0x1a   : > { %v735_v55 = vor.u32 %v795_v52, %v732_v53  ;;  %v836_v61 = vld [vmem:[%s1089_s2] ss:$0 sm:$0xff]  ;;  %v727_v0 = vor.u32 %v793_v57, %v724_v58  ;;  %v791_v1 = vld [vmem:[%s1090_s3 + $0x4] sm:$0xf]  ;;  %v716_v2 = vld [vmem:[%s1090_s3 + $0x8] sm:$0xf0] }
  0x1b   : > { %497 = vmatpush.bf16.msra.mxu2 %v767_v39  ;;  %v719_v5 = vor.u32 %v791_v1, %v716_v2 }
  0x1c   : > { %485 = vmatpush.bf16.msra.mxu1 %v747_v15 }
  0x1d   : > { %364 = vmatpush.bf16.msra.mxu0 %v786_v18 }
  0x1f   : > { %498 = vmatpush.bf16.msra.mxu2 %v759_v42 }
  0x20   : > { %486 = vmatpush.bf16.msra.mxu1 %v739_v19 }
  0x21   : > { %365 = vmatpush.bf16.msra.mxu0 %v785_v22 }
  0x23   : > { %499 = vmatpush.bf16.msra.mxu2 %v751_v45 }
  0x24   : > { %487 = vmatpush.bf16.msra.mxu1 %v731_v23 }
  0x25   : > { %366 = vmatpush.bf16.msra.mxu0 %v784_v26 }
  0x27   : > { %500 = vmatpush.bf16.msra.mxu2 %v743_v51 }
  0x28   : > { %488 = vmatpush.bf16.msra.mxu1 %v723_v27 }
  0x29   : > { %367 = vmatpush.bf16.msra.mxu0 %v783_v30 }
  0x2b   : > { %501 = vmatpush.bf16.msra.mxu2 %v735_v55 }
  0x2c   : > { %489 = vmatpush.bf16.msra.mxu1 %v715_v31  ;;  %368 = vmatmul.bf16.vlgmr.msra.gmra.mxu0 %v781_v32 }
  0x2f   : > { %490 = vmatmul.bf16.vlgmr.msra.gmra.mxu1 %v782_v33  ;;  %502 = vmatpush.bf16.msra.mxu2 %v727_v0 }
  0x33   : > { %503 = vmatpush.bf16.msra.mxu2 %v719_v5 }
  0x36   : > { %504 = vmatmul.bf16.vlgmr.msra.gmra.mxu2 %v782_v33  ;;  %v282_v33 = vld [vmem:[%s1009_s11] sm:$0xff]  }
  0x37   : > { %v572_v38 = vunpack.c.l.bf16 %v282_v33  ;;  %v573_v40 = vunpack.c.h.bf16 %v282_v33 }
  0xa9   : > { %v369_v49 = vpop.f32.mrf.mxu0 }
  0xaa   : > { %v370_v3 = vadd.f32 %v836_v61, %v369_v49 }
  0xac   : > { %v491_v46 = vpop.f32.mrf.mxu1 }
  0xad   : > { %v492_v59 = vadd.f32 %v491_v46, %v392_v54 }
  0xb1   : > { %v371_v62 = vpop.f32.mrf.mxu0 }
  0xb2   : > { %v372_v4 = vadd.f32 %v836_v61, %v371_v62 }
  0xb4   : > { %v493_v56 = vpop.f32.mrf.mxu1  ;;  %v510_v6 = vpack.c.bf16 %v372_v4, %v370_v3 }
  0xb5   : > { %v494_v60 = vadd.f32 %v493_v56, %v392_v54 }
  0xb7   : > { %v511_v63 = vpack.c.bf16 %v494_v60, %v492_v59 }
  0xb9   : > { %519 = vmatpush.bf16.xpose.msra.mxu3 %v511_v63  ;;  %v505_v9 = vpop.f32.mrf.mxu2 }
  0xba   : > { %v506_v13 = vadd.f32 %v505_v9, %v393_v10 }
  0xc0   : > { %520 = vmatmul.bf16.vlgmr.msra.gmra.mxu3 %v510_v6 }
  0xc1   : > { %v507_v14 = vpop.f32.mrf.mxu2 }
  0xc2   : > { %v508_v15 = vadd.f32 %v507_v14, %v393_v10 }
  0xc4   : > { %v546_v16 = vpack.c.bf16 %v508_v15, %v506_v13 }
  0xc6   : > { %557 = vmatpush.bf16.msrb.mxu3 %v546_v16 }
 0x143   : > { %v521_v7 = vpop.f32.mrf.mxu3 }
 0x144   : > { %v527_v8 = vsel %vm526_vm0, %v521_v7, -inf }
 0x145   : > { %528 = vmax.xlane.f32.xlu0 %v527_v8 }
 0x14b   : > { %v523_v11 = vpop.f32.mrf.mxu3 }
 0x14c   : > { %v530_v12 = vsel %vm526_vm0, %v523_v11, -inf }
 0x14d   : > { %531 = vmax.xlane.f32.xlu0 %v530_v12 }
 0x1b8   : > { %v529_v17 = vpop.xlane.xlu0 %528 }
 0x1b9   : > { %v533_v18 = vsub.f32 %v521_v7, %v529_v17 }
 0x1bb   : > { %v535_v19 = vmul.f32 1.442695, %v533_v18 }
 0x1bd   : > { %837 = vpow2.f32 %v535_v19 }
 0x1c0   : > { %v532_v20 = vpop.xlane.xlu0 %531 }
 0x1c1   : > { %v534_v21 = vsub.f32 %v523_v11, %v532_v20 }
 0x1c3   : > { %v838_v22 = vpop.eup %837  ;;  %v537_v23 = vmul.f32 1.442695, %v534_v21 }
 0x1c4   : > { %v539_v24 = vsel %vm526_vm0, %v838_v22, 0.0 }
 0x1c5   : > { %839 = vpow2.f32 %v537_v23  ;;  %540 = vadd.xlane.f32.xlu1 %v539_v24 }
 0x1cb   : > { %v840_v25 = vpop.eup %839 }
 0x1cc   : > { %v542_v26 = vsel %vm526_vm0, %v840_v25, 0.0  ;;  %v545_v27 = vpack.c.bf16 %v840_v25, %v838_v22 }
 0x1cd   : > { %543 = vadd.xlane.f32.xlu1 %v542_v26 }
 0x1ce   : > { %776 = vmatmul.msk.bf16.vlgmr.msrb.gmra.mxu3 %vm526_vm0, %v545_v27 }
 0x238   : > { %v541_v28 = vpop.xlane.xlu1 %540 }
 0x239   : > { %841 = vrcp.f32 %v541_v28 }
 0x23f   : > { %v842_v31 = vpop.eup %841 }
 0x240   : > { %v544_v29 = vpop.xlane.xlu1 %543 }
 0x241   : > { %843 = vrcp.f32 %v544_v29 }
 0x247   : > { %v844_v35 = vpop.eup %843 }
 0x251   : > { %v559_v30 = vpop.f32.mrf.mxu3 }
 0x252   : > { %v567_v32 = vmul.f32 %v842_v31, %v559_v30 }
 0x254   : > { %v570_v37 = vmul.f32 %v569_v34, %v567_v32 }
 0x256   : > { %v574_v42 = vadd.f32 %v572_v38, %v570_v37 }
 0x259   : > { %v561_v36 = vpop.f32.mrf.mxu3 }
 0x25a   : > { %v568_v39 = vmul.f32 %v844_v35, %v561_v36 }
 0x25c   : > { %v571_v41 = vmul.f32 %v569_v34, %v568_v39 }
 0x25e   : > { %v575_v43 = vadd.f32 %v573_v40, %v571_v41 }
 0x260   : > { %v810_v44 = vpack.c.bf16 %v575_v43, %v574_v42 }
 0x262   : > { %811 = vst [vmem:[%s274_s13] sm:$0xff] %v810_v44  }
 0x263 PF: > { %s17_s25 = sadd.s32 1, %s867_s25   ;;  %s1094_s23 = smov %s863_s24 }
 0x264   : > { %p14_p5 = scmp.ge.s32.totalorder %s17_s25, 4   ;;  %s1095_s24 = smov %s1097_s5 }
 0x266   :  { %16 = sbr.rel (!%p14_p5) target bundleno = 2 (0x2), region = 75 }

// kernel: e2ad_forward.35
= control target key start
LH: loop header
LB: loop body
LE: loop exit
PB: predicated region body
PF: predicated region fallthrough
CT: control target
= control target key end

     0   :  { %v391_v20 = vmov 1.0   ;;  %vm280_vm8 = vcmask 1040384   ;;  %vm282_vm9 = vcmask 1041408   ;;  %vm284_vm10 = vcmask 1042432   ;;  %s481_s1 = inlined_call_operand.vmem [shape: bf16[128,128], index: 1, kind: input, shape index: {}]   ;;  %s482_s2 = inlined_call_operand.vmem [shape: f32[1,128], index: 2, kind: input, shape index: {}]   ;;  %s483_s0 = inlined_call_operand.vmem [shape: bf16[32,128], index: 0, kind: input, shape index: {}]   ;;  %s484_s4 = inlined_call_operand.vmem [shape: bf16[32,128], index: 4, kind: input, shape index: {}]   ;;  %s485_s3 = inlined_call_operand.vmem [shape: bf16[32,128], index: 3, kind: input, shape index: {}]   ;;  %s486_s5 = inlined_call_operand.vmem [shape: bf16[32,128], index: 5, kind: output, shape index: {0}]   ;;  %s487_s6 = inlined_call_operand.vmem [shape: f32[4,32], index: 6, kind: output, shape index: {1}]  }
   0x1   :  { %v345_v0 = vld [vmem:[%s481_s1 + $0x38] sm:$0xff]  ;;  %v344_v1 = vld [vmem:[%s481_s1 + $0x30] sm:$0xff]  ;;  %v343_v2 = vld [vmem:[%s481_s1 + $0x28] sm:$0xff]  ;;  %vm286_vm11 = vcmask 257024  }
   0x2   :  { %106 = vmatpush.bf16.msra.mxu0 %v345_v0  ;;  %375 = vmatpush.bf16.msra.mxu1 %v345_v0  ;;  %v342_v3 = vld [vmem:[%s481_s1 + $0x20] sm:$0xff]  ;;  %v341_v4 = vld [vmem:[%s481_s1 + $0x18] sm:$0xff]  ;;  %v340_v5 = vld [vmem:[%s481_s1 + $0x10] sm:$0xff] }
   0x3   :  { %v339_v6 = vld [vmem:[%s481_s1 + $0x8] sm:$0xff]  ;;  %v338_v7 = vld [vmem:[%s481_s1] sm:$0xff] }
   0x4   :  { %v336_v8 = vld [vmem:[%s483_s0] sm:$0xff]  ;;  %v337_v9 = vld [vmem:[%s483_s0 + $0x8] sm:$0xff] }
   0x5   :  { %v374_v10 = vld [vmem:[%s484_s4 + $0x8] sm:$0xff]   ;;  %v365_v14 = vld [vmem:[%s484_s4] sm:$0xff]  }
   0x6   :  { %107 = vmatpush.bf16.msra.mxu0 %v344_v1  ;;  %376 = vmatpush.bf16.msra.mxu1 %v344_v1  ;;  %v371_v11 = vunpack.c.h.bf16 %v374_v10  ;;  %v370_v13 = vunpack.c.l.bf16 %v374_v10  ;;  %v367_v16 = vunpack.c.h.bf16 %v365_v14  ;;  %v366_v18 = vunpack.c.l.bf16 %v365_v14  ;;  %v347_v22 = vld [vmem:[%s485_s3] sm:$0xff]   ;;  %v372_v25 = vld [vmem:[%s485_s3 + $0x8] sm:$0xff]  }
   0x7   :  { %v384_v24 = vld [vmem:[%s482_s2] ss:$0 sm:$0xff]  ;;  %v348_v27 = vunpack.c.l.bf16 %v347_v22  ;;  %v352_v29 = vunpack.c.l.bf16 %v372_v25  ;;  %v349_v31 = vunpack.c.h.bf16 %v347_v22  ;;  %v353_v32 = vunpack.c.h.bf16 %v372_v25 }
   0x8   :  { %v208_v12 = vmul.f32 %v371_v11, %v371_v11  ;;  %v207_v15 = vmul.f32 %v370_v13, %v370_v13  ;;  %v206_v17 = vmul.f32 %v367_v16, %v367_v16  ;;  %v205_v19 = vmul.f32 %v366_v18, %v366_v18 }
   0xa   :  { %108 = vmatpush.bf16.msra.mxu0 %v343_v2  ;;  %377 = vmatpush.bf16.msra.mxu1 %v343_v2 }
   0xb   :  { %221 = vmatpush.xpose.msra.mxu3 %v208_v12 }
   0xe   :  { %109 = vmatpush.bf16.msra.mxu0 %v342_v3  ;;  %378 = vmatpush.bf16.msra.mxu1 %v342_v3 }
   0xf   :  { %222 = vmatpush.xpose.msra.mxu3 %v207_v15 }
  0x12   :  { %110 = vmatpush.bf16.msra.mxu0 %v341_v4  ;;  %379 = vmatpush.bf16.msra.mxu1 %v341_v4 }
  0x13   :  { %223 = vmatpush.xpose.msra.mxu3 %v206_v17 }
  0x16   :  { %111 = vmatpush.bf16.msra.mxu0 %v340_v5  ;;  %380 = vmatpush.bf16.msra.mxu1 %v340_v5 }
  0x17   :  { %224 = vmatpush.xpose.msra.mxu3 %v205_v19 }
  0x1a   :  { %112 = vmatpush.bf16.msra.mxu0 %v339_v6  ;;  %381 = vmatpush.bf16.msra.mxu1 %v339_v6 }
  0x1b   :  { %225 = vmatmul.f32.vlgmr.msra.gmra.mxu3 %v391_v20 }
  0x1e   :  { %113 = vmatpush.bf16.msra.mxu0 %v338_v7  ;;  %382 = vmatpush.bf16.msra.mxu1 %v338_v7 }
  0x21   :  { %114 = vmatmul.bf16.vlgmr.msra.gmra.mxu0 %v336_v8  ;;  %119 = vmatmul.bf16.vlgmr.msra.gmra.mxu1 %v337_v9 }
  0x9e   :  { %v115_v21 = vpop.f32.mrf.mxu0  ;;  %v120_v23 = vpop.f32.mrf.mxu1 }
  0x9f   :  { %v116_v26 = vadd.f32 %v384_v24, %v115_v21  ;;  %v121_v28 = vadd.f32 %v384_v24, %v120_v23  ;;  %v226_v54 = vpop.f32.mrf.mxu3 }
  0xa0   :  { %385 = vrsqrt.f32 %v226_v54  ;;  %vm249_vm0 = vcmp.eq.f32.partialorder %v226_v54, inf  ;;  %v252_v5 = vand.u32 2147483648, %v226_v54  ;;  %vm251_vm1 = vcmp.eq.f32.partialorder %v226_v54, 0.0 }
  0xa1   :  { %v133_v30 = vadd.f32 %v348_v27, %v116_v26  ;;  %v135_v35 = vadd.f32 %v352_v29, %v121_v28  ;;  %v278_v29 = vrot.slane %v226_v54, 5 }
  0xa3   :  { %v137_v38 = vmax.f32 %v133_v30, 0.0  ;;  %v139_v41 = vmax.f32 %v135_v35, 0.0 }
  0xa5   :  { %v159_v47 = vmul.f32 %v370_v13, %v139_v41  ;;  %v157_v49 = vmul.f32 %v366_v18, %v137_v38  ;;  %v183_v51 = vmul.f32 %v139_v41, %v139_v41  ;;  %v181_v53 = vmul.f32 %v137_v38, %v137_v38 }
  0xa6   :  { %v117_v33 = vpop.f32.mrf.mxu0  ;;  %v122_v34 = vpop.f32.mrf.mxu1 }
  0xa7   :  { %v118_v36 = vadd.f32 %v384_v24, %v117_v33  ;;  %v123_v37 = vadd.f32 %v384_v24, %v122_v34  ;;  %v386_v55 = vpop.eup %385 }
  0xa8   :  { %v243_v57 = vmul.f32 %v386_v55, %v226_v54 }
  0xa9   :  { %v134_v39 = vadd.f32 %v349_v31, %v118_v36  ;;  %v136_v40 = vadd.f32 %v353_v32, %v123_v37 }
  0xaa   :  { %v244_v58 = vmul.f32 %v386_v55, %v243_v57 }
  0xab   :  { %v138_v42 = vmax.f32 %v134_v39, 0.0  ;;  %v140_v43 = vmax.f32 %v136_v40, 0.0 }
  0xac   :  { %v245_v59 = vmul.f32 0.5, %v244_v58 }
  0xad   :  { %v357_v44 = vpack.c.bf16 %v138_v42, %v137_v38  ;;  %v362_v45 = vpack.c.bf16 %v140_v43, %v139_v41  ;;  %v160_v46 = vmul.f32 %v371_v11, %v140_v43  ;;  %v158_v48 = vmul.f32 %v367_v16, %v138_v42 }
  0xae   :  { %v184_v50 = vmul.f32 %v140_v43, %v140_v43  ;;  %v182_v52 = vmul.f32 %v138_v42, %v138_v42  ;;  %v246_v61 = vsub.f32 1.5, %v245_v59 }
  0xaf   :  { %358 = vst [vmem:[%s486_s5] sm:$0xff] %v357_v44   ;;  %173 = vmatpush.xpose.msra.mxu2 %v160_v46 }
  0xb0   :  { %373 = vst [vmem:[%s486_s5 + $0x8] sm:$0xff] %v362_v45   ;;  %v247_v63 = vmul.f32 %v386_v55, %v246_v61 }
  0xb2   :  { %v248_v2 = vmul.f32 %v247_v63, %v226_v54 }
  0xb3   :  { %174 = vmatpush.xpose.msra.mxu2 %v159_v47 }
  0xb4   :  { %v250_v6 = vsel %vm249_vm0, %v226_v54, %v248_v2 }
  0xb5   :  { %v253_v9 = vsel %vm251_vm1, %v252_v5, %v250_v6 }
  0xb6   :  { %v254_v13 = vmax.f32 %v253_v9, 1e-08 }
  0xb7   :  { %175 = vmatpush.xpose.msra.mxu2 %v158_v48 }
  0xbb   :  { %176 = vmatpush.xpose.msra.mxu2 %v157_v49 }
  0xbe   :  { %177 = vmatmul.f32.vlgmr.msra.gmra.mxu2 %v391_v20 }
  0xbf   :  { %197 = vmatpush.xpose.msrb.mxu2 %v184_v50 }
  0xc3   :  { %198 = vmatpush.xpose.msrb.mxu2 %v183_v51 }
  0xc7   :  { %199 = vmatpush.xpose.msrb.mxu2 %v182_v52 }
  0xcb   :  { %200 = vmatpush.xpose.msrb.mxu2 %v181_v53 }
  0xce   :  { %201 = vmatmul.f32.vlgmr.msrb.gmra.mxu2 %v391_v20 }
 0x141   :  { %v178_v56 = vpop.f32.mrf.mxu2 }
 0x142   :  { %v272_v26 = vrot.slane %v178_v56, 7 }
 0x151   :  { %v202_v60 = vpop.f32.mrf.mxu2 }
 0x152   :  { %387 = vrsqrt.f32 %v202_v60  ;;  %vm236_vm2 = vcmp.eq.f32.partialorder %v202_v60, inf  ;;  %v239_v10 = vand.u32 2147483648, %v202_v60  ;;  %vm238_vm3 = vcmp.eq.f32.partialorder %v202_v60, 0.0 }
 0x153   :  { %v275_v28 = vrot.slane %v202_v60, 6 }
 0x158   :  { %v388_v62 = vpop.eup %387 }
 0x159   :  { %v230_v0 = vmul.f32 %v388_v62, %v202_v60 }
 0x15b   :  { %v231_v1 = vmul.f32 %v388_v62, %v230_v0 }
 0x15d   :  { %v232_v3 = vmul.f32 0.5, %v231_v1 }
 0x15f   :  { %v233_v4 = vsub.f32 1.5, %v232_v3 }
 0x161   :  { %v234_v7 = vmul.f32 %v388_v62, %v233_v4 }
 0x163   :  { %v235_v8 = vmul.f32 %v234_v7, %v202_v60 }
 0x165   :  { %v237_v11 = vsel %vm236_vm2, %v202_v60, %v235_v8 }
 0x166   :  { %v240_v12 = vsel %vm238_vm3, %v239_v10, %v237_v11 }
 0x167   :  { %v241_v14 = vmax.f32 %v240_v12, 1e-08 }
 0x169   :  { %v255_v15 = vmul.f32 %v254_v13, %v241_v14 }
 0x16b   :  { %389 = vrcp.f32 %v255_v15  ;;  %v267_v19 = vand.u32 2147483648, %v255_v15  ;;  %v265_v21 = vand.u32 2147483647, %v255_v15  ;;  %vm261_vm5 = vweird.f32 %v255_v15 }
 0x16d   :  { %v268_v23 = vor.u32 1.1754944e-38, %v267_v19  ;;  %vm266_vm7 = vcmp.eq.f32.partialorder %v265_v21, 8.507059e+37 }
 0x171   :  { %v390_v16 = vpop.eup %389 }
 0x172   :  { %v257_v17 = vmul.f32 %v390_v16, %v255_v15  ;;  %vm262_vm4 = vweird.f32 %v390_v16 }
 0x173   :  { %vm263_vm6 = vmor %vm261_vm5, %vm262_vm4 }
 0x174   :  { %v258_v18 = vsub.f32 1.0, %v257_v17 }
 0x176   :  { %v259_v20 = vmul.f32 %v390_v16, %v258_v18 }
 0x178   :  { %v260_v22 = vadd.f32 %v390_v16, %v259_v20 }
 0x17a   :  { %v264_v24 = vsel %vm263_vm6, %v390_v16, %v260_v22 }
 0x17b   :  { %v269_v25 = vsel %vm266_vm7, %v268_v23, %v264_v24 }
 0x17c   :  { %v270_v27 = vmul.f32 %v269_v25, %v178_v56 }
 0x17e   :  { %v281_v30 = vsel %vm280_vm8, %v270_v27, %v272_v26 }
 0x17f   :  { %v283_v31 = vsel %vm282_vm9, %v281_v30, %v275_v28 }
 0x180   :  { %v285_v32 = vsel %vm284_vm10, %v283_v31, %v278_v29 }
 0x181   :  { %287 = vst.msk [vmem:[%s487_s6] sm:$0xf] %vm286_vm11, %v285_v32 }

// kernel: e2ad_forward.36
= control target key start
LH: loop header
LB: loop body
LE: loop exit
PB: predicated region body
PF: predicated region fallthrough
CT: control target
= control target key end

     0   :  { %vm121_vm0 = vcmask 519168   ;;  %s254_s1 = inlined_call_operand.vmem [shape: bf16[128,64], index: 1, kind: input, shape index: {}]   ;;  %s255_s2 = inlined_call_operand.vmem [shape: f32[1,64], index: 2, kind: input, shape index: {}]   ;;  %s256_s0 = inlined_call_operand.vmem [shape: bf16[32,128], index: 0, kind: input, shape index: {}]   ;;  %s257_s3 = inlined_call_operand.vmem [shape: bf16[32,64], index: 3, kind: output, shape index: {}]  }
   0x1   :  { %v179_v0 = vld [vmem:[%s254_s1 + $0x38] sm:$0xff]  ;;  %v178_v1 = vld [vmem:[%s254_s1 + $0x30] sm:$0xff]  ;;  %v177_v2 = vld [vmem:[%s254_s1 + $0x28] sm:$0xff] }
   0x2   :  { %98 = vmatpush.bf16.msra.mxu0 %v179_v0  ;;  %180 = vmatpush.bf16.msra.mxu1 %v179_v0  ;;  %v176_v3 = vld [vmem:[%s254_s1 + $0x20] sm:$0xff]  ;;  %v175_v4 = vld [vmem:[%s254_s1 + $0x18] sm:$0xff]  ;;  %v174_v5 = vld [vmem:[%s254_s1 + $0x10] sm:$0xff] }
   0x3   :  { %v173_v6 = vld [vmem:[%s254_s1 + $0x8] sm:$0xff]  ;;  %v172_v7 = vld [vmem:[%s254_s1] sm:$0xff] }
   0x4   :  { %v170_v8 = vld [vmem:[%s256_s0] sm:$0xff]  ;;  %v171_v9 = vld [vmem:[%s256_s0 + $0x8] sm:$0xff] }
   0x5   :  { %v188_v10 = vld [vmem:[%s255_s2] ss:$0 sm:$0xff] }
   0x6   :  { %99 = vmatpush.bf16.msra.mxu0 %v178_v1  ;;  %181 = vmatpush.bf16.msra.mxu1 %v178_v1 }
   0xa   :  { %100 = vmatpush.bf16.msra.mxu0 %v177_v2  ;;  %182 = vmatpush.bf16.msra.mxu1 %v177_v2 }
   0xe   :  { %101 = vmatpush.bf16.msra.mxu0 %v176_v3  ;;  %183 = vmatpush.bf16.msra.mxu1 %v176_v3 }
  0x12   :  { %102 = vmatpush.bf16.msra.mxu0 %v175_v4  ;;  %184 = vmatpush.bf16.msra.mxu1 %v175_v4 }
  0x16   :  { %103 = vmatpush.bf16.msra.mxu0 %v174_v5  ;;  %185 = vmatpush.bf16.msra.mxu1 %v174_v5 }
  0x1a   :  { %104 = vmatpush.bf16.msra.mxu0 %v173_v6  ;;  %186 = vmatpush.bf16.msra.mxu1 %v173_v6 }
  0x1e   :  { %105 = vmatpush.bf16.msra.mxu0 %v172_v7  ;;  %187 = vmatpush.bf16.msra.mxu1 %v172_v7 }
  0x21   :  { %106 = vmatmul.bf16.vlgmr.msra.gmra.mxu0 %v170_v8  ;;  %111 = vmatmul.bf16.vlgmr.msra.gmra.mxu1 %v171_v9 }
  0x9e   :  { %v107_v11 = vpop.f32.mrf.mxu0  ;;  %v112_v12 = vpop.f32.mrf.mxu1 }
  0x9f   :  { %v108_v13 = vadd.f32 %v188_v10, %v107_v11  ;;  %v113_v14 = vadd.f32 %v188_v10, %v112_v12 }
  0xa1   :  { %v117_v15 = vpack.c.bf16 %v108_v13, %v108_v13  ;;  %v119_v16 = vpack.c.bf16 %v113_v14, %v113_v14 }
  0xa3   :  { %122 = vst.msk [vmem:[%s257_s3] sm:$0xf] %vm121_vm0, %v117_v15 }
  0xa4   :  { %124 = vst.msk [vmem:[%s257_s3 + $0x8] sm:$0xf] %vm121_vm0, %v119_v16 }
  0xa6   :  { %v109_v17 = vpop.f32.mrf.mxu0  ;;  %v114_v18 = vpop.f32.mrf.mxu1 }
  0xa7   :  { %v110_v19 = vadd.f32 %v188_v10, %v109_v17  ;;  %v115_v20 = vadd.f32 %v188_v10, %v114_v18 }
  0xa9   :  { %v118_v21 = vpack.c.bf16 %v110_v19, %v110_v19  ;;  %v120_v22 = vpack.c.bf16 %v115_v20, %v115_v20 }
  0xab   :  { %123 = vst.msk [vmem:[%s257_s3 + $0x4] sm:$0xf] %vm121_vm0, %v118_v21 }
  0xac   :  { %125 = vst.msk [vmem:[%s257_s3 + $0xc] sm:$0xf] %vm121_vm0, %v120_v22 }

// kernel: e2ad_forward.26
= control target key start
LH: loop header
LB: loop body
LE: loop exit
PB: predicated region body
PF: predicated region fallthrough
CT: control target
= control target key end

     0   :  { %s1096_s23 = smov 0   ;;  %s1098_s24 = smov 0   ;;  %s1298_s0 = inlined_call_operand.vmem [shape: bf16[2,64,64], index: 0, kind: input, shape index: {}]   ;;  %s1299_s1 = inlined_call_operand.vmem [shape: bf16[64,128], index: 1, kind: input, shape index: {}]   ;;  %s1300_s2 = inlined_call_operand.vmem [shape: f32[1,128], index: 2, kind: input, shape index: {}]   ;;  %s1301_s3 = inlined_call_operand.vmem [shape: bf16[64,192], index: 3, kind: input, shape index: {}]   ;;  %s1302_s4 = inlined_call_operand.vmem [shape: f32[1,192], index: 4, kind: input, shape index: {}]   ;;  %s1303_s5 = inlined_call_operand.<no memory space> [shape: f32[1,1], index: 5, kind: input, shape index: {}]   ;;  %s1304_s6 = inlined_call_operand.vmem [shape: bf16[2,64,64], index: 6, kind: output, shape index: {}]  }
   0x1   :  { %11 = sst [smem:[#allocation2]] %s1303_s5  ;;  %s1100_s25 = smov 0  }
   0x2 LB: > { %s29_s5 = sadd.s32 1, %s1052_s24  ;;  %p844_p0 = scmp.ge.s32.totalorder %s1056_s25, 1  ;;  %s1056_s25 = sphi %s1100_s25, %s17_s25   ;;  %s1052_s24 = sphi %s1098_s24, %s1306_s24   ;;  %s1048_s23 = sphi %s1096_s23, %s1305_s23  }
   0x3   : > { %p31_p1 = scmp.ge.s32.totalorder %s29_s5, 2  ;;  %p227_p2 = scmp.lt.s32.totalorder %s1056_s25, 3 }
   0x5   : > { %s1308_s5 = smov (%p31_p1, %s29_s5), 0  ;;  %p228_p3 = pnand %p844_p0, %p227_p2 }
   0x6   : > { %p261_p4 = scmp.lt.s32.totalorder (!%p228_p3), %s1048_s23, 1  ;;  %s698_s11 = sld [smem:[#allocation2]] (!%p228_p3) }
   0x7   : > { %231 = sbr.rel (%p228_p3) target bundleno = 738 (0x2e2), region = 44 }
   0xc   : > { %v960_v0 = vld [vmem:[%s1299_s1 + $0x18] sm:$0xff]  ;;  %v959_v1 = vld [vmem:[%s1299_s1 + $0x10] sm:$0xff]  ;;  %s1310_s23 = smov (!%p261_p4, %s1048_s23), 1  ;;  %v958_v2 = vld [vmem:[%s1299_s1 + $0x8] sm:$0xff]  ;;  %vm354_vm0 = vcmask 523264   ;;  %vm748_vm1 = vcmask 519168  }
   0xd   : > { %969 = vmatpush.bf16.msra.mxu1 %v960_v0  ;;  %371 = vmatpush.bf16.msra.mxu0 %v960_v0  ;;  %s947_s8 = sshll.u32 %s1310_s23, 5  ;;  %v927_v3 = vld [vmem:[%s1301_s3 + $0x30] sm:$0xf]  ;;  %v968_v4 = vld [vmem:[%s1301_s3 + $0x34] sm:$0xf0]  ;;  %v957_v5 = vld [vmem:[%s1299_s1] sm:$0xff] }
   0xe   : > { %970 = vmatpush.bf16.msra.mxu2 %v960_v0  ;;  %s1140_s17 = scalar_lea.vmem %s1298_s0, %s947_s8  ;;  %v928_v6 = vor.u32 %v968_v4, %v927_v3  ;;  %v919_v7 = vld [vmem:[%s1301_s3 + $0x20] sm:$0xf]  ;;  %v966_v8 = vld [vmem:[%s1301_s3 + $0x24] sm:$0xf0]  ;;  %v911_v11 = vld [vmem:[%s1301_s3 + $0x10] sm:$0xf]  ;;  %s1261_s14 = scalar_lea.vmem %s1304_s6, %s947_s8 }
   0xf   : > { %v950_v9 = vld [vmem:[%s1140_s17 + $0x8] sm:$0xff]  ;;  %v920_v10 = vor.u32 %v966_v8, %v919_v7  ;;  %v964_v12 = vld [vmem:[%s1301_s3 + $0x14] sm:$0xf0]  ;;  %v903_v14 = vld [vmem:[%s1301_s3] sm:$0xf] }
  0x10   : > { %v912_v13 = vor.u32 %v964_v12, %v911_v11  ;;  %v962_v15 = vld [vmem:[%s1301_s3 + $0x4] sm:$0xf0]  ;;  %v951_v17 = vld [vmem:[%s1140_s17 + $0x10] sm:$0xff]  ;;  %v953_v18 = vld [vmem:[%s1140_s17] sm:$0xff] }
  0x11   : > { %971 = vmatpush.bf16.msra.mxu1 %v959_v1  ;;  %372 = vmatpush.bf16.msra.mxu0 %v959_v1  ;;  %v904_v16 = vor.u32 %v962_v15, %v903_v14  ;;  %v954_v19 = vld [vmem:[%s1140_s17 + $0x8] sm:$0xff]  ;;  %v949_v20 = vld [vmem:[%s1140_s17] sm:$0xff]  ;;  %v1171_v21 = vld [vmem:[%s1140_s17 + $0x10] sm:$0xff] }
  0x12   : > { %972 = vmatpush.bf16.msra.mxu2 %v959_v1  ;;  %v1176_v22 = vld [vmem:[%s1140_s17 + $0x18] sm:$0xff]  ;;  %v1185_v25 = vld [vmem:[%s1300_s2] ss:$0 sm:$0xff]  ;;  %v967_v45 = vld [vmem:[%s1301_s3 + $0x34] sm:$0xf] }
  0x13   : > { %v952_v23 = vld [vmem:[%s1140_s17 + $0x18] sm:$0xff]  ;;  %v1194_v36 = vld [vmem:[%s1302_s4] sm:$0x3]  ;;  %v965_v47 = vld [vmem:[%s1301_s3 + $0x24] sm:$0xf] }
  0x14   : > { %v406_v37 = vperm.slane %v1194_v36, 0  ;;  %v929_v46 = vld [vmem:[%s1301_s3 + $0x38] sm:$0xf0]  ;;  %v921_v49 = vld [vmem:[%s1301_s3 + $0x28] sm:$0xf0] }
  0x15   : > { %973 = vmatpush.bf16.msra.mxu1 %v958_v2  ;;  %373 = vmatpush.bf16.msra.mxu0 %v958_v2  ;;  %v932_v48 = vor.u32 %v967_v45, %v929_v46  ;;  %v924_v51 = vor.u32 %v965_v47, %v921_v49  ;;  %v963_v52 = vld [vmem:[%s1301_s3 + $0x14] sm:$0xf]  ;;  %v913_v53 = vld [vmem:[%s1301_s3 + $0x18] sm:$0xf0]  ;;  %v961_v54 = vld [vmem:[%s1301_s3 + $0x4] sm:$0xf] }
  0x16   : > { %974 = vmatpush.bf16.msra.mxu2 %v958_v2  ;;  %v916_v55 = vor.u32 %v963_v52, %v913_v53  ;;  %v905_v56 = vld [vmem:[%s1301_s3 + $0x8] sm:$0xf0] }
  0x17   : > { %v908_v58 = vor.u32 %v961_v54, %v905_v56 }
  0x19   : > { %975 = vmatpush.bf16.msra.mxu1 %v957_v5  ;;  %374 = vmatpush.bf16.msra.mxu0 %v957_v5 }
  0x1a   : > { %976 = vmatpush.bf16.msra.mxu2 %v957_v5 }
  0x1c   : > { %882 = vmatmul.msk.bf16.vlgmr.msra.gmra.mxu1 %vm354_vm0, %v950_v9  ;;  %881 = vmatmul.msk.bf16.vlgmr.msra.gmra.mxu0 %vm354_vm0, %v949_v20 }
  0x1d   : > { %486 = vmatpush.bf16.msrb.mxu1 %v928_v6  ;;  %884 = vmatmul.msk.bf16.vlgmr.msra.gmra.mxu2 %vm354_vm0, %v952_v23 }
  0x1e   : > { %515 = vmatpush.bf16.msrb.mxu2 %v932_v48 }
  0x21   : > { %487 = vmatpush.bf16.msrb.mxu1 %v920_v10 }
  0x22   : > { %516 = vmatpush.bf16.msrb.mxu2 %v924_v51 }
  0x25   : > { %488 = vmatpush.bf16.msrb.mxu1 %v912_v13 }
  0x26   : > { %517 = vmatpush.bf16.msrb.mxu2 %v916_v55 }
  0x29   : > { %489 = vmatpush.bf16.msrb.mxu1 %v904_v16 }
  0x2a   : > { %518 = vmatpush.bf16.msrb.mxu2 %v908_v58 }
  0x2c   : > { %883 = vmatmul.msk.bf16.gmra.mxu1 %vm354_vm0, %v951_v17 }
  0x2d   : > { %937 = vmatmul.msk.bf16.vlgmr.msrb.gmra.mxu2 %vm354_vm0, %v953_v18 }
  0x3c   : > { %933 = vmatmul.msk.bf16.vlgmr.msrb.gmra.mxu1 %vm354_vm0, %v953_v18 }
  0x3d   : > { %938 = vmatmul.msk.bf16.gmra.mxu2 %vm354_vm0, %v954_v19 }
  0x4c   : > { %934 = vmatmul.msk.bf16.gmra.mxu1 %vm354_vm0, %v954_v19 }
  0x4d   : > { %939 = vmatmul.msk.bf16.gmra.mxu2 %vm354_vm0, %v1171_v21 }
  0x5c   : > { %935 = vmatmul.msk.bf16.gmra.mxu1 %vm354_vm0, %v1171_v21 }
  0x5d   : > { %940 = vmatmul.msk.bf16.gmra.mxu2 %vm354_vm0, %v1176_v22 }
  0x6c   : > { %936 = vmatmul.msk.bf16.gmra.mxu1 %vm354_vm0, %v1176_v22 }
  0x99   : > { %v381_v24 = vpop.f32.mrf.mxu1  ;;  %v376_v4 = vpop.f32.mrf.mxu0 }
  0x9a   : > { %v382_v27 = vadd.f32 %v1185_v25, %v381_v24  ;;  %v377_v7 = vadd.f32 %v1185_v25, %v376_v4 }
  0xa0   : > { %v391_v10 = vpop.f32.mrf.mxu2 }
  0xa1   : > { %v383_v26 = vpop.f32.mrf.mxu1  ;;  %v378_v6 = vpop.f32.mrf.mxu0  ;;  %v392_v12 = vadd.f32 %v1185_v25, %v391_v10 }
  0xa2   : > { %v384_v28 = vadd.f32 %v1185_v25, %v383_v26  ;;  %v379_v8 = vadd.f32 %v1185_v25, %v378_v6 }
  0xa4   : > { %v541_v29 = vpack.c.bf16 %v384_v28, %v382_v27  ;;  %v540_v9 = vpack.c.bf16 %v379_v8, %v377_v7  ;;  %v407_v27 = vperm.slane %v1194_v36, 1 }
  0xa8   : > { %v393_v11 = vpop.f32.mrf.mxu2 }
  0xa9   : > { %v386_v30 = vpop.f32.mrf.mxu1  ;;  %v394_v13 = vadd.f32 %v1185_v25, %v393_v11 }
  0xaa   : > { %v387_v32 = vadd.f32 %v1185_v25, %v386_v30 }
  0xab   : > { %v543_v14 = vpack.c.bf16 %v394_v13, %v392_v12 }
  0xb0   : > { %v520_v15 = vpop.f32.mrf.mxu2 }
  0xb1   : > { %v388_v31 = vpop.f32.mrf.mxu1 }
  0xb2   : > { %v389_v33 = vadd.f32 %v1185_v25, %v388_v31 }
  0xb4   : > { %v542_v34 = vpack.c.bf16 %v389_v33, %v387_v32 }
  0xb8   : > { %v522_v16 = vpop.f32.mrf.mxu2 }
  0xb9   : > { %v491_v35 = vpop.f32.mrf.mxu1  ;;  %v523_v36 = vadd.f32 %v522_v16, %v407_v27 }
  0xba   : > { %v492_v39 = vadd.f32 %v491_v35, %v406_v37 }
  0xc0   : > { %v525_v17 = vpop.f32.mrf.mxu2 }
  0xc1   : > { %v493_v38 = vpop.f32.mrf.mxu1  ;;  %v526_v35 = vadd.f32 %v525_v17, %v407_v27 }
  0xc2   : > { %v494_v40 = vadd.f32 %v493_v38, %v406_v37 }
  0xc4   : > { %v544_v41 = vpack.c.bf16 %v494_v40, %v492_v39 }
  0xc8   : > { %v527_v18 = vpop.f32.mrf.mxu2 }
  0xc9   : > { %v496_v42 = vpop.f32.mrf.mxu1 }
  0xca   : > { %v497_v3 = vadd.f32 %v496_v42, %v406_v37 }
  0xd0   : > { %v530_v19 = vpop.f32.mrf.mxu2 }
  0xd1   : > { %v498_v43 = vpop.f32.mrf.mxu1  ;;  %v531_v32 = vadd.f32 %v530_v19, %v407_v27 }
  0xd2   : > { %v499_v2 = vadd.f32 %v498_v43, %v406_v37 }
  0xd4   : > { %v545_v5 = vpack.c.bf16 %v499_v2, %v497_v3 }
  0xd8   : > { %v532_v22 = vpop.f32.mrf.mxu2 }
  0xd9   : > { %v501_v44 = vpop.f32.mrf.mxu1  ;;  %v533_v33 = vadd.f32 %v532_v22, %v407_v27 }
  0xda   : > { %v502_v0 = vadd.f32 %v501_v44, %v406_v37 }
  0xdb   : > { %v655_v40 = vpack.c.bf16 %v533_v33, %v531_v32  ;;  %v282_v33 = vld [vmem:[%s1140_s17] sm:$0xff]  }
  0xe0   : > { %v535_v26 = vpop.f32.mrf.mxu2 }
  0xe1   : > { %v503_v50 = vpop.f32.mrf.mxu1 }
  0xe2   : > { %v504_v63 = vadd.f32 %v503_v50, %v406_v37 }
  0xe4   : > { %v546_v1 = vpack.c.bf16 %v504_v63, %v502_v0 }
  0xe8   : > { %v537_v30 = vpop.f32.mrf.mxu2 }
  0xe9   : > { %v506_v57 = vpop.f32.mrf.mxu1  ;;  %v538_v31 = vadd.f32 %v537_v30, %v407_v27 }
  0xea   : > { %v507_v60 = vadd.f32 %v506_v57, %v406_v37 }
  0xf1   : > { %v508_v59 = vpop.f32.mrf.mxu1 }
  0xf2   : > { %v509_v61 = vadd.f32 %v508_v59, %v406_v37  ;;  %v528_v37 = vadd.f32 %v527_v18, %v407_v27 }
  0xf4   : > { %v547_v62 = vpack.c.bf16 %v509_v61, %v507_v60  ;;  %v654_v42 = vpack.c.bf16 %v528_v37, %v526_v35 }
  0xf6   : > { %552 = vmatpush.bf16.xpose.msra.mxu3 %v547_v62 }
  0xfe   : > { %553 = vmatpush.bf16.xpose.msra.mxu3 %v546_v1 }
 0x106   : > { %554 = vmatpush.bf16.xpose.msra.mxu3 %v545_v5 }
 0x10e   : > { %555 = vmatpush.bf16.xpose.msra.mxu3 %v544_v41  ;;  %v521_v41 = vadd.f32 %v520_v15, %v407_v27 }
 0x110   : > { %v653_v44 = vpack.c.bf16 %v523_v36, %v521_v41 }
 0x115   : > { %556 = vmatmul.bf16.vlgmr.msra.gmra.mxu3 %v540_v9 }
 0x125   : > { %561 = vmatmul.bf16.gmra.mxu3 %v541_v29  ;;  %v536_v29 = vadd.f32 %v535_v26, %v407_v27 }
 0x135   : > { %566 = vmatmul.bf16.gmra.mxu3 %v542_v34  ;;  %v656_v34 = vpack.c.bf16 %v538_v31, %v536_v29 }
 0x137   : > { %673 = vmatpush.bf16.msrb.mxu0 %v656_v34 }
 0x13b   : > { %674 = vmatpush.bf16.msrb.mxu0 %v655_v40  ;;  %v724_v40 = vunpack.c.l.bf16 %v282_v33 }
 0x13f   : > { %675 = vmatpush.bf16.msrb.mxu0 %v654_v42 }
 0x143   : > { %676 = vmatpush.bf16.msrb.mxu0 %v653_v44 }
 0x145   : > { %571 = vmatmul.bf16.gmra.mxu3 %v543_v14 }
 0x198   : > { %v557_v20 = vpop.f32.mrf.mxu3 }
 0x199   : > { %v577_v21 = vsel %vm354_vm0, %v557_v20, -inf }
 0x19a   : > { %578 = vmax.xlane.f32.xlu0 %v577_v21 }
 0x1a0   : > { %v559_v23 = vpop.f32.mrf.mxu3 }
 0x1a1   : > { %v580_v24 = vsel %vm354_vm0, %v559_v23, -inf }
 0x1a2   : > { %581 = vmax.xlane.f32.xlu0 %v580_v24 }
 0x1a8   : > { %v562_v25 = vpop.f32.mrf.mxu3 }
 0x1a9   : > { %v583_v28 = vsel %vm354_vm0, %v562_v25, -inf }
 0x1aa   : > { %584 = vmax.xlane.f32.xlu1 %v583_v28 }
 0x1b0   : > { %v564_v38 = vpop.f32.mrf.mxu3 }
 0x1b1   : > { %v586_v39 = vsel %vm354_vm0, %v564_v38, -inf }
 0x1b2   : > { %587 = vmax.xlane.f32.xlu1 %v586_v39 }
 0x1b8   : > { %v567_v43 = vpop.f32.mrf.mxu3 }
 0x1b9   : > { %v589_v45 = vsel %vm354_vm0, %v567_v43, -inf }
 0x1ba   : > { %590 = vmax.xlane.f32.xlu2 %v589_v45 }
 0x1c0   : > { %v569_v46 = vpop.f32.mrf.mxu3 }
 0x1c1   : > { %v592_v47 = vsel %vm354_vm0, %v569_v46, -inf }
 0x1c2   : > { %593 = vmax.xlane.f32.xlu2 %v592_v47  ;;  %v725_v47 = vunpack.c.h.bf16 %v282_v33 }
 0x1c8   : > { %v572_v48 = vpop.f32.mrf.mxu3 }
 0x1c9   : > { %v595_v49 = vsel %vm354_vm0, %v572_v48, -inf }
 0x1ca   : > { %596 = vmax.xlane.f32.xlu0 %v595_v49 }
 0x1d0   : > { %v574_v50 = vpop.f32.mrf.mxu3 }
 0x1d1   : > { %v598_v51 = vsel %vm354_vm0, %v574_v50, -inf }
 0x1d2   : > { %599 = vmax.xlane.f32.xlu1 %v598_v51 }
 0x20d   : > { %v579_v52 = vpop.xlane.xlu0 %578 }
 0x20e   : > { %v601_v53 = vsub.f32 %v557_v20, %v579_v52 }
 0x210   : > { %v609_v54 = vmul.f32 1.442695, %v601_v53 }
 0x212   : > { %1002 = vpow2.f32 %v609_v54 }
 0x215   : > { %v582_v55 = vpop.xlane.xlu0 %581 }
 0x216   : > { %v602_v56 = vsub.f32 %v559_v23, %v582_v55 }
 0x218   : > { %v1003_v57 = vpop.eup %1002  ;;  %v611_v58 = vmul.f32 1.442695, %v602_v56 }
 0x219   : > { %v625_v59 = vsel %vm354_vm0, %v1003_v57, 0.0 }
 0x21a   : > { %1004 = vpow2.f32 %v611_v58  ;;  %626 = vadd.xlane.f32.xlu2 %v625_v59 }
 0x21d   : > { %v585_v60 = vpop.xlane.xlu1 %584 }
 0x21e   : > { %v603_v61 = vsub.f32 %v562_v25, %v585_v60 }
 0x220   : > { %v1005_v62 = vpop.eup %1004  ;;  %v613_v63 = vmul.f32 1.442695, %v603_v61 }
 0x221   : > { %v628_v0 = vsel %vm354_vm0, %v1005_v62, 0.0  ;;  %v649_v1 = vpack.c.bf16 %v1005_v62, %v1003_v57 }
 0x222   : > { %1006 = vpow2.f32 %v613_v63  ;;  %629 = vadd.xlane.f32.xlu0 %v628_v0 }
 0x223   : > { %941 = vmatmul.msk.bf16.vlgmr.msrb.gmra.mxu0 %vm354_vm0, %v649_v1 }
 0x225   : > { %v588_v2 = vpop.xlane.xlu1 %587 }
 0x226   : > { %v604_v3 = vsub.f32 %v564_v38, %v588_v2  ;;  %v1253_v38 = vstv %s698_s11 }
 0x228   : > { %v1007_v4 = vpop.eup %1006  ;;  %v615_v5 = vmul.f32 1.442695, %v604_v3  ;;  %v286_v3 = vld [vmem:[%s1140_s17 + $0x10] sm:$0xff]  }
 0x229   : > { %v631_v6 = vsel %vm354_vm0, %v1007_v4, 0.0 }
 0x22a   : > { %1008 = vpow2.f32 %v615_v5  ;;  %632 = vadd.xlane.f32.xlu1 %v631_v6 }
 0x22d   : > { %v591_v7 = vpop.xlane.xlu2 %590 }
 0x22e   : > { %v605_v8 = vsub.f32 %v567_v43, %v591_v7 }
 0x230   : > { %v1009_v9 = vpop.eup %1008  ;;  %v617_v10 = vmul.f32 1.442695, %v605_v8 }
 0x231   : > { %v634_v11 = vsel %vm354_vm0, %v1009_v9, 0.0  ;;  %v650_v12 = vpack.c.bf16 %v1009_v9, %v1007_v4  ;;  %v728_v9 = vunpack.c.l.bf16 %v286_v3 }
 0x232   : > { %1010 = vpow2.f32 %v617_v10  ;;  %635 = vadd.xlane.f32.xlu2 %v634_v11 }
 0x233   : > { %942 = vmatmul.msk.bf16.gmra.mxu0 %vm354_vm0, %v650_v12 }
 0x235   : > { %v594_v13 = vpop.xlane.xlu2 %593 }
 0x236   : > { %v606_v14 = vsub.f32 %v569_v46, %v594_v13 }
 0x238   : > { %v1011_v15 = vpop.eup %1010  ;;  %v619_v16 = vmul.f32 1.442695, %v606_v14 }
 0x239   : > { %v637_v17 = vsel %vm354_vm0, %v1011_v15, 0.0 }
 0x23a   : > { %1012 = vpow2.f32 %v619_v16  ;;  %638 = vadd.xlane.f32.xlu0 %v637_v17  ;;  %v729_v17 = vunpack.c.h.bf16 %v286_v3 }
 0x23d   : > { %v597_v18 = vpop.xlane.xlu0 %596 }
 0x23e   : > { %v607_v19 = vsub.f32 %v572_v48, %v597_v18 }
 0x240   : > { %v1013_v20 = vpop.eup %1012  ;;  %v621_v21 = vmul.f32 1.442695, %v607_v19 }
 0x241   : > { %v640_v22 = vsel %vm354_vm0, %v1013_v20, 0.0  ;;  %v651_v23 = vpack.c.bf16 %v1013_v20, %v1011_v15  ;;  %v288_v20 = vld [vmem:[%s1140_s17 + $0x18] sm:$0xff]  }
 0x242   : > { %1014 = vpow2.f32 %v621_v21  ;;  %641 = vadd.xlane.f32.xlu1 %v640_v22  ;;  %v731_v33 = vunpack.c.h.bf16 %v288_v20 }
 0x243   : > { %943 = vmatmul.msk.bf16.gmra.mxu0 %vm354_vm0, %v651_v23 }
 0x245   : > { %v600_v24 = vpop.xlane.xlu1 %599 }
 0x246   : > { %v608_v26 = vsub.f32 %v574_v50, %v600_v24  ;;  %v284_v50 = vld [vmem:[%s1140_s17 + $0x8] sm:$0xff]  }
 0x247   : > { %v726_v56 = vunpack.c.l.bf16 %v284_v50  ;;  %v727_v0 = vunpack.c.h.bf16 %v284_v50 }
 0x248   : > { %v1015_v27 = vpop.eup %1014  ;;  %v623_v25 = vmul.f32 1.442695, %v608_v26 }
 0x249   : > { %v643_v28 = vsel %vm354_vm0, %v1015_v27, 0.0 }
 0x24a   : > { %1016 = vpow2.f32 %v623_v25  ;;  %644 = vadd.xlane.f32.xlu2 %v643_v28 }
 0x250   : > { %v1017_v29 = vpop.eup %1016 }
 0x251   : > { %v646_v30 = vsel %vm354_vm0, %v1017_v29, 0.0  ;;  %v652_v31 = vpack.c.bf16 %v1017_v29, %v1015_v27  ;;  %v730_v27 = vunpack.c.l.bf16 %v288_v20 }
 0x252   : > { %647 = vadd.xlane.f32.xlu0 %v646_v30 }
 0x253   : > { %944 = vmatmul.msk.bf16.gmra.mxu0 %vm354_vm0, %v652_v31 }
 0x28d   : > { %v627_v32 = vpop.xlane.xlu2 %626 }
 0x28e   : > { %1018 = vrcp.f32 %v627_v32 }
 0x294   : > { %v1019_v35 = vpop.eup %1018 }
 0x295   : > { %v630_v34 = vpop.xlane.xlu0 %629 }
 0x296   : > { %1020 = vrcp.f32 %v630_v34 }
 0x29c   : > { %v1021_v44 = vpop.eup %1020 }
 0x29d   : > { %v633_v42 = vpop.xlane.xlu1 %632 }
 0x29e   : > { %1022 = vrcp.f32 %v633_v42 }
 0x2a0   : > { %v678_v37 = vpop.f32.mrf.mxu0 }
 0x2a1   : > { %v707_v39 = vmul.f32 %v1019_v35, %v678_v37 }
 0x2a3   : > { %v716_v41 = vmul.f32 %v1253_v38, %v707_v39 }
 0x2a4   : > { %v1023_v53 = vpop.eup %1022 }
 0x2a5   : > { %v732_v36 = vadd.f32 %v724_v40, %v716_v41  ;;  %v636_v51 = vpop.xlane.xlu2 %635 }
 0x2a6   : > { %1024 = vrcp.f32 %v636_v51 }
 0x2a7   : > { %v740_v43 = vpack.c.bf16 %v732_v36, %v732_v36 }
 0x2a8   : > { %v680_v45 = vpop.f32.mrf.mxu0 }
 0x2a9   : > { %749 = vst.msk [vmem:[%s1261_s14] sm:$0xf] %vm748_vm1, %v740_v43  ;;  %v708_v46 = vmul.f32 %v1021_v44, %v680_v45 }
 0x2ab   : > { %v717_v48 = vmul.f32 %v1253_v38, %v708_v46 }
 0x2ac   : > { %v1025_v61 = vpop.eup %1024 }
 0x2ad   : > { %v733_v49 = vadd.f32 %v725_v47, %v717_v48  ;;  %v639_v59 = vpop.xlane.xlu0 %638 }
 0x2ae   : > { %1026 = vrcp.f32 %v639_v59 }
 0x2af   : > { %v741_v52 = vpack.c.bf16 %v733_v49, %v733_v49 }
 0x2b0   : > { %v683_v54 = vpop.f32.mrf.mxu0 }
 0x2b1   : > { %750 = vst.msk [vmem:[%s1261_s14 + $0x4] sm:$0xf] %vm748_vm1, %v741_v52  ;;  %v709_v55 = vmul.f32 %v1023_v53, %v683_v54 }
 0x2b3   : > { %v718_v57 = vmul.f32 %v1253_v38, %v709_v55 }
 0x2b4   : > { %v1027_v6 = vpop.eup %1026 }
 0x2b5   : > { %v734_v58 = vadd.f32 %v726_v56, %v718_v57  ;;  %v642_v4 = vpop.xlane.xlu1 %641 }
 0x2b6   : > { %1028 = vrcp.f32 %v642_v4 }
 0x2b7   : > { %v742_v60 = vpack.c.bf16 %v734_v58, %v734_v58 }
 0x2b8   : > { %v685_v62 = vpop.f32.mrf.mxu0 }
 0x2b9   : > { %751 = vst.msk [vmem:[%s1261_s14 + $0x8] sm:$0xf] %vm748_vm1, %v742_v60  ;;  %v710_v63 = vmul.f32 %v1025_v61, %v685_v62 }
 0x2bb   : > { %v719_v1 = vmul.f32 %v1253_v38, %v710_v63 }
 0x2bc   : > { %v1029_v14 = vpop.eup %1028 }
 0x2bd   : > { %v735_v2 = vadd.f32 %v727_v0, %v719_v1  ;;  %v645_v12 = vpop.xlane.xlu2 %644 }
 0x2be   : > { %1030 = vrcp.f32 %v645_v12 }
 0x2bf   : > { %v743_v5 = vpack.c.bf16 %v735_v2, %v735_v2 }
 0x2c0   : > { %v688_v7 = vpop.f32.mrf.mxu0 }
 0x2c1   : > { %752 = vst.msk [vmem:[%s1261_s14 + $0xc] sm:$0xf] %vm748_vm1, %v743_v5  ;;  %v711_v8 = vmul.f32 %v1027_v6, %v688_v7 }
 0x2c3   : > { %v720_v10 = vmul.f32 %v1253_v38, %v711_v8 }
 0x2c4   : > { %v1031_v23 = vpop.eup %1030 }
 0x2c5   : > { %v736_v11 = vadd.f32 %v728_v9, %v720_v10  ;;  %v648_v21 = vpop.xlane.xlu0 %647 }
 0x2c6   : > { %1032 = vrcp.f32 %v648_v21 }
 0x2c7   : > { %v744_v13 = vpack.c.bf16 %v736_v11, %v736_v11 }
 0x2c8   : > { %v690_v15 = vpop.f32.mrf.mxu0 }
 0x2c9   : > { %753 = vst.msk [vmem:[%s1261_s14 + $0x10] sm:$0xf] %vm748_vm1, %v744_v13  ;;  %v712_v16 = vmul.f32 %v1029_v14, %v690_v15 }
 0x2cb   : > { %v721_v18 = vmul.f32 %v1253_v38, %v712_v16 }
 0x2cc   : > { %v1033_v30 = vpop.eup %1032 }
 0x2cd   : > { %v737_v19 = vadd.f32 %v729_v17, %v721_v18 }
 0x2cf   : > { %v745_v22 = vpack.c.bf16 %v737_v19, %v737_v19 }
 0x2d0   : > { %v693_v24 = vpop.f32.mrf.mxu0 }
 0x2d1   : > { %754 = vst.msk [vmem:[%s1261_s14 + $0x14] sm:$0xf] %vm748_vm1, %v745_v22  ;;  %v713_v26 = vmul.f32 %v1031_v23, %v693_v24 }
 0x2d3   : > { %v722_v25 = vmul.f32 %v1253_v38, %v713_v26 }
 0x2d5   : > { %v738_v28 = vadd.f32 %v730_v27, %v722_v25 }
 0x2d7   : > { %v746_v29 = vpack.c.bf16 %v738_v28, %v738_v28 }
 0x2d8   : > { %v695_v31 = vpop.f32.mrf.mxu0 }
 0x2d9   : > { %755 = vst.msk [vmem:[%s1261_s14 + $0x18] sm:$0xf] %vm748_vm1, %v746_v29  ;;  %v714_v32 = vmul.f32 %v1033_v30, %v695_v31 }
 0x2db   : > { %v723_v34 = vmul.f32 %v1253_v38, %v714_v32 }
 0x2dd   : > { %v739_v35 = vadd.f32 %v731_v33, %v723_v34 }
 0x2df   : > { %v747_v37 = vpack.c.bf16 %v739_v35, %v739_v35 }
 0x2e1   : > { %756 = vst.msk [vmem:[%s1261_s14 + $0x1c] sm:$0xf] %vm748_vm1, %v747_v37 }
 0x2e2 PF: > { %s17_s25 = sadd.s32 1, %s1056_s25   ;;  %s1305_s23 = smov %s1052_s24 }
 0x2e3   : > { %p14_p5 = scmp.ge.s32.totalorder %s17_s25, 4   ;;  %s1306_s24 = smov %s1308_s5 }
 0x2e5   :  { %16 = sbr.rel (!%p14_p5) target bundleno = 2 (0x2), region = 75 }

// kernel: e2ad_forward.38
= control target key start
LH: loop header
LB: loop body
LE: loop exit
PB: predicated region body
PF: predicated region fallthrough
CT: control target
= control target key end

     0   :  { %vm107_vm0 = vcmask 523264   ;;  %vm213_vm1 = vcmask 257024   ;;  %s464_s1 = inlined_call_operand.vmem [shape: bf16[64,32], index: 1, kind: input, shape index: {}]   ;;  %s465_s2 = inlined_call_operand.vmem [shape: f32[1,32], index: 2, kind: input, shape index: {}]   ;;  %s466_s0 = inlined_call_operand.vmem [shape: bf16[128,64], index: 0, kind: input, shape index: {}]   ;;  %s467_s3 = inlined_call_operand.vmem [shape: bf16[128,32], index: 3, kind: output, shape index: {}]  }
   0x1   :  { %v301_v0 = vld [vmem:[%s464_s1 + $0x18] sm:$0xff]  ;;  %v300_v1 = vld [vmem:[%s464_s1 + $0x10] sm:$0xff]  ;;  %v299_v2 = vld [vmem:[%s464_s1 + $0x8] sm:$0xff] }
   0x2   :  { %136 = vmatpush.bf16.msra.mxu0 %v301_v0  ;;  %302 = vmatpush.bf16.msra.mxu1 %v301_v0  ;;  %v298_v3 = vld [vmem:[%s464_s1] sm:$0xff]  ;;  %v292_v5 = vld [vmem:[%s466_s0 + $0x10] sm:$0xff]  ;;  %v291_v8 = vld [vmem:[%s466_s0 + $0x8] sm:$0xff] }
   0x3   :  { %303 = vmatpush.bf16.msra.mxu2 %v301_v0  ;;  %304 = vmatpush.bf16.msra.mxu3 %v301_v0  ;;  %v290_v4 = vld [vmem:[%s466_s0] sm:$0xff]  ;;  %v296_v7 = vld [vmem:[%s466_s0 + $0x30] sm:$0xff]  ;;  %v293_v9 = vld [vmem:[%s466_s0 + $0x18] sm:$0xff] }
   0x4   :  { %v294_v6 = vld [vmem:[%s466_s0 + $0x20] sm:$0xff]  ;;  %v295_v10 = vld [vmem:[%s466_s0 + $0x28] sm:$0xff]  ;;  %v297_v11 = vld [vmem:[%s466_s0 + $0x38] sm:$0xff] }
   0x5   :  { %v382_v12 = vld [vmem:[%s465_s2] ss:$0 sm:$0xff] }
   0x6   :  { %137 = vmatpush.bf16.msra.mxu0 %v300_v1  ;;  %305 = vmatpush.bf16.msra.mxu1 %v300_v1 }
   0x7   :  { %306 = vmatpush.bf16.msra.mxu2 %v300_v1  ;;  %307 = vmatpush.bf16.msra.mxu3 %v300_v1 }
   0xa   :  { %138 = vmatpush.bf16.msra.mxu0 %v299_v2  ;;  %308 = vmatpush.bf16.msra.mxu1 %v299_v2 }
   0xb   :  { %309 = vmatpush.bf16.msra.mxu2 %v299_v2  ;;  %310 = vmatpush.bf16.msra.mxu3 %v299_v2 }
   0xe   :  { %139 = vmatpush.bf16.msra.mxu0 %v298_v3  ;;  %311 = vmatpush.bf16.msra.mxu1 %v298_v3 }
   0xf   :  { %312 = vmatpush.bf16.msra.mxu2 %v298_v3  ;;  %313 = vmatpush.bf16.msra.mxu3 %v298_v3 }
  0x11   :  { %282 = vmatmul.msk.bf16.vlgmr.msra.gmra.mxu0 %vm107_vm0, %v290_v4  ;;  %284 = vmatmul.msk.bf16.vlgmr.msra.gmra.mxu1 %vm107_vm0, %v292_v5 }
  0x12   :  { %286 = vmatmul.msk.bf16.vlgmr.msra.gmra.mxu2 %vm107_vm0, %v294_v6  ;;  %288 = vmatmul.msk.bf16.vlgmr.msra.gmra.mxu3 %vm107_vm0, %v296_v7 }
  0x21   :  { %283 = vmatmul.msk.bf16.gmra.mxu0 %vm107_vm0, %v291_v8  ;;  %285 = vmatmul.msk.bf16.gmra.mxu1 %vm107_vm0, %v293_v9 }
  0x22   :  { %287 = vmatmul.msk.bf16.gmra.mxu2 %vm107_vm0, %v295_v10  ;;  %289 = vmatmul.msk.bf16.gmra.mxu3 %vm107_vm0, %v297_v11 }
  0x8e   :  { %v141_v13 = vpop.f32.mrf.mxu0  ;;  %v151_v14 = vpop.f32.mrf.mxu1 }
  0x8f   :  { %v142_v15 = vadd.f32 %v382_v12, %v141_v13  ;;  %v152_v16 = vadd.f32 %v382_v12, %v151_v14 }
  0x91   :  { %v181_v17 = vmax.f32 %v142_v15, 0.0  ;;  %v185_v18 = vmax.f32 %v152_v16, 0.0 }
  0x93   :  { %v197_v19 = vpack.c.bf16 %v181_v17, %v181_v17  ;;  %v201_v20 = vpack.c.bf16 %v185_v18, %v185_v18 }
  0x95   :  { %214 = vst.msk [vmem:[%s467_s3] sm:$0xf] %vm213_vm1, %v197_v19  ;;  %v161_v21 = vpop.f32.mrf.mxu2  ;;  %v171_v22 = vpop.f32.mrf.mxu3 }
  0x96   :  { %218 = vst.msk [vmem:[%s467_s3 + $0x10] sm:$0xf] %vm213_vm1, %v201_v20  ;;  %v162_v23 = vadd.f32 %v382_v12, %v161_v21  ;;  %v172_v24 = vadd.f32 %v382_v12, %v171_v22  ;;  %v143_v25 = vpop.f32.mrf.mxu0  ;;  %v153_v26 = vpop.f32.mrf.mxu1 }
  0x97   :  { %v144_v27 = vadd.f32 %v382_v12, %v143_v25  ;;  %v154_v28 = vadd.f32 %v382_v12, %v153_v26 }
  0x98   :  { %v189_v29 = vmax.f32 %v162_v23, 0.0  ;;  %v193_v30 = vmax.f32 %v172_v24, 0.0 }
  0x99   :  { %v182_v31 = vmax.f32 %v144_v27, 0.0  ;;  %v186_v32 = vmax.f32 %v154_v28, 0.0 }
  0x9a   :  { %v205_v33 = vpack.c.bf16 %v189_v29, %v189_v29  ;;  %v209_v34 = vpack.c.bf16 %v193_v30, %v193_v30 }
  0x9b   :  { %v198_v35 = vpack.c.bf16 %v182_v31, %v182_v31  ;;  %v202_v36 = vpack.c.bf16 %v186_v32, %v186_v32 }
  0x9c   :  { %222 = vst.msk [vmem:[%s467_s3 + $0x20] sm:$0xf] %vm213_vm1, %v205_v33 }
  0x9d   :  { %226 = vst.msk [vmem:[%s467_s3 + $0x30] sm:$0xf] %vm213_vm1, %v209_v34  ;;  %v163_v37 = vpop.f32.mrf.mxu2  ;;  %v173_v38 = vpop.f32.mrf.mxu3 }
  0x9e   :  { %215 = vst.msk [vmem:[%s467_s3 + $0x4] sm:$0xf] %vm213_vm1, %v198_v35  ;;  %v164_v39 = vadd.f32 %v382_v12, %v163_v37  ;;  %v174_v40 = vadd.f32 %v382_v12, %v173_v38  ;;  %v146_v41 = vpop.f32.mrf.mxu0  ;;  %v156_v42 = vpop.f32.mrf.mxu1 }
  0x9f   :  { %219 = vst.msk [vmem:[%s467_s3 + $0x14] sm:$0xf] %vm213_vm1, %v202_v36  ;;  %v147_v43 = vadd.f32 %v382_v12, %v146_v41  ;;  %v157_v44 = vadd.f32 %v382_v12, %v156_v42 }
  0xa0   :  { %v190_v45 = vmax.f32 %v164_v39, 0.0  ;;  %v194_v46 = vmax.f32 %v174_v40, 0.0 }
  0xa1   :  { %v183_v47 = vmax.f32 %v147_v43, 0.0  ;;  %v187_v48 = vmax.f32 %v157_v44, 0.0 }
  0xa2   :  { %v206_v49 = vpack.c.bf16 %v190_v45, %v190_v45  ;;  %v210_v50 = vpack.c.bf16 %v194_v46, %v194_v46 }
  0xa3   :  { %v199_v51 = vpack.c.bf16 %v183_v47, %v183_v47  ;;  %v203_v52 = vpack.c.bf16 %v187_v48, %v187_v48 }
  0xa4   :  { %223 = vst.msk [vmem:[%s467_s3 + $0x24] sm:$0xf] %vm213_vm1, %v206_v49 }
  0xa5   :  { %227 = vst.msk [vmem:[%s467_s3 + $0x34] sm:$0xf] %vm213_vm1, %v210_v50  ;;  %v166_v53 = vpop.f32.mrf.mxu2  ;;  %v176_v54 = vpop.f32.mrf.mxu3 }
  0xa6   :  { %216 = vst.msk [vmem:[%s467_s3 + $0x8] sm:$0xf] %vm213_vm1, %v199_v51  ;;  %v167_v55 = vadd.f32 %v382_v12, %v166_v53  ;;  %v177_v56 = vadd.f32 %v382_v12, %v176_v54  ;;  %v148_v57 = vpop.f32.mrf.mxu0  ;;  %v158_v58 = vpop.f32.mrf.mxu1 }
  0xa7   :  { %220 = vst.msk [vmem:[%s467_s3 + $0x18] sm:$0xf] %vm213_vm1, %v203_v52  ;;  %v149_v59 = vadd.f32 %v382_v12, %v148_v57  ;;  %v159_v60 = vadd.f32 %v382_v12, %v158_v58 }
  0xa8   :  { %v191_v61 = vmax.f32 %v167_v55, 0.0  ;;  %v195_v62 = vmax.f32 %v177_v56, 0.0 }
  0xa9   :  { %v184_v63 = vmax.f32 %v149_v59, 0.0  ;;  %v188_v0 = vmax.f32 %v159_v60, 0.0 }
  0xaa   :  { %v207_v1 = vpack.c.bf16 %v191_v61, %v191_v61  ;;  %v211_v2 = vpack.c.bf16 %v195_v62, %v195_v62 }
  0xab   :  { %v200_v3 = vpack.c.bf16 %v184_v63, %v184_v63  ;;  %v204_v4 = vpack.c.bf16 %v188_v0, %v188_v0 }
  0xac   :  { %224 = vst.msk [vmem:[%s467_s3 + $0x28] sm:$0xf] %vm213_vm1, %v207_v1 }
  0xad   :  { %228 = vst.msk [vmem:[%s467_s3 + $0x38] sm:$0xf] %vm213_vm1, %v211_v2  ;;  %v168_v5 = vpop.f32.mrf.mxu2  ;;  %v178_v6 = vpop.f32.mrf.mxu3 }
  0xae   :  { %217 = vst.msk [vmem:[%s467_s3 + $0xc] sm:$0xf] %vm213_vm1, %v200_v3  ;;  %v169_v7 = vadd.f32 %v382_v12, %v168_v5  ;;  %v179_v8 = vadd.f32 %v382_v12, %v178_v6 }
  0xaf   :  { %221 = vst.msk [vmem:[%s467_s3 + $0x1c] sm:$0xf] %vm213_vm1, %v204_v4 }
  0xb0   :  { %v192_v9 = vmax.f32 %v169_v7, 0.0  ;;  %v196_v10 = vmax.f32 %v179_v8, 0.0 }
  0xb2   :  { %v208_v11 = vpack.c.bf16 %v192_v9, %v192_v9  ;;  %v212_v13 = vpack.c.bf16 %v196_v10, %v196_v10 }
  0xb4   :  { %225 = vst.msk [vmem:[%s467_s3 + $0x2c] sm:$0xf] %vm213_vm1, %v208_v11 }
  0xb5   :  { %229 = vst.msk [vmem:[%s467_s3 + $0x3c] sm:$0xf] %vm213_vm1, %v212_v13 }

// kernel: e2ad_forward.37
= control target key start
LH: loop header
LB: loop body
LE: loop exit
PB: predicated region body
PF: predicated region fallthrough
CT: control target
= control target key end

     0   :  { %vm115_vm0 = vcmask 523264   ;;  %vm269_vm1 = vcmask 519168   ;;  %vm624_vm10 = vcmask 1040384   ;;  %vm626_vm11 = vcmask 1041408   ;;  %s1276_s1 = inlined_call_operand.vmem [shape: bf16[64,64], index: 1, kind: input, shape index: {}]   ;;  %s1277_s2 = inlined_call_operand.vmem [shape: f32[1,64], index: 2, kind: input, shape index: {}]   ;;  %s1278_s0 = inlined_call_operand.vmem [shape: bf16[128,64], index: 0, kind: input, shape index: {}]   ;;  %s1279_s3 = inlined_call_operand.vmem [shape: bf16[128,64], index: 3, kind: input, shape index: {}]   ;;  %s1280_s5 = inlined_call_operand.vmem [shape: bf16[128,64], index: 5, kind: output, shape index: {0}]   ;;  %s1281_s4 = inlined_call_operand.vmem [shape: bf16[128,64], index: 4, kind: input, shape index: {}]   ;;  %s1282_s6 = inlined_call_operand.vmem [shape: f32[4,128], index: 6, kind: output, shape index: {1}]  }
   0x1   :  { %v757_v0 = vld [vmem:[%s1276_s1 + $0x18] sm:$0xff]  ;;  %v756_v1 = vld [vmem:[%s1276_s1 + $0x10] sm:$0xff]  ;;  %v755_v2 = vld [vmem:[%s1276_s1 + $0x8] sm:$0xff]  ;;  %vm628_vm12 = vcmask 1042432  }
   0x2   :  { %836 = vmatpush.bf16.msra.mxu1 %v757_v0  ;;  %144 = vmatpush.bf16.msra.mxu0 %v757_v0  ;;  %v754_v3 = vld [vmem:[%s1276_s1] sm:$0xff]  ;;  %v751_v6 = vld [vmem:[%s1278_s0 + $0x28] sm:$0xff]  ;;  %v752_v8 = vld [vmem:[%s1278_s0 + $0x30] sm:$0xff] }
   0x3   :  { %v750_v4 = vld [vmem:[%s1278_s0 + $0x20] sm:$0xff]  ;;  %v747_v7 = vld [vmem:[%s1278_s0 + $0x8] sm:$0xff]  ;;  %v748_v9 = vld [vmem:[%s1278_s0 + $0x10] sm:$0xff] }
   0x4   :  { %v746_v5 = vld [vmem:[%s1278_s0] sm:$0xff]  ;;  %v753_v10 = vld [vmem:[%s1278_s0 + $0x38] sm:$0xff]  ;;  %v826_v37 = vld [vmem:[%s1279_s3 + $0x28] sm:$0xff]  }
   0x5   :  { %v749_v11 = vld [vmem:[%s1278_s0 + $0x18] sm:$0xff]  ;;  %v825_v12 = vld [vmem:[%s1279_s3 + $0x20] sm:$0xff]   ;;  %v822_v38 = vld [vmem:[%s1279_s3 + $0x8] sm:$0xff]   ;;  %v780_v44 = vunpack.c.l.bf16 %v826_v37  ;;  %v781_v61 = vunpack.c.h.bf16 %v826_v37 }
   0x6   :  { %837 = vmatpush.bf16.msra.mxu1 %v756_v1  ;;  %145 = vmatpush.bf16.msra.mxu0 %v756_v1  ;;  %v759_v13 = vld [vmem:[%s1279_s3] sm:$0xff]   ;;  %v776_v15 = vunpack.c.l.bf16 %v825_v12  ;;  %v777_v26 = vunpack.c.h.bf16 %v825_v12  ;;  %v835_v33 = vld [vmem:[%s1281_s4 + $0x38] sm:$0xff]   ;;  %v764_v46 = vunpack.c.l.bf16 %v822_v38  ;;  %v834_v52 = vld [vmem:[%s1281_s4 + $0x30] sm:$0xff]   ;;  %v765_v63 = vunpack.c.h.bf16 %v822_v38 }
   0x7   :  { %v937_v14 = vld [vmem:[%s1277_s2] ss:$0 sm:$0xff]  ;;  %v760_v16 = vunpack.c.l.bf16 %v759_v13  ;;  %v761_v28 = vunpack.c.h.bf16 %v759_v13  ;;  %v962_v34 = vunpack.c.h.bf16 %v835_v33  ;;  %v976_v42 = vunpack.c.l.bf16 %v835_v33 }
   0x8   :  { %v999_v53 = vunpack.c.h.bf16 %v834_v52  ;;  %v1008_v59 = vunpack.c.l.bf16 %v834_v52  ;;  %v828_v52 = vld [vmem:[%s1279_s3 + $0x38] sm:$0xff]  }
   0x9   :  { %v504_v39 = vmul.f32 %v962_v34, %v962_v34  ;;  %v503_v49 = vmul.f32 %v976_v42, %v976_v42 }
   0xa   :  { %838 = vmatpush.bf16.msra.mxu1 %v755_v2  ;;  %146 = vmatpush.bf16.msra.mxu0 %v755_v2  ;;  %v502_v56 = vmul.f32 %v999_v53, %v999_v53  ;;  %v501_v2 = vmul.f32 %v1008_v59, %v1008_v59 }
   0xb   :  { %729 = vmatpush.xpose.msk.msra.mxu3 %vm115_vm0, %v504_v39 }
   0xe   :  { %839 = vmatpush.bf16.msra.mxu1 %v754_v3  ;;  %147 = vmatpush.bf16.msra.mxu0 %v754_v3 }
   0xf   :  { %730 = vmatpush.xpose.msk.msra.mxu3 %vm115_vm0, %v503_v49 }
  0x11   :  { %691 = vmatmul.msk.bf16.vlgmr.msra.gmra.mxu1 %vm115_vm0, %v750_v4  ;;  %687 = vmatmul.msk.bf16.vlgmr.msra.gmra.mxu0 %vm115_vm0, %v746_v5  ;;  %v833_v5 = vld [vmem:[%s1281_s4 + $0x28] sm:$0xff]  }
  0x13   :  { %731 = vmatpush.xpose.msk.msra.mxu3 %vm115_vm0, %v502_v56 }
  0x17   :  { %732 = vmatpush.xpose.msk.msra.mxu3 %vm115_vm0, %v501_v2  ;;  %v830_v2 = vld [vmem:[%s1281_s4 + $0x10] sm:$0xff]  }
  0x21   :  { %692 = vmatmul.msk.bf16.gmra.mxu1 %vm115_vm0, %v751_v6  ;;  %688 = vmatmul.msk.bf16.gmra.mxu0 %vm115_vm0, %v747_v7  ;;  %v1030_v6 = vunpack.c.h.bf16 %v833_v5 }
  0x31   :  { %693 = vmatmul.msk.bf16.gmra.mxu1 %vm115_vm0, %v752_v8  ;;  %689 = vmatmul.msk.bf16.gmra.mxu0 %vm115_vm0, %v748_v9  ;;  %v827_v9 = vld [vmem:[%s1279_s3 + $0x30] sm:$0xff]  }
  0x32   :  { %v785_v37 = vunpack.c.h.bf16 %v827_v9 }
  0x41   :  { %694 = vmatmul.msk.bf16.gmra.mxu1 %vm115_vm0, %v753_v10  ;;  %690 = vmatmul.msk.bf16.gmra.mxu0 %vm115_vm0, %v749_v11  ;;  %v823_v10 = vld [vmem:[%s1279_s3 + $0x10] sm:$0xff]   ;;  %v500_v11 = vmul.f32 %v1030_v6, %v1030_v6 }
  0x42   :  { %v769_v39 = vunpack.c.h.bf16 %v823_v10 }
  0x43   :  { %733 = vmatpush.xpose.msk.msra.mxu3 %vm115_vm0, %v500_v11 }
  0x8e   :  { %v169_v17 = vpop.f32.mrf.mxu1  ;;  %v149_v18 = vpop.f32.mrf.mxu0 }
  0x8f   :  { %v170_v19 = vadd.f32 %v937_v14, %v169_v17  ;;  %v150_v20 = vadd.f32 %v937_v14, %v149_v18  ;;  %v784_v17 = vunpack.c.l.bf16 %v827_v9  ;;  %v1135_v9 = vunpack.c.h.bf16 %v830_v2 }
  0x91   :  { %v229_v21 = vadd.f32 %v776_v15, %v170_v19  ;;  %v221_v22 = vadd.f32 %v760_v16, %v150_v20  ;;  %v1045_v15 = vunpack.c.l.bf16 %v833_v5  ;;  %v768_v19 = vunpack.c.l.bf16 %v823_v10 }
  0x93   :  { %v941_v23 = vmax.f32 %v229_v21, 0.0  ;;  %v943_v24 = vmax.f32 %v221_v22, 0.0  ;;  %v499_v22 = vmul.f32 %v1045_v15, %v1045_v15 }
  0x95   :  { %v261_v25 = vpack.c.bf16 %v941_v23, %v941_v23  ;;  %v253_v27 = vpack.c.bf16 %v943_v24, %v943_v24  ;;  %734 = vmatpush.xpose.msk.msra.mxu3 %vm115_vm0, %v499_v22 }
  0x96   :  { %v171_v29 = vpop.f32.mrf.mxu1  ;;  %v151_v30 = vpop.f32.mrf.mxu0 }
  0x97   :  { %278 = vst.msk [vmem:[%s1280_s5 + $0x20] sm:$0xf] %vm269_vm1, %v261_v25  ;;  %v172_v31 = vadd.f32 %v937_v14, %v171_v29  ;;  %v152_v32 = vadd.f32 %v937_v14, %v151_v30 }
  0x98   :  { %270 = vst.msk [vmem:[%s1280_s5] sm:$0xf] %vm269_vm1, %v253_v27  ;;  %v832_v27 = vld [vmem:[%s1281_s4 + $0x20] sm:$0xff]  }
  0x99   :  { %v230_v35 = vadd.f32 %v777_v26, %v172_v31  ;;  %v222_v36 = vadd.f32 %v761_v28, %v152_v32  ;;  %v1067_v28 = vunpack.c.h.bf16 %v832_v27 }
  0x9b   :  { %v972_v40 = vmax.f32 %v230_v35, 0.0  ;;  %v974_v41 = vmax.f32 %v222_v36, 0.0  ;;  %v498_v31 = vmul.f32 %v1067_v28, %v1067_v28  ;;  %v1076_v35 = vunpack.c.l.bf16 %v832_v27 }
  0x9d   :  { %v262_v43 = vpack.c.bf16 %v972_v40, %v972_v40  ;;  %v254_v45 = vpack.c.bf16 %v974_v41, %v974_v41  ;;  %735 = vmatpush.xpose.msk.msra.mxu3 %vm115_vm0, %v498_v31 }
  0x9e   :  { %v174_v47 = vpop.f32.mrf.mxu1  ;;  %v154_v48 = vpop.f32.mrf.mxu0 }
  0x9f   :  { %279 = vst.msk [vmem:[%s1280_s5 + $0x24] sm:$0xf] %vm269_vm1, %v262_v43  ;;  %v175_v50 = vadd.f32 %v937_v14, %v174_v47  ;;  %v155_v51 = vadd.f32 %v937_v14, %v154_v48  ;;  %v831_v48 = vld [vmem:[%s1281_s4 + $0x18] sm:$0xff]  }
  0xa0   :  { %271 = vst.msk [vmem:[%s1280_s5 + $0x4] sm:$0xf] %vm269_vm1, %v254_v45  ;;  %v497_v45 = vmul.f32 %v1076_v35, %v1076_v35  ;;  %v1098_v49 = vunpack.c.h.bf16 %v831_v48 }
  0xa1   :  { %v231_v54 = vadd.f32 %v780_v44, %v175_v50  ;;  %v223_v55 = vadd.f32 %v764_v46, %v155_v51 }
  0xa2   :  { %736 = vmatpush.xpose.msk.msra.mxu3 %vm115_vm0, %v497_v45 }
  0xa3   :  { %v1003_v57 = vmax.f32 %v231_v54, 0.0  ;;  %v1005_v58 = vmax.f32 %v223_v55, 0.0  ;;  %v824_v54 = vld [vmem:[%s1279_s3 + $0x18] sm:$0xff]   ;;  %v496_v55 = vmul.f32 %v1098_v49, %v1098_v49 }
  0xa5   :  { %v263_v60 = vpack.c.bf16 %v1003_v57, %v1003_v57  ;;  %v255_v62 = vpack.c.bf16 %v1005_v58, %v1005_v58 }
  0xa6   :  { %v176_v0 = vpop.f32.mrf.mxu1  ;;  %v156_v1 = vpop.f32.mrf.mxu0  ;;  %737 = vmatpush.xpose.msk.msra.mxu3 %vm115_vm0, %v496_v55 }
  0xa7   :  { %280 = vst.msk [vmem:[%s1280_s5 + $0x28] sm:$0xf] %vm269_vm1, %v263_v60  ;;  %v177_v3 = vadd.f32 %v937_v14, %v176_v0  ;;  %v157_v4 = vadd.f32 %v937_v14, %v156_v1  ;;  %v772_v1 = vunpack.c.l.bf16 %v824_v54 }
  0xa8   :  { %272 = vst.msk [vmem:[%s1280_s5 + $0x8] sm:$0xf] %vm269_vm1, %v255_v62 }
  0xa9   :  { %v232_v7 = vadd.f32 %v781_v61, %v177_v3  ;;  %v224_v8 = vadd.f32 %v765_v63, %v157_v4  ;;  %v1113_v61 = vunpack.c.l.bf16 %v831_v48  ;;  %v788_v63 = vunpack.c.l.bf16 %v828_v52 }
  0xab   :  { %v1040_v12 = vmax.f32 %v232_v7, 0.0  ;;  %v1042_v13 = vmax.f32 %v224_v8, 0.0  ;;  %v495_v5 = vmul.f32 %v1113_v61, %v1113_v61 }
  0xad   :  { %v264_v16 = vpack.c.bf16 %v1040_v12, %v1040_v12  ;;  %v256_v18 = vpack.c.bf16 %v1042_v13, %v1042_v13  ;;  %738 = vmatpush.xpose.msk.msra.mxu3 %vm115_vm0, %v495_v5 }
  0xae   :  { %v179_v20 = vpop.f32.mrf.mxu1  ;;  %v159_v21 = vpop.f32.mrf.mxu0 }
  0xaf   :  { %281 = vst.msk [vmem:[%s1280_s5 + $0x2c] sm:$0xf] %vm269_vm1, %v264_v16  ;;  %v180_v25 = vadd.f32 %v937_v14, %v179_v20  ;;  %v160_v26 = vadd.f32 %v937_v14, %v159_v21  ;;  %v494_v16 = vmul.f32 %v1135_v9, %v1135_v9  ;;  %v789_v21 = vunpack.c.h.bf16 %v828_v52 }
  0xb0   :  { %273 = vst.msk [vmem:[%s1280_s5 + $0xc] sm:$0xf] %vm269_vm1, %v256_v18 }
  0xb1   :  { %v233_v29 = vadd.f32 %v784_v17, %v180_v25  ;;  %v225_v30 = vadd.f32 %v768_v19, %v160_v26  ;;  %739 = vmatpush.xpose.msk.msra.mxu3 %vm115_vm0, %v494_v16  ;;  %v1142_v19 = vunpack.c.l.bf16 %v830_v2  ;;  %v773_v25 = vunpack.c.h.bf16 %v824_v54  ;;  %v829_v26 = vld [vmem:[%s1281_s4 + $0x8] sm:$0xff]  }
  0xb2   :  { %v405_v16 = vmul.f32 %v943_v24, %v943_v24 }
  0xb3   :  { %v1071_v32 = vmax.f32 %v233_v29, 0.0  ;;  %v1073_v33 = vmax.f32 %v225_v30, 0.0  ;;  %v493_v30 = vmul.f32 %v1142_v19, %v1142_v19 }
  0xb5   :  { %v265_v36 = vpack.c.bf16 %v1071_v32, %v1071_v32  ;;  %v257_v38 = vpack.c.bf16 %v1073_v33, %v1073_v33  ;;  %740 = vmatpush.xpose.msk.msra.mxu3 %vm115_vm0, %v493_v30 }
  0xb6   :  { %v181_v43 = vpop.f32.mrf.mxu1  ;;  %v161_v44 = vpop.f32.mrf.mxu0 }
  0xb7   :  { %282 = vst.msk [vmem:[%s1280_s5 + $0x30] sm:$0xf] %vm269_vm1, %v265_v36  ;;  %v182_v46 = vadd.f32 %v937_v14, %v181_v43  ;;  %v162_v47 = vadd.f32 %v937_v14, %v161_v44 }
  0xb8   :  { %274 = vst.msk [vmem:[%s1280_s5 + $0x10] sm:$0xf] %vm269_vm1, %v257_v38 }
  0xb9   :  { %v234_v50 = vadd.f32 %v785_v37, %v182_v46  ;;  %v226_v51 = vadd.f32 %v769_v39, %v162_v47  ;;  %v1162_v37 = vunpack.c.h.bf16 %v829_v26  ;;  %v1167_v46 = vunpack.c.l.bf16 %v829_v26 }
  0xbb   :  { %v1108_v56 = vmax.f32 %v234_v50, 0.0  ;;  %v1110_v60 = vmax.f32 %v226_v51, 0.0  ;;  %v492_v43 = vmul.f32 %v1162_v37, %v1162_v37  ;;  %v791_v51 = vld [vmem:[%s1281_s4] sm:$0xff]   ;;  %v491_v52 = vmul.f32 %v1167_v46, %v1167_v46 }
  0xbd   :  { %v266_v62 = vpack.c.bf16 %v1108_v56, %v1108_v56  ;;  %v258_v0 = vpack.c.bf16 %v1110_v60, %v1110_v60  ;;  %741 = vmatpush.xpose.msk.msra.mxu3 %vm115_vm0, %v492_v43 }
  0xbe   :  { %v184_v3 = vpop.f32.mrf.mxu1  ;;  %v164_v4 = vpop.f32.mrf.mxu0 }
  0xbf   :  { %283 = vst.msk [vmem:[%s1280_s5 + $0x34] sm:$0xf] %vm269_vm1, %v266_v62  ;;  %v185_v7 = vadd.f32 %v937_v14, %v184_v3  ;;  %v165_v8 = vadd.f32 %v937_v14, %v164_v4  ;;  %v417_v3 = vmul.f32 %v1071_v32, %v1071_v32  ;;  %v416_v4 = vmul.f32 %v1040_v12, %v1040_v12 }
  0xc0   :  { %275 = vst.msk [vmem:[%s1280_s5 + $0x14] sm:$0xf] %vm269_vm1, %v258_v0  ;;  %v331_v0 = vmul.f32 %v999_v53, %v1108_v56  ;;  %v848_v53 = vmov 1.0  }
  0xc1   :  { %v235_v10 = vadd.f32 %v788_v63, %v185_v7  ;;  %v227_v11 = vadd.f32 %v772_v1, %v165_v8  ;;  %742 = vmatpush.xpose.msk.msra.mxu3 %vm115_vm0, %v491_v52  ;;  %v792_v63 = vunpack.c.l.bf16 %v791_v51  ;;  %v418_v1 = vmul.f32 %v1108_v56, %v1108_v56 }
  0xc2   :  { %v329_v56 = vmul.f32 %v1030_v6, %v1040_v12  ;;  %v327_v6 = vmul.f32 %v1067_v28, %v972_v40  ;;  %v414_v12 = vmul.f32 %v972_v40, %v972_v40  ;;  %v409_v7 = vmul.f32 %v1073_v33, %v1073_v33 }
  0xc3   :  { %v251_v17 = vmax.f32 %v235_v10, 0.0  ;;  %v1139_v18 = vmax.f32 %v227_v11, 0.0  ;;  %v489_v2 = vmul.f32 %v792_v63, %v792_v63  ;;  %v321_v8 = vmul.f32 %v1162_v37, %v1042_v13 }
  0xc4   :  { %v406_v11 = vmul.f32 %v974_v41, %v974_v41 }
  0xc5   :  { %v267_v20 = vpack.c.bf16 %v251_v17, %v251_v17  ;;  %v259_v22 = vpack.c.bf16 %v1139_v18, %v1139_v18  ;;  %v332_v54 = vmul.f32 %v976_v42, %v251_v17  ;;  %v419_v55 = vmul.f32 %v251_v17, %v251_v17 }
  0xc6   :  { %v186_v27 = vpop.f32.mrf.mxu1  ;;  %v166_v29 = vpop.f32.mrf.mxu0  ;;  %v330_v42 = vmul.f32 %v1008_v59, %v1071_v32  ;;  %v328_v59 = vmul.f32 %v1045_v15, %v1003_v57  ;;  %v415_v32 = vmul.f32 %v1003_v57, %v1003_v57  ;;  %v326_v15 = vmul.f32 %v1076_v35, %v941_v23 }
  0xc7   :  { %284 = vst.msk [vmem:[%s1280_s5 + $0x38] sm:$0xf] %vm269_vm1, %v267_v20  ;;  %v187_v31 = vadd.f32 %v937_v14, %v186_v27  ;;  %v167_v36 = vadd.f32 %v937_v14, %v166_v29  ;;  %v413_v57 = vmul.f32 %v941_v23, %v941_v23  ;;  %v324_v40 = vmul.f32 %v1113_v61, %v1139_v18 }
  0xc8   :  { %276 = vst.msk [vmem:[%s1280_s5 + $0x18] sm:$0xf] %vm269_vm1, %v259_v22  ;;  %v411_v35 = vmul.f32 %v1139_v18, %v1139_v18  ;;  %v323_v23 = vmul.f32 %v1135_v9, %v1110_v60  ;;  %v322_v61 = vmul.f32 %v1142_v19, %v1073_v33  ;;  %v320_v9 = vmul.f32 %v1167_v46, %v1005_v58 }
  0xc9   :  { %v236_v38 = vadd.f32 %v789_v21, %v187_v31  ;;  %v228_v39 = vadd.f32 %v773_v25, %v167_v36  ;;  %v407_v33 = vmul.f32 %v1005_v58, %v1005_v58 }
  0xcb   :  { %v252_v44 = vmax.f32 %v236_v38, 0.0  ;;  %v244_v45 = vmax.f32 %v228_v39, 0.0 }
  0xcd   :  { %v268_v14 = vpack.c.bf16 %v252_v44, %v252_v44  ;;  %v333_v47 = vmul.f32 %v962_v34, %v252_v44  ;;  %v420_v48 = vmul.f32 %v252_v44, %v252_v44  ;;  %v260_v50 = vpack.c.bf16 %v244_v45, %v244_v45 }
  0xce   :  { %v793_v34 = vunpack.c.h.bf16 %v791_v51  ;;  %v325_v5 = vmul.f32 %v1098_v49, %v244_v45  ;;  %v412_v28 = vmul.f32 %v244_v45, %v244_v45  ;;  %v410_v49 = vmul.f32 %v1110_v60, %v1110_v60 }
  0xcf   :  { %285 = vst.msk [vmem:[%s1280_s5 + $0x3c] sm:$0xf] %vm269_vm1, %v268_v14  ;;  %695 = vmatpush.xpose.msk.msrb.mxu1 %vm115_vm0, %v333_v47  ;;  %712 = vmatpush.xpose.msk.msra.mxu2 %vm115_vm0, %v420_v48  ;;  %v408_v60 = vmul.f32 %v1042_v13, %v1042_v13  ;;  %v318_v13 = vmul.f32 %v792_v63, %v943_v24 }
  0xd0   :  { %277 = vst.msk [vmem:[%s1280_s5 + $0x1c] sm:$0xf] %vm269_vm1, %v260_v50  ;;  %v490_v62 = vmul.f32 %v793_v34, %v793_v34  ;;  %v319_v10 = vmul.f32 %v793_v34, %v974_v41 }
  0xd2   :  { %743 = vmatpush.xpose.msk.msra.mxu3 %vm115_vm0, %v490_v62 }
  0xd3   :  { %696 = vmatpush.xpose.msk.msrb.mxu1 %vm115_vm0, %v332_v54  ;;  %713 = vmatpush.xpose.msk.msra.mxu2 %vm115_vm0, %v419_v55 }
  0xd6   :  { %744 = vmatpush.xpose.msk.msra.mxu3 %vm115_vm0, %v489_v2 }
  0xd7   :  { %697 = vmatpush.xpose.msk.msrb.mxu1 %vm115_vm0, %v331_v0  ;;  %714 = vmatpush.xpose.msk.msra.mxu2 %vm115_vm0, %v418_v1 }
  0xd9   :  { %745 = vmatmul.msk.f32.vlgmr.msra.gmra.mxu3 %vm115_vm0, %v848_v53 }
  0xdb   :  { %698 = vmatpush.xpose.msk.msrb.mxu1 %vm115_vm0, %v330_v42  ;;  %715 = vmatpush.xpose.msk.msra.mxu2 %vm115_vm0, %v417_v3 }
  0xdf   :  { %699 = vmatpush.xpose.msk.msrb.mxu1 %vm115_vm0, %v329_v56  ;;  %716 = vmatpush.xpose.msk.msra.mxu2 %vm115_vm0, %v416_v4 }
  0xe3   :  { %700 = vmatpush.xpose.msk.msrb.mxu1 %vm115_vm0, %v328_v59  ;;  %717 = vmatpush.xpose.msk.msra.mxu2 %vm115_vm0, %v415_v32 }
  0xe7   :  { %701 = vmatpush.xpose.msk.msrb.mxu1 %vm115_vm0, %v327_v6  ;;  %718 = vmatpush.xpose.msk.msra.mxu2 %vm115_vm0, %v414_v12 }
  0xeb   :  { %702 = vmatpush.xpose.msk.msrb.mxu1 %vm115_vm0, %v326_v15  ;;  %719 = vmatpush.xpose.msk.msra.mxu2 %vm115_vm0, %v413_v57 }
  0xef   :  { %703 = vmatpush.xpose.msk.msrb.mxu1 %vm115_vm0, %v325_v5  ;;  %720 = vmatpush.xpose.msk.msra.mxu2 %vm115_vm0, %v412_v28 }
  0xf3   :  { %704 = vmatpush.xpose.msk.msrb.mxu1 %vm115_vm0, %v324_v40  ;;  %721 = vmatpush.xpose.msk.msra.mxu2 %vm115_vm0, %v411_v35 }
  0xf7   :  { %705 = vmatpush.xpose.msk.msrb.mxu1 %vm115_vm0, %v323_v23  ;;  %722 = vmatpush.xpose.msk.msra.mxu2 %vm115_vm0, %v410_v49 }
  0xfb   :  { %706 = vmatpush.xpose.msk.msrb.mxu1 %vm115_vm0, %v322_v61  ;;  %723 = vmatpush.xpose.msk.msra.mxu2 %vm115_vm0, %v409_v7 }
  0xff   :  { %707 = vmatpush.xpose.msk.msrb.mxu1 %vm115_vm0, %v321_v8  ;;  %724 = vmatpush.xpose.msk.msra.mxu2 %vm115_vm0, %v408_v60 }
 0x103   :  { %708 = vmatpush.xpose.msk.msrb.mxu1 %vm115_vm0, %v320_v9  ;;  %725 = vmatpush.xpose.msk.msra.mxu2 %vm115_vm0, %v407_v33 }
 0x107   :  { %709 = vmatpush.xpose.msk.msrb.mxu1 %vm115_vm0, %v319_v10  ;;  %726 = vmatpush.xpose.msk.msra.mxu2 %vm115_vm0, %v406_v11 }
 0x10b   :  { %710 = vmatpush.xpose.msk.msrb.mxu1 %vm115_vm0, %v318_v13  ;;  %727 = vmatpush.xpose.msk.msra.mxu2 %vm115_vm0, %v405_v16 }
 0x10e   :  { %728 = vmatmul.msk.f32.vlgmr.msra.gmra.mxu2 %vm115_vm0, %v848_v53  ;;  %711 = vmatmul.msk.f32.vlgmr.msrb.gmra.mxu1 %vm115_vm0, %v848_v53 }
 0x15c   :  { %v570_v58 = vpop.f32.mrf.mxu3 }
 0x15d   :  { %842 = vrsqrt.f32 %v570_v58  ;;  %vm593_vm2 = vcmp.eq.f32.partialorder %v570_v58, inf  ;;  %v596_v31 = vand.u32 2147483648, %v570_v58  ;;  %vm595_vm3 = vcmp.eq.f32.partialorder %v570_v58, 0.0 }
 0x15e   :  { %v622_v53 = vrot.slane %v570_v58, 5 }
 0x163   :  { %v843_v41 = vpop.eup %842 }
 0x164   :  { %v587_v17 = vmul.f32 %v843_v41, %v570_v58 }
 0x166   :  { %v588_v18 = vmul.f32 %v843_v41, %v587_v17 }
 0x168   :  { %v589_v19 = vmul.f32 0.5, %v588_v18 }
 0x16a   :  { %v590_v21 = vsub.f32 1.5, %v589_v19 }
 0x16c   :  { %v591_v25 = vmul.f32 %v843_v41, %v590_v21 }
 0x16e   :  { %v592_v27 = vmul.f32 %v591_v25, %v570_v58 }
 0x170   :  { %v594_v36 = vsel %vm593_vm2, %v570_v58, %v592_v27 }
 0x171   :  { %v597_v39 = vsel %vm595_vm3, %v596_v31, %v594_v36 }
 0x172   :  { %v598_v46 = vmax.f32 %v597_v39, 1e-08 }
 0x18b   :  { %v402_v55 = vpop.f32.mrf.mxu1 }
 0x18c   :  { %v616_v1 = vrot.slane %v402_v55, 7 }
 0x191   :  { %v486_v20 = vpop.f32.mrf.mxu2 }
 0x192   :  { %844 = vrsqrt.f32 %v486_v20  ;;  %vm580_vm4 = vcmp.eq.f32.partialorder %v486_v20, inf  ;;  %v583_v43 = vand.u32 2147483648, %v486_v20  ;;  %vm582_vm5 = vcmp.eq.f32.partialorder %v486_v20, 0.0 }
 0x193   :  { %v619_v3 = vrot.slane %v486_v20, 6 }
 0x198   :  { %v845_v22 = vpop.eup %844 }
 0x199   :  { %v574_v24 = vmul.f32 %v845_v22, %v486_v20 }
 0x19b   :  { %v575_v26 = vmul.f32 %v845_v22, %v574_v24 }
 0x19d   :  { %v576_v29 = vmul.f32 0.5, %v575_v26 }
 0x19f   :  { %v577_v30 = vsub.f32 1.5, %v576_v29 }
 0x1a1   :  { %v578_v37 = vmul.f32 %v845_v22, %v577_v30 }
 0x1a3   :  { %v579_v38 = vmul.f32 %v578_v37, %v486_v20 }
 0x1a5   :  { %v581_v44 = vsel %vm580_vm4, %v486_v20, %v579_v38 }
 0x1a6   :  { %v584_v45 = vsel %vm582_vm5, %v583_v43, %v581_v44 }
 0x1a7   :  { %v585_v14 = vmax.f32 %v584_v45, 1e-08 }
 0x1a9   :  { %v599_v47 = vmul.f32 %v598_v46, %v585_v14 }
 0x1ab   :  { %846 = vrcp.f32 %v599_v47  ;;  %v611_v52 = vand.u32 2147483648, %v599_v47  ;;  %v609_v54 = vand.u32 2147483647, %v599_v47  ;;  %vm605_vm7 = vweird.f32 %v599_v47 }
 0x1ad   :  { %v612_v63 = vor.u32 1.1754944e-38, %v611_v52  ;;  %vm610_vm9 = vcmp.eq.f32.partialorder %v609_v54, 8.507059e+37 }
 0x1b1   :  { %v847_v48 = vpop.eup %846 }
 0x1b2   :  { %v601_v50 = vmul.f32 %v847_v48, %v599_v47  ;;  %vm606_vm6 = vweird.f32 %v847_v48 }
 0x1b3   :  { %vm607_vm8 = vmor %vm605_vm7, %vm606_vm6 }
 0x1b4   :  { %v602_v51 = vsub.f32 1.0, %v601_v50 }
 0x1b6   :  { %v603_v34 = vmul.f32 %v847_v48, %v602_v51 }
 0x1b8   :  { %v604_v62 = vadd.f32 %v847_v48, %v603_v34 }
 0x1ba   :  { %v608_v0 = vsel %vm607_vm8, %v847_v48, %v604_v62 }
 0x1bb   :  { %v613_v2 = vsel %vm610_vm9, %v612_v63, %v608_v0 }
 0x1bc   :  { %v614_v42 = vmul.f32 %v613_v2, %v402_v55 }
 0x1be   :  { %v625_v56 = vsel %vm624_vm10, %v614_v42, %v616_v1 }
 0x1bf   :  { %v627_v4 = vsel %vm626_vm11, %v625_v56, %v619_v3 }
 0x1c0   :  { %v629_v59 = vsel %vm628_vm12, %v627_v4, %v622_v53 }
 0x1c1   :  { %630 = vst [vmem:[%s1282_s6] sm:$0xf] %v629_v59 }

// kernel: squeeze.45
= control target key start
LH: loop header
LB: loop body
LE: loop exit
PB: predicated region body
PF: predicated region fallthrough
CT: control target
= control target key end

     0   :  { %s42_s0 = inlined_call_operand.vmem [shape: f32[512], index: 0, kind: input, shape index: {}]   ;;  %s43_s1 = inlined_call_operand.vmem [shape: f32[2,256], index: 1, kind: output, shape index: {}]  }
   0x1   :  { %v4_v0 = vld [vmem:[%s42_s0] sm:$0xf] }
   0x2   :  { %5 = vst [vmem:[#allocation1] sm:$0xf] %v4_v0 }
   0x9   :  { %v6_v1 = vld [vmem:[#allocation1] sm:$0xf]  }
   0xa   :  { %7 = vst [vmem:[#allocation0] ss:$8 sm:$0x3] %v6_v1  }
   0xb   :  { %9 = vst [vmem:[#allocation0 - $0xf] ss:$8 sm:$0xc] %v6_v1  }
  0x12   :  { %v12_v2 = vld [vmem:[#allocation0] sm:$0x3]  ;;  %v17_v3 = vld [vmem:[#allocation0 + $0x8] sm:$0x3] }
  0x13   :  { %15 = vst [vmem:[%s43_s1] sm:$0x3] %v12_v2 }
  0x14   :  { %22 = vst [vmem:[%s43_s1 + $0x2] sm:$0x3] %v17_v3 }

// kernel: squeeze.41
= control target key start
LH: loop header
LB: loop body
LE: loop exit
PB: predicated region body
PF: predicated region fallthrough
CT: control target
= control target key end

     0   :  { %vm7_vm0 = vcmask 523264   ;;  %s39_s0 = inlined_call_operand.vmem [shape: f32[128], index: 0, kind: input, shape index: {}]   ;;  %s40_s1 = inlined_call_operand.vmem [shape: f32[2,64], index: 1, kind: output, shape index: {}]  }
   0x1   :  { %v4_v0 = vld [vmem:[%s39_s0] sm:$0x1]  ;;  %s22_s0 = smov 64  }
   0x2   :  { %5 = vst [vmem:[#allocation1] sm:$0x1] %v4_v0 }
   0x9   :  { %v9_v1 = vld [vmem:[#allocation1] sm:$0x1]  }
   0xa   :  { %v6_v2 = vld [vmem:[#allocation1] sm:$0x1]   ;;  %10 = vrot.lane.b32.xlu0 %v9_v1, %s22_s0 }
   0xb   :  { %8 = vst.msk [vmem:[#allocation0] sm:$0x1] %vm7_vm0, %v6_v2  }
  0x7c   :  { %v11_v3 = vpop.permute.xlu0 %10  }
  0x7d   :  { %14 = vst.msk [vmem:[#allocation0 + $0x1] sm:$0x1] %vm7_vm0, %v11_v3  }
  0x84   :  { %v17_v4 = vld [vmem:[#allocation0] sm:$0x3] }
  0x85   :  { %20 = vst [vmem:[%s40_s1] sm:$0x3] %v17_v4 }

// kernel: squeeze.37
= control target key start
LH: loop header
LB: loop body
LE: loop exit
PB: predicated region body
PF: predicated region fallthrough
CT: control target
= control target key end

     0   :  { %vm7_vm0 = vcmask 130048   ;;  %s39_s0 = inlined_call_operand.vmem [shape: f32[32], index: 0, kind: input, shape index: {}]   ;;  %s40_s1 = inlined_call_operand.vmem [shape: f32[2,16], index: 1, kind: output, shape index: {}]  }
   0x1   :  { %v4_v0 = vld [vmem:[%s39_s0] sm:$0x1]  ;;  %s22_s0 = smov 112  }
   0x2   :  { %5 = vst [vmem:[#allocation1] sm:$0x1] %v4_v0 }
   0x9   :  { %v9_v1 = vld [vmem:[#allocation1] sm:$0x1]  }
   0xa   :  { %v6_v2 = vld [vmem:[#allocation1] sm:$0x1]   ;;  %10 = vrot.lane.b32.xlu0 %v9_v1, %s22_s0 }
   0xb   :  { %8 = vst.msk [vmem:[#allocation0] sm:$0x1] %vm7_vm0, %v6_v2  }
  0x7c   :  { %v11_v3 = vpop.permute.xlu0 %10  }
  0x7d   :  { %14 = vst.msk [vmem:[#allocation0 + $0x1] sm:$0x1] %vm7_vm0, %v11_v3  }
  0x84   :  { %v17_v4 = vld [vmem:[#allocation0] sm:$0x3] }
  0x85   :  { %20 = vst [vmem:[%s40_s1] sm:$0x3] %v17_v4 }

// kernel: e2ad_forward.39
= control target key start
LH: loop header
LB: loop body
LE: loop exit
PB: predicated region body
PF: predicated region fallthrough
CT: control target
= control target key end

     0   :  { %s1309_s9 = smov 0   ;;  %s1728_s0 = inlined_call_operand.vmem [shape: bf16[512,32], index: 0, kind: input, shape index: {}]   ;;  %s1729_s1 = inlined_call_operand.vmem [shape: bf16[512,32], index: 1, kind: input, shape index: {}]   ;;  %s1730_s2 = inlined_call_operand.vmem [shape: f32[4,512], index: 2, kind: output, shape index: {}]  }
   0x1 LB: > { %s991_s10 = sadd.s32 4294967295, %s1291_s9   ;;  %p995_p0 = scmp.ge.s32.totalorder %s1291_s9, 1  ;;  %s1291_s9 = sphi %s1309_s9, %s12_s9  }
   0x2   : > { %p124_p1 = scmp.lt.s32.totalorder %s1291_s9, 3 }
   0x4   : > { %p125_p2 = pnand %p995_p0, %p124_p1 }
   0x5   : > { %s996_s11 = sshll.u32 (!%p125_p2), %s991_s10, 5  ;;  %s1000_s19 = sshll.u32 (!%p125_p2), %s991_s10, 1 }
   0x6   : > { %128 = sbr.rel (%p125_p2) target bundleno = 326 (0x146), region = 28  ;;  %p152_p3 = scmp.lt.s32.totalorder (!%p125_p2), %s996_s11, 63 }
   0x7   : > { %p164_p4 = scmp.lt.s32.totalorder (!%p125_p2), %s1000_s19, 3 }
   0xb   : > { %s1732_s11 = smov (!%p152_p3, %s996_s11), 63  ;;  %vm329_vm0 = vcmask 261120   ;;  %s1734_s19 = smov (!%p164_p4, %s1000_s19), 3 }
   0xc   : > { %s997_s12 = sshll.u32 %s1732_s11, 2  ;;  %s1001_s20 = sshll.u32 %s1734_s19, 2 }
   0xd   : > { %s1322_s15 = scalar_lea.vmem %s1728_s0, %s997_s12  ;;  %s1327_s18 = scalar_lea.vmem %s1729_s1, %s997_s12 }
   0xe   : > { %v1240_v0 = vld [vmem:[%s1322_s15 + $0x38] sm:$0xff]   ;;  %v1239_v12 = vld [vmem:[%s1322_s15 + $0x30] sm:$0xff]   ;;  %v1238_v30 = vld [vmem:[%s1322_s15 + $0x28] sm:$0xff]   ;;  %s167_s23 = scalar_lea.vmem %s1730_s2, %s1001_s20 }
   0xf   : > { %v1255_v1 = vld [vmem:[%s1327_s18 + $0x38] sm:$0xff]   ;;  %v1136_v3 = vunpack.c.l.bf16 %v1240_v0  ;;  %v1137_v4 = vunpack.c.h.bf16 %v1240_v0  ;;  %v1254_v13 = vld [vmem:[%s1327_s18 + $0x30] sm:$0xff]   ;;  %v1133_v19 = vunpack.c.h.bf16 %v1239_v12  ;;  %v1132_v25 = vunpack.c.l.bf16 %v1239_v12  ;;  %v1253_v31 = vld [vmem:[%s1327_s18 + $0x28] sm:$0xff]  }
  0x10   : > { %v1248_v2 = vld [vmem:[%s1322_s15 + $0x78] sm:$0xff]   ;;  %v1332_v5 = vunpack.c.l.bf16 %v1255_v1  ;;  %v1334_v6 = vunpack.c.h.bf16 %v1255_v1  ;;  %v1247_v15 = vld [vmem:[%s1322_s15 + $0x70] sm:$0xff]   ;;  %v1349_v20 = vunpack.c.h.bf16 %v1254_v13  ;;  %v1357_v26 = vunpack.c.l.bf16 %v1254_v13  ;;  %v1246_v32 = vld [vmem:[%s1322_s15 + $0x68] sm:$0xff]  }
  0x11   : > { %v1263_v7 = vld [vmem:[%s1327_s18 + $0x78] sm:$0xff]   ;;  %v1168_v8 = vunpack.c.l.bf16 %v1248_v2  ;;  %v1169_v9 = vunpack.c.h.bf16 %v1248_v2  ;;  %v1262_v16 = vld [vmem:[%s1327_s18 + $0x70] sm:$0xff]   ;;  %v1165_v22 = vunpack.c.h.bf16 %v1247_v15  ;;  %v1164_v28 = vunpack.c.l.bf16 %v1247_v15  ;;  %v1261_v33 = vld [vmem:[%s1327_s18 + $0x68] sm:$0xff]  }
  0x12   : > { %v1337_v10 = vunpack.c.l.bf16 %v1263_v7  ;;  %v1339_v11 = vunpack.c.h.bf16 %v1263_v7  ;;  %v312_v14 = vmul.f32 %v1334_v6, %v1137_v4  ;;  %v311_v18 = vmul.f32 %v1332_v5, %v1136_v3  ;;  %v1237_v49 = vld [vmem:[%s1322_s15 + $0x20] sm:$0xff]   ;;  %v1236_v7 = vld [vmem:[%s1322_s15 + $0x18] sm:$0xff]  }
  0x13   : > { %v1353_v23 = vunpack.c.h.bf16 %v1262_v16  ;;  %v310_v24 = vmul.f32 %v1349_v20, %v1133_v19  ;;  %v1361_v29 = vunpack.c.l.bf16 %v1262_v16  ;;  %v309_v34 = vmul.f32 %v1357_v26, %v1132_v25  ;;  %v1252_v50 = vld [vmem:[%s1327_s18 + $0x20] sm:$0xff]   ;;  %v1244_v12 = vld [vmem:[%s1322_s15 + $0x58] sm:$0xff]  }
  0x14   : > { %v328_v17 = vmul.f32 %v1339_v11, %v1169_v9  ;;  %1002 = vmatpush.xpose.msk.msra.mxu0 %vm329_vm0, %v312_v14  ;;  %v327_v21 = vmul.f32 %v1337_v10, %v1168_v8  ;;  %v1369_v35 = vunpack.c.h.bf16 %v1238_v30  ;;  %v1371_v36 = vunpack.c.h.bf16 %v1253_v31  ;;  %v1245_v52 = vld [vmem:[%s1322_s15 + $0x60] sm:$0xff]   ;;  %v1259_v13 = vld [vmem:[%s1327_s18 + $0x58] sm:$0xff]  }
  0x15   : > { %v326_v27 = vmul.f32 %v1353_v23, %v1165_v22  ;;  %v325_v37 = vmul.f32 %v1361_v29, %v1164_v28  ;;  %v1161_v38 = vunpack.c.h.bf16 %v1246_v32  ;;  %v1375_v39 = vunpack.c.h.bf16 %v1261_v33  ;;  %v1260_v53 = vld [vmem:[%s1327_s18 + $0x60] sm:$0xff]  }
  0x16   : > { %1019 = vmatpush.xpose.msk.msra.mxu1 %vm329_vm0, %v328_v17  ;;  %v500_v40 = vmul.f32 %v1169_v9, %v1169_v9  ;;  %v484_v41 = vmul.f32 %v1137_v4, %v1137_v4  ;;  %v308_v42 = vmul.f32 %v1371_v36, %v1369_v35  ;;  %v1380_v43 = vunpack.c.l.bf16 %v1238_v30 }
  0x17   : > { %v1382_v44 = vunpack.c.l.bf16 %v1253_v31  ;;  %v499_v45 = vmul.f32 %v1168_v8, %v1168_v8  ;;  %v324_v46 = vmul.f32 %v1375_v39, %v1161_v38  ;;  %v1160_v47 = vunpack.c.l.bf16 %v1246_v32  ;;  %v1251_v8 = vld [vmem:[%s1327_s18 + $0x18] sm:$0xff]  }
  0x18   : > { %1003 = vmatpush.xpose.msk.msra.mxu0 %vm329_vm0, %v311_v18  ;;  %1053 = vmatpush.xpose.msk.msra.mxu3 %vm329_vm0, %v500_v40  ;;  %v1387_v48 = vunpack.c.l.bf16 %v1261_v33  ;;  %v483_v51 = vmul.f32 %v1136_v3, %v1136_v3  ;;  %v1397_v55 = vunpack.c.h.bf16 %v1237_v49  ;;  %v1399_v56 = vunpack.c.h.bf16 %v1252_v50  ;;  %v1235_v33 = vld [vmem:[%s1322_s15 + $0x10] sm:$0xff]  }
  0x19   : > { %1036 = vmatpush.xpose.msk.msra.mxu2 %vm329_vm0, %v484_v41  ;;  %v307_v54 = vmul.f32 %v1382_v44, %v1380_v43  ;;  %v498_v57 = vmul.f32 %v1165_v22, %v1165_v22  ;;  %v1157_v59 = vunpack.c.h.bf16 %v1245_v52  ;;  %v1404_v60 = vunpack.c.h.bf16 %v1260_v53 }
  0x1a   : > { %1020 = vmatpush.xpose.msk.msra.mxu1 %vm329_vm0, %v327_v21  ;;  %v323_v58 = vmul.f32 %v1387_v48, %v1160_v47  ;;  %v482_v61 = vmul.f32 %v1133_v19, %v1133_v19  ;;  %v306_v62 = vmul.f32 %v1399_v56, %v1397_v55  ;;  %v1410_v63 = vunpack.c.l.bf16 %v1237_v49 }
  0x1b   : > { %v1412_v0 = vunpack.c.l.bf16 %v1252_v50  ;;  %v497_v1 = vmul.f32 %v1164_v28, %v1164_v28  ;;  %v322_v2 = vmul.f32 %v1404_v60, %v1157_v59  ;;  %v1156_v3 = vunpack.c.l.bf16 %v1245_v52 }
  0x1c   : > { %1004 = vmatpush.xpose.msk.msra.mxu0 %vm329_vm0, %v310_v24  ;;  %1054 = vmatpush.xpose.msk.msra.mxu3 %vm329_vm0, %v499_v45  ;;  %v1417_v4 = vunpack.c.l.bf16 %v1260_v53  ;;  %v481_v9 = vmul.f32 %v1132_v25, %v1132_v25  ;;  %v1427_v15 = vunpack.c.h.bf16 %v1236_v7  ;;  %v1429_v16 = vunpack.c.h.bf16 %v1251_v8 }
  0x1d   : > { %1037 = vmatpush.xpose.msk.msra.mxu2 %vm329_vm0, %v483_v51  ;;  %v305_v14 = vmul.f32 %v1412_v0, %v1410_v63  ;;  %v496_v17 = vmul.f32 %v1161_v38, %v1161_v38  ;;  %v1153_v19 = vunpack.c.h.bf16 %v1244_v12  ;;  %v1434_v21 = vunpack.c.h.bf16 %v1259_v13  ;;  %v1258_v38 = vld [vmem:[%s1327_s18 + $0x50] sm:$0xff]  }
  0x1e   : > { %1021 = vmatpush.xpose.msk.msra.mxu1 %vm329_vm0, %v326_v27  ;;  %v321_v18 = vmul.f32 %v1417_v4, %v1156_v3  ;;  %v480_v22 = vmul.f32 %v1369_v35, %v1369_v35  ;;  %v304_v24 = vmul.f32 %v1429_v16, %v1427_v15  ;;  %v1442_v25 = vunpack.c.l.bf16 %v1236_v7 }
  0x1f   : > { %v1444_v27 = vunpack.c.l.bf16 %v1251_v8  ;;  %v495_v28 = vmul.f32 %v1160_v47, %v1160_v47  ;;  %v320_v30 = vmul.f32 %v1434_v21, %v1153_v19  ;;  %v1152_v31 = vunpack.c.l.bf16 %v1244_v12 }
  0x20   : > { %1005 = vmatpush.xpose.msk.msra.mxu0 %vm329_vm0, %v309_v34  ;;  %1055 = vmatpush.xpose.msk.msra.mxu3 %vm329_vm0, %v498_v57  ;;  %v1449_v32 = vunpack.c.l.bf16 %v1259_v13  ;;  %v1250_v34 = vld [vmem:[%s1327_s18 + $0x10] sm:$0xff]   ;;  %v479_v35 = vmul.f32 %v1380_v43, %v1380_v43  ;;  %v1461_v41 = vunpack.c.h.bf16 %v1235_v33  ;;  %v494_v45 = vmul.f32 %v1157_v59, %v1157_v59  ;;  %v1249_v59 = vld [vmem:[%s1327_s18 + $0x8] sm:$0xff]  }
  0x21   : > { %1038 = vmatpush.xpose.msk.msra.mxu2 %vm329_vm0, %v482_v61  ;;  %v303_v40 = vmul.f32 %v1444_v27, %v1442_v25  ;;  %v1468_v47 = vunpack.c.h.bf16 %v1258_v38  ;;  %v478_v49 = vmul.f32 %v1397_v55, %v1397_v55  ;;  %v1476_v51 = vunpack.c.l.bf16 %v1235_v33  ;;  %v1234_v55 = vld [vmem:[%s1322_s15 + $0x8] sm:$0xff]  }
  0x22   : > { %1022 = vmatpush.xpose.msk.msra.mxu1 %vm329_vm0, %v325_v37  ;;  %v1243_v37 = vld [vmem:[%s1322_s15 + $0x50] sm:$0xff]   ;;  %v1478_v52 = vunpack.c.l.bf16 %v1250_v34  ;;  %v493_v53 = vmul.f32 %v1156_v3, %v1156_v3  ;;  %v477_v61 = vmul.f32 %v1410_v63, %v1410_v63  ;;  %v1113_v3 = vunpack.c.h.bf16 %v1234_v55 }
  0x23   : > { %v1149_v43 = vunpack.c.h.bf16 %v1243_v37  ;;  %v1148_v57 = vunpack.c.l.bf16 %v1243_v37  ;;  %v1495_v7 = vunpack.c.h.bf16 %v1249_v59  ;;  %v492_v8 = vmul.f32 %v1153_v19, %v1153_v19 }
  0x24   : > { %1006 = vmatpush.xpose.msk.msra.mxu0 %vm329_vm0, %v308_v42  ;;  %1056 = vmatpush.xpose.msk.msra.mxu3 %vm329_vm0, %v497_v1  ;;  %v1463_v42 = vunpack.c.h.bf16 %v1250_v34  ;;  %v1257_v1 = vld [vmem:[%s1327_s18 + $0x48] sm:$0xff]   ;;  %v476_v13 = vmul.f32 %v1427_v15, %v1427_v15  ;;  %v491_v19 = vmul.f32 %v1152_v31, %v1152_v31  ;;  %v1171_v15 = vld [vmem:[%s1327_s18] sm:$0xff]   ;;  %v475_v33 = vmul.f32 %v1442_v25, %v1442_v25 }
  0x25   : > { %1039 = vmatpush.xpose.msk.msra.mxu2 %vm329_vm0, %v481_v9  ;;  %v1500_v12 = vunpack.c.h.bf16 %v1257_v1  ;;  %v1241_v34 = vld [vmem:[%s1322_s15 + $0x40] sm:$0xff]   ;;  %v474_v25 = vmul.f32 %v1461_v41, %v1461_v41 }
  0x26   : > { %1023 = vmatpush.xpose.msk.msra.mxu1 %vm329_vm0, %v324_v46  ;;  %v319_v46 = vmul.f32 %v1449_v32, %v1152_v31  ;;  %v302_v50 = vmul.f32 %v1463_v42, %v1461_v41  ;;  %v473_v41 = vmul.f32 %v1476_v51, %v1476_v51 }
  0x28   : > { %1007 = vmatpush.xpose.msk.msra.mxu0 %vm329_vm0, %v307_v54  ;;  %1057 = vmatpush.xpose.msk.msra.mxu3 %vm329_vm0, %v496_v17  ;;  %v318_v54 = vmul.f32 %v1468_v47, %v1149_v43  ;;  %v1112_v17 = vunpack.c.l.bf16 %v1234_v55 }
  0x29   : > { %1040 = vmatpush.xpose.msk.msra.mxu2 %vm329_vm0, %v480_v22 }
  0x2a   : > { %1024 = vmatpush.xpose.msk.msra.mxu1 %vm329_vm0, %v323_v58  ;;  %v1483_v58 = vunpack.c.l.bf16 %v1258_v38  ;;  %v1523_v38 = vunpack.c.h.bf16 %v1171_v15 }
  0x2c   : > { %1008 = vmatpush.xpose.msk.msra.mxu0 %vm329_vm0, %v306_v62  ;;  %1058 = vmatpush.xpose.msk.msra.mxu3 %vm329_vm0, %v495_v28  ;;  %v1242_v62 = vld [vmem:[%s1322_s15 + $0x48] sm:$0xff]   ;;  %v317_v9 = vmul.f32 %v1483_v58, %v1148_v57  ;;  %v1512_v28 = vunpack.c.l.bf16 %v1257_v1 }
  0x2d   : > { %1041 = vmatpush.xpose.msk.msra.mxu2 %vm329_vm0, %v479_v35  ;;  %v1145_v63 = vunpack.c.h.bf16 %v1242_v62  ;;  %v1256_v35 = vld [vmem:[%s1327_s18 + $0x40] sm:$0xff]  }
  0x2e   : > { %1025 = vmatpush.xpose.msk.msra.mxu1 %vm329_vm0, %v322_v2  ;;  %v301_v2 = vmul.f32 %v1478_v52, %v1476_v51  ;;  %v472_v51 = vmul.f32 %v1113_v3, %v1113_v3 }
  0x2f   : > { %v316_v22 = vmul.f32 %v1500_v12, %v1145_v63  ;;  %v488_v1 = vmul.f32 %v1145_v63, %v1145_v63  ;;  %v651_v63 = vmul.f32 %v1332_v5, %v1332_v5  ;;  %v666_v5 = vmul.f32 %v1353_v23, %v1353_v23 }
  0x30   : > { %1009 = vmatpush.xpose.msk.msra.mxu0 %vm329_vm0, %v305_v14  ;;  %1059 = vmatpush.xpose.msk.msra.mxu3 %vm329_vm0, %v494_v45  ;;  %v300_v14 = vmul.f32 %v1495_v7, %v1113_v3  ;;  %v665_v23 = vmul.f32 %v1361_v29, %v1361_v29  ;;  %v647_v29 = vmul.f32 %v1382_v44, %v1382_v44 }
  0x31   : > { %1042 = vmatpush.xpose.msk.msra.mxu2 %vm329_vm0, %v478_v49  ;;  %v1528_v49 = vunpack.c.h.bf16 %v1256_v35  ;;  %v645_v44 = vmul.f32 %v1412_v0, %v1412_v0  ;;  %v643_v0 = vmul.f32 %v1444_v27, %v1444_v27  ;;  %v641_v27 = vmul.f32 %v1478_v52, %v1478_v52 }
  0x32   : > { %1026 = vmatpush.xpose.msk.msra.mxu1 %vm329_vm0, %v321_v18  ;;  %v1507_v18 = vunpack.c.l.bf16 %v1249_v59  ;;  %v1140_v59 = vunpack.c.l.bf16 %v1241_v34 }
  0x34   : > { %1010 = vmatpush.xpose.msk.msra.mxu0 %vm329_vm0, %v304_v24  ;;  %1060 = vmatpush.xpose.msk.msra.mxu3 %vm329_vm0, %v493_v53  ;;  %v1144_v24 = vunpack.c.l.bf16 %v1242_v62  ;;  %v299_v31 = vmul.f32 %v1507_v18, %v1112_v17  ;;  %v639_v52 = vmul.f32 %v1507_v18, %v1507_v18 }
  0x35   : > { %1043 = vmatpush.xpose.msk.msra.mxu2 %vm329_vm0, %v477_v61  ;;  %v1540_v61 = vunpack.c.l.bf16 %v1256_v35 }
  0x36   : > { %1027 = vmatpush.xpose.msk.msra.mxu1 %vm329_vm0, %v320_v30  ;;  %v1107_v30 = vld [vmem:[%s1322_s15] sm:$0xff]   ;;  %v315_v45 = vmul.f32 %v1512_v28, %v1144_v24 }
  0x37   : > { %v1109_v37 = vunpack.c.h.bf16 %v1107_v30  ;;  %v1108_v53 = vunpack.c.l.bf16 %v1107_v30 }
  0x38   : > { %1011 = vmatpush.xpose.msk.msra.mxu0 %vm329_vm0, %v303_v40  ;;  %1061 = vmatpush.xpose.msk.msra.mxu3 %vm329_vm0, %v492_v8  ;;  %v490_v40 = vmul.f32 %v1149_v43, %v1149_v43  ;;  %v489_v43 = vmul.f32 %v1148_v57, %v1148_v57  ;;  %v313_v57 = vmul.f32 %v1540_v61, %v1140_v59 }
  0x39   : > { %1044 = vmatpush.xpose.msk.msra.mxu2 %vm329_vm0, %v476_v13  ;;  %v668_v8 = vmul.f32 %v1339_v11, %v1339_v11  ;;  %v471_v11 = vmul.f32 %v1112_v17, %v1112_v17  ;;  %v650_v13 = vmul.f32 %v1349_v20, %v1349_v20  ;;  %v485_v17 = vmul.f32 %v1140_v59, %v1140_v59 }
  0x3a   : > { %1028 = vmatpush.xpose.msk.msra.mxu1 %vm329_vm0, %v319_v46  ;;  %v1141_v46 = vunpack.c.h.bf16 %v1241_v34  ;;  %v649_v20 = vmul.f32 %v1357_v26, %v1357_v26  ;;  %v664_v26 = vmul.f32 %v1375_v39, %v1375_v39  ;;  %v646_v39 = vmul.f32 %v1399_v56, %v1399_v56 }
  0x3b   : > { %v644_v56 = vmul.f32 %v1429_v16, %v1429_v16  ;;  %v642_v16 = vmul.f32 %v1463_v42, %v1463_v42  ;;  %v640_v42 = vmul.f32 %v1495_v7, %v1495_v7  ;;  %v638_v7 = vmul.f32 %v1523_v38, %v1523_v38 }
  0x3c   : > { %1012 = vmatpush.xpose.msk.msra.mxu0 %vm329_vm0, %v302_v50  ;;  %1062 = vmatpush.xpose.msk.msra.mxu3 %vm329_vm0, %v491_v19  ;;  %v298_v50 = vmul.f32 %v1523_v38, %v1109_v37  ;;  %v314_v55 = vmul.f32 %v1528_v49, %v1141_v46  ;;  %v486_v3 = vmul.f32 %v1141_v46, %v1141_v46 }
  0x3d   : > { %1045 = vmatpush.xpose.msk.msra.mxu2 %vm329_vm0, %v475_v33  ;;  %v469_v19 = vmul.f32 %v1108_v53, %v1108_v53 }
  0x3e   : > { %1029 = vmatpush.xpose.msk.msra.mxu1 %vm329_vm0, %v318_v54  ;;  %v1535_v54 = vunpack.c.l.bf16 %v1171_v15 }
  0x40   : > { %1013 = vmatpush.xpose.msk.msra.mxu0 %vm329_vm0, %v301_v2  ;;  %1063 = vmatpush.xpose.msk.msra.mxu3 %vm329_vm0, %v490_v40  ;;  %v297_v62 = vmul.f32 %v1535_v54, %v1108_v53  ;;  %v652_v2 = vmul.f32 %v1334_v6, %v1334_v6  ;;  %v667_v6 = vmul.f32 %v1337_v10, %v1337_v10  ;;  %v1293_v10 = vmov 1.0  }
  0x41   : > { %1046 = vmatpush.xpose.msk.msra.mxu2 %vm329_vm0, %v474_v25  ;;  %v637_v18 = vmul.f32 %v1535_v54, %v1535_v54 }
  0x42   : > { %1030 = vmatpush.xpose.msk.msra.mxu1 %vm329_vm0, %v317_v9  ;;  %v487_v9 = vmul.f32 %v1144_v24, %v1144_v24  ;;  %v662_v24 = vmul.f32 %v1404_v60, %v1404_v60  ;;  %v660_v60 = vmul.f32 %v1434_v21, %v1434_v21  ;;  %v658_v21 = vmul.f32 %v1468_v47, %v1468_v47 }
  0x43   : > { %v656_v47 = vmul.f32 %v1500_v12, %v1500_v12  ;;  %v654_v12 = vmul.f32 %v1528_v49, %v1528_v49 }
  0x44   : > { %1014 = vmatpush.xpose.msk.msra.mxu0 %vm329_vm0, %v300_v14  ;;  %1064 = vmatpush.xpose.msk.msra.mxu3 %vm329_vm0, %v489_v43  ;;  %v470_v14 = vmul.f32 %v1109_v37, %v1109_v37 }
  0x45   : > { %1047 = vmatpush.xpose.msk.msra.mxu2 %vm329_vm0, %v473_v41 }
  0x46   : > { %1031 = vmatpush.xpose.msk.msra.mxu1 %vm329_vm0, %v316_v22  ;;  %v648_v22 = vmul.f32 %v1371_v36, %v1371_v36  ;;  %v663_v36 = vmul.f32 %v1387_v48, %v1387_v48  ;;  %v661_v48 = vmul.f32 %v1417_v4, %v1417_v4  ;;  %v659_v4 = vmul.f32 %v1449_v32, %v1449_v32 }
  0x47   : > { %v657_v32 = vmul.f32 %v1483_v58, %v1483_v58  ;;  %v655_v58 = vmul.f32 %v1512_v28, %v1512_v28  ;;  %v653_v28 = vmul.f32 %v1540_v61, %v1540_v61 }
  0x48   : > { %1015 = vmatpush.xpose.msk.msra.mxu0 %vm329_vm0, %v299_v31  ;;  %1065 = vmatpush.xpose.msk.msra.mxu3 %vm329_vm0, %v488_v1 }
  0x49   : > { %1048 = vmatpush.xpose.msk.msra.mxu2 %vm329_vm0, %v472_v51 }
  0x4a   : > { %1032 = vmatpush.xpose.msk.msra.mxu1 %vm329_vm0, %v315_v45 }
  0x4c   : > { %1016 = vmatpush.xpose.msk.msra.mxu0 %vm329_vm0, %v298_v50  ;;  %1066 = vmatpush.xpose.msk.msra.mxu3 %vm329_vm0, %v487_v9 }
  0x4d   : > { %1049 = vmatpush.xpose.msk.msra.mxu2 %vm329_vm0, %v471_v11 }
  0x4e   : > { %1033 = vmatpush.xpose.msk.msra.mxu1 %vm329_vm0, %v314_v55 }
  0x50   : > { %1017 = vmatpush.xpose.msk.msra.mxu0 %vm329_vm0, %v297_v62  ;;  %1067 = vmatpush.xpose.msk.msra.mxu3 %vm329_vm0, %v486_v3 }
  0x51   : > { %1050 = vmatpush.xpose.msk.msra.mxu2 %vm329_vm0, %v470_v14 }
  0x52   : > { %1034 = vmatpush.xpose.msk.msra.mxu1 %vm329_vm0, %v313_v57 }
  0x53   : > { %1018 = vmatmul.msk.f32.vlgmr.msra.gmra.mxu0 %vm329_vm0, %v1293_v10 }
  0x54   : > { %1070 = vmatpush.xpose.msk.msrb.mxu0 %vm329_vm0, %v652_v2  ;;  %1068 = vmatpush.xpose.msk.msra.mxu3 %vm329_vm0, %v485_v17 }
  0x55   : > { %1035 = vmatmul.msk.f32.vlgmr.msra.gmra.mxu1 %vm329_vm0, %v1293_v10  ;;  %1051 = vmatpush.xpose.msk.msra.mxu2 %vm329_vm0, %v469_v19 }
  0x56   : > { %1087 = vmatpush.xpose.msk.msrb.mxu1 %vm329_vm0, %v668_v8 }
  0x57   : > { %1069 = vmatmul.msk.f32.vlgmr.msra.gmra.mxu3 %vm329_vm0, %v1293_v10 }
  0x58   : > { %1071 = vmatpush.xpose.msk.msrb.mxu0 %vm329_vm0, %v651_v63  ;;  %1052 = vmatmul.msk.f32.vlgmr.msra.gmra.mxu2 %vm329_vm0, %v1293_v10 }
  0x5a   : > { %1088 = vmatpush.xpose.msk.msrb.mxu1 %vm329_vm0, %v667_v6 }
  0x5c   : > { %1072 = vmatpush.xpose.msk.msrb.mxu0 %vm329_vm0, %v650_v13 }
  0x5e   : > { %1089 = vmatpush.xpose.msk.msrb.mxu1 %vm329_vm0, %v666_v5 }
  0x60   : > { %1073 = vmatpush.xpose.msk.msrb.mxu0 %vm329_vm0, %v649_v20 }
  0x62   : > { %1090 = vmatpush.xpose.msk.msrb.mxu1 %vm329_vm0, %v665_v23 }
  0x64   : > { %1074 = vmatpush.xpose.msk.msrb.mxu0 %vm329_vm0, %v648_v22 }
  0x66   : > { %1091 = vmatpush.xpose.msk.msrb.mxu1 %vm329_vm0, %v664_v26 }
  0x68   : > { %1075 = vmatpush.xpose.msk.msrb.mxu0 %vm329_vm0, %v647_v29 }
  0x6a   : > { %1092 = vmatpush.xpose.msk.msrb.mxu1 %vm329_vm0, %v663_v36 }
  0x6c   : > { %1076 = vmatpush.xpose.msk.msrb.mxu0 %vm329_vm0, %v646_v39 }
  0x6e   : > { %1093 = vmatpush.xpose.msk.msrb.mxu1 %vm329_vm0, %v662_v24 }
  0x70   : > { %1077 = vmatpush.xpose.msk.msrb.mxu0 %vm329_vm0, %v645_v44 }
  0x72   : > { %1094 = vmatpush.xpose.msk.msrb.mxu1 %vm329_vm0, %v661_v48 }
  0x74   : > { %1078 = vmatpush.xpose.msk.msrb.mxu0 %vm329_vm0, %v644_v56 }
  0x76   : > { %1095 = vmatpush.xpose.msk.msrb.mxu1 %vm329_vm0, %v660_v60 }
  0x78   : > { %1079 = vmatpush.xpose.msk.msrb.mxu0 %vm329_vm0, %v643_v0 }
  0x7a   : > { %1096 = vmatpush.xpose.msk.msrb.mxu1 %vm329_vm0, %v659_v4 }
  0x7c   : > { %1080 = vmatpush.xpose.msk.msrb.mxu0 %vm329_vm0, %v642_v16 }
  0x7e   : > { %1097 = vmatpush.xpose.msk.msrb.mxu1 %vm329_vm0, %v658_v21 }
  0x80   : > { %1081 = vmatpush.xpose.msk.msrb.mxu0 %vm329_vm0, %v641_v27 }
  0x82   : > { %1098 = vmatpush.xpose.msk.msrb.mxu1 %vm329_vm0, %v657_v32 }
  0x84   : > { %1082 = vmatpush.xpose.msk.msrb.mxu0 %vm329_vm0, %v640_v42 }
  0x86   : > { %1099 = vmatpush.xpose.msk.msrb.mxu1 %vm329_vm0, %v656_v47 }
  0x88   : > { %1083 = vmatpush.xpose.msk.msrb.mxu0 %vm329_vm0, %v639_v52 }
  0x8a   : > { %1100 = vmatpush.xpose.msk.msrb.mxu1 %vm329_vm0, %v655_v58 }
  0x8c   : > { %1084 = vmatpush.xpose.msk.msrb.mxu0 %vm329_vm0, %v638_v7 }
  0x8e   : > { %1101 = vmatpush.xpose.msk.msrb.mxu1 %vm329_vm0, %v654_v12 }
  0x90   : > { %1085 = vmatpush.xpose.msk.msrb.mxu0 %vm329_vm0, %v637_v18 }
  0x92   : > { %1102 = vmatpush.xpose.msk.msrb.mxu1 %vm329_vm0, %v653_v28 }
  0x93   : > { %1086 = vmatmul.msk.f32.vlgmr.msrb.gmra.mxu0 %vm329_vm0, %v1293_v10 }
  0x95   : > { %1103 = vmatmul.msk.f32.vlgmr.msrb.gmra.mxu1 %vm329_vm0, %v1293_v10  ;;  %vm907_vm0 = vcmask 1040384  }
  0xd0   : > { %v1675_v35 = vpop.f32.mrf.mxu0 }
  0xd2   : > { %v1678_v37 = vpop.f32.mrf.mxu1 }
  0xda   : > { %v1669_v30 = vpop.f32.mrf.mxu3 }
  0xdb   : > { %v1671_v15 = vpop.f32.mrf.mxu2  ;;  %1273 = vrsqrt.f32 %v1669_v30  ;;  %vm824_vm1 = vcmp.eq.f32.partialorder %v1669_v30, inf  ;;  %v827_v63 = vand.u32 2147483648, %v1669_v30  ;;  %vm826_vm3 = vcmp.eq.f32.partialorder %v1669_v30, 0.0 }
  0xdc   : > { %1275 = vrsqrt.f32 %v1671_v15  ;;  %vm812_vm2 = vcmp.eq.f32.partialorder %v1671_v15, inf  ;;  %v815_v3 = vand.u32 2147483648, %v1671_v15  ;;  %vm814_vm4 = vcmp.eq.f32.partialorder %v1671_v15, 0.0 }
  0xe1   : > { %v1274_v33 = vpop.eup %1273 }
  0xe2   : > { %v1276_v34 = vpop.eup %1275  ;;  %v818_v31 = vmul.f32 %v1274_v33, %v1669_v30 }
  0xe3   : > { %v806_v38 = vmul.f32 %v1276_v34, %v1671_v15 }
  0xe4   : > { %v819_v40 = vmul.f32 %v1274_v33, %v818_v31 }
  0xe5   : > { %v807_v45 = vmul.f32 %v1276_v34, %v806_v38 }
  0xe6   : > { %v820_v46 = vmul.f32 0.5, %v819_v40 }
  0xe7   : > { %v808_v49 = vmul.f32 0.5, %v807_v45 }
  0xe8   : > { %v821_v53 = vsub.f32 1.5, %v820_v46 }
  0xe9   : > { %v809_v54 = vsub.f32 1.5, %v808_v49  ;;  %v891_v49 = vrot.slane %v1675_v35, 7 }
  0xea   : > { %v822_v55 = vmul.f32 %v1274_v33, %v821_v53 }
  0xeb   : > { %v810_v61 = vmul.f32 %v1276_v34, %v809_v54 }
  0xec   : > { %v823_v57 = vmul.f32 %v822_v55, %v1669_v30 }
  0xed   : > { %v811_v8 = vmul.f32 %v810_v61, %v1671_v15  ;;  %v897_v61 = vrot.slane %v1671_v15, 6 }
  0xee   : > { %v825_v11 = vsel %vm824_vm1, %v1669_v30, %v823_v57 }
  0xef   : > { %v813_v5 = vsel %vm812_vm2, %v1671_v15, %v811_v8  ;;  %v828_v17 = vsel %vm826_vm3, %v827_v63, %v825_v11  ;;  %vm910_vm2 = vcmask 1041408   ;;  %vm913_vm3 = vcmask 1042432  }
  0xf0   : > { %v816_v23 = vsel %vm814_vm4, %v815_v3, %v813_v5  ;;  %v830_v56 = vmax.f32 %v828_v17, 1e-08  ;;  %vm919_vm4 = vcmask 1043456  }
  0xf1   : > { %v829_v24 = vmax.f32 %v816_v23, 1e-08 }
 0x110   : > { %v1681_v25 = vpop.f32.mrf.mxu0 }
 0x111   : > { %1277 = vrsqrt.f32 %v1681_v25  ;;  %vm838_vm5 = vcmp.eq.f32.partialorder %v1681_v25, inf  ;;  %v841_v19 = vand.u32 2147483648, %v1681_v25  ;;  %vm840_vm6 = vcmp.eq.f32.partialorder %v1681_v25, 0.0 }
 0x112   : > { %v1684_v50 = vpop.f32.mrf.mxu1 }
 0x113   : > { %1279 = vrsqrt.f32 %v1684_v50  ;;  %vm850_vm7 = vcmp.eq.f32.partialorder %v1684_v50, inf  ;;  %v853_v29 = vand.u32 2147483648, %v1684_v50  ;;  %vm852_vm8 = vcmp.eq.f32.partialorder %v1684_v50, 0.0 }
 0x117   : > { %v1278_v43 = vpop.eup %1277 }
 0x118   : > { %v832_v41 = vmul.f32 %v1278_v43, %v1681_v25 }
 0x119   : > { %v1280_v59 = vpop.eup %1279 }
 0x11a   : > { %v844_v62 = vmul.f32 %v1280_v59, %v1684_v50  ;;  %v833_v1 = vmul.f32 %v1278_v43, %v832_v41 }
 0x11c   : > { %v845_v2 = vmul.f32 %v1280_v59, %v844_v62  ;;  %v834_v51 = vmul.f32 0.5, %v833_v1  ;;  %v904_v62 = vrot.slane %v1684_v50, 5 }
 0x11e   : > { %v846_v9 = vmul.f32 0.5, %v845_v2  ;;  %v835_v6 = vsub.f32 1.5, %v834_v51  ;;  %v903_v2 = vrot.slane %v1681_v25, 5 }
 0x120   : > { %v847_v13 = vsub.f32 1.5, %v846_v9  ;;  %v836_v14 = vmul.f32 %v1278_v43, %v835_v6  ;;  %v892_v43 = vrot.slane %v1678_v37, 7 }
 0x122   : > { %v848_v10 = vmul.f32 %v1280_v59, %v847_v13  ;;  %v837_v20 = vmul.f32 %v836_v14, %v1681_v25  ;;  %v898_v59 = vrot.slane %v1669_v30, 6 }
 0x124   : > { %v849_v22 = vmul.f32 %v848_v10, %v1684_v50  ;;  %v839_v26 = vsel %vm838_vm5, %v1681_v25, %v837_v20 }
 0x125   : > { %v842_v36 = vsel %vm840_vm6, %v841_v19, %v839_v26 }
 0x126   : > { %v851_v39 = vsel %vm850_vm7, %v1684_v50, %v849_v22  ;;  %v855_v44 = vmax.f32 %v842_v36, 1e-08 }
 0x127   : > { %v854_v48 = vsel %vm852_vm8, %v853_v29, %v851_v39 }
 0x128   : > { %v856_v60 = vmax.f32 %v854_v48, 1e-08  ;;  %v857_v0 = vmul.f32 %v855_v44, %v829_v24 }
 0x12a   : > { %v858_v4 = vmul.f32 %v856_v60, %v830_v56  ;;  %1281 = vrcp.f32 %v857_v0  ;;  %v870_v47 = vand.u32 2147483648, %v857_v0  ;;  %v868_v7 = vand.u32 2147483647, %v857_v0 }
 0x12b   : > { %vm864_vm11 = vweird.f32 %v857_v0 }
 0x12c   : > { %1283 = vrcp.f32 %v858_v4  ;;  %v885_v12 = vand.u32 2147483648, %v858_v4  ;;  %v883_v28 = vand.u32 2147483647, %v858_v4  ;;  %v871_v34 = vor.u32 1.1754944e-38, %v870_v47 }
 0x12d   : > { %vm879_vm13 = vweird.f32 %v858_v4  ;;  %vm869_vm14 = vcmp.eq.f32.partialorder %v868_v7, 8.507059e+37 }
 0x12e   : > { %v886_v40 = vor.u32 1.1754944e-38, %v885_v12  ;;  %vm884_vm1 = vcmp.eq.f32.partialorder %v883_v28, 8.507059e+37 }
 0x130   : > { %v1282_v16 = vpop.eup %1281 }
 0x131   : > { %v860_v27 = vmul.f32 %v1282_v16, %v857_v0  ;;  %vm865_vm9 = vweird.f32 %v1282_v16 }
 0x132   : > { %v1284_v21 = vpop.eup %1283  ;;  %vm866_vm12 = vmor %vm864_vm11, %vm865_vm9 }
 0x133   : > { %v875_v32 = vmul.f32 %v1284_v21, %v858_v4  ;;  %v861_v42 = vsub.f32 1.0, %v860_v27  ;;  %vm880_vm10 = vweird.f32 %v1284_v21 }
 0x134   : > { %vm881_vm15 = vmor %vm879_vm13, %vm880_vm10 }
 0x135   : > { %v876_v52 = vsub.f32 1.0, %v875_v32  ;;  %v862_v58 = vmul.f32 %v1282_v16, %v861_v42 }
 0x137   : > { %v877_v18 = vmul.f32 %v1284_v21, %v876_v52  ;;  %v863_v33 = vadd.f32 %v1282_v16, %v862_v58 }
 0x139   : > { %v878_v31 = vadd.f32 %v1284_v21, %v877_v18  ;;  %v867_v38 = vsel %vm866_vm12, %v1282_v16, %v863_v33 }
 0x13a   : > { %v872_v45 = vsel %vm869_vm14, %v871_v34, %v867_v38 }
 0x13b   : > { %v882_v46 = vsel %vm881_vm15, %v1284_v21, %v878_v31  ;;  %v873_v53 = vmul.f32 %v872_v45, %v1675_v35 }
 0x13c   : > { %v887_v54 = vsel %vm884_vm1, %v886_v40, %v882_v46 }
 0x13d   : > { %v888_v55 = vmul.f32 %v887_v54, %v1678_v37  ;;  %v908_v41 = vsel %vm907_vm0, %v873_v53, %v891_v49 }
 0x13e   : > { %v911_v57 = vsel %vm910_vm2, %v908_v41, %v897_v61 }
 0x13f   : > { %v909_v1 = vsel %vm907_vm0, %v888_v55, %v892_v43  ;;  %v914_v15 = vsel %vm913_vm3, %v911_v57, %v903_v2 }
 0x140   : > { %v912_v35 = vsel %vm910_vm2, %v909_v1, %v898_v59 }
 0x141   : > { %v915_v8 = vsel %vm913_vm3, %v912_v35, %v904_v62 }
 0x142   : > { %v918_v30 = vrot.slane %v915_v8, 4 }
 0x144   : > { %v920_v37 = vsel %vm919_vm4, %v914_v15, %v918_v30 }
 0x145   : > { %922 = vst [vmem:[%s167_s23] sm:$0xff] %v920_v37 }
 0x146 PF: > { %s12_s9 = sadd.s32 1, %s1291_s9  }
 0x147   : > { %p9_p5 = scmp.ge.s32.totalorder %s12_s9, 4  }
 0x149   :  { %11 = sbr.rel (!%p9_p5) target bundleno = 1 (0x1), region = 61 }

</bundles_post_ra>
